<compile_context>
chip_gen: v5e
topology: v5e:2x2
jax: 0.10.0
libtpu: 0.0.40
codegen_flags: <defaults>
</compile_context>

<pallas_src>
import jax
import jax.numpy as jnp
from jax.experimental import pallas as pl
from jax.experimental.pallas import tpu as pltpu

# ---------------- module config: BasicLayer(net_depth, dim, depth) ----------------
NET_DEPTH = 4          # only affects weight-init scale
DIM = 32               # channels (dim)
DEPTH = 2              # number of BasicBlocks
KS = 3                 # kernel_size
N, H, W = 2, 16, 16    # batch / spatial
HW = H * W
BN_EPS = 1e-5

assert H >= 3 and W >= 3, "reflect-pad neighbor indices assume H, W >= 3"
assert (W & (W - 1)) == 0, "lane->column index uses a bitwise AND (W power of 2)"


# ------------------------------- fused Pallas kernel -------------------------------

def _basic_layer_kernel(x_ref, wm_ref, wdw_ref, vec_ref, o_ref):
    # x_ref block: (1, DIM, HW)    channels-major, lane-dense (HW = 256 lanes)
    # wm_ref:  (DEPTH, 4*DIM, DIM) rows [Wv; Wg; Wsca; Wproj], (Cout, Cin) layout
    # wdw_ref: (DEPTH, DIM, 9)     depthwise taps, column index = kh*3 + kw
    # vec_ref: (DEPTH, DIM, 7)     cols [bn_scale, bn_shift, bv1, bg1, bd, bsca, bproj]
    x = x_ref[0]                                              # (DIM, HW), f32

    # lane-position masks for the reflect boundaries (hoisted out of the depth loop)
    p = jax.lax.broadcasted_iota(jnp.int32, (DIM, HW), 1)     # flattened h*W + w
    w_idx = jnp.bitwise_and(p, W - 1)                         # w  (W is a power of 2)
    is_w_first = w_idx == 0
    is_w_last = w_idx == W - 1
    is_h_first = p < W
    is_h_last = p >= HW - W

    for d in range(DEPTH):                                    # DEPTH=2 -> unrolled
        vec = vec_ref[d]                                      # (DIM, 7) per-channel cols
        bn_sc, bn_sh = vec[:, 0:1], vec[:, 1:2]
        bv1, bg1 = vec[:, 2:3], vec[:, 3:4]
        bdw, bsca, bproj = vec[:, 4:5], vec[:, 5:6], vec[:, 6:7]

        # ---- BatchNorm2d (inference affine) ----
        y = x * bn_sc + bn_sh                                 # (DIM, HW)

        # ---- fused Wv || Wg 1x1 convs: one (2C, C) @ (C, HW) MXU matmul ----
        vg = jnp.dot(wm_ref[d, 0:2 * DIM, :], y,
                     preferred_element_type=jnp.float32)      # (2C, HW)
        v = vg[0:DIM, :] + bv1
        g = jax.nn.sigmoid(vg[DIM:2 * DIM, :] + bg1)

        # ---- depthwise 3x3, reflect padding, fully in registers ----
        # lane rolls (XLU) + boundary selects (VPU); no VMEM halo scratch.
        # pltpu.roll follows jnp.roll semantics: result[p] = x[(p - shift) mod HW],
        # so shift=+1 -> value at p-1, shift=HW-1 -> value at p+1 (positive shifts only).
        wd = wdw_ref[d]                                       # (DIM, 9)
        v_wm = pltpu.roll(v, 1, axis=1)                       # value at p-1  (w-1)
        v_wp = pltpu.roll(v, HW - 1, axis=1)                  # value at p+1  (w+1)
        acc = jnp.zeros_like(v)
        for kw in range(KS):
            if kw == 0:
                c = jnp.where(is_w_first, v_wp, v_wm)         # v[h, reflect(w-1)]
            elif kw == 1:
                c = v                                         # v[h, w]
            else:
                c = jnp.where(is_w_last, v_wm, v_wp)          # v[h, reflect(w+1)]
            c_up = pltpu.roll(c, W, axis=1)                   # row h-1 (circular)
            c_dn = pltpu.roll(c, HW - W, axis=1)              # row h+1 (circular)
            r_m1 = jnp.where(is_h_first, c_dn, c_up)          # row reflect(h-1)
            r_p1 = jnp.where(is_h_last, c_up, c_dn)           # row reflect(h+1)
            acc = (acc
                   + r_m1 * wd[:, kw:kw + 1]                  # kh = 0
                   + c * wd[:, 3 + kw:4 + kw]                 # kh = 1
                   + r_p1 * wd[:, 6 + kw:7 + kw])             # kh = 2
        v = acc + bdw

        # ---- gate ----
        out = v * g

        # ---- sca: Wsca @ mean_HW(out) == mean_HW(Wsca @ out) ----
        wsca = wm_ref[d, 2 * DIM:3 * DIM, :]                  # (C, C)
        att = (jnp.sum(jnp.dot(wsca, out, preferred_element_type=jnp.float32),
                       axis=1, keepdims=True) * (1.0 / HW) + bsca)   # (C, 1)
        out = out * att

        # ---- proj (1x1 conv) + residual ----
        out = jnp.dot(wm_ref[d, 3 * DIM:4 * DIM, :], out,
                      preferred_element_type=jnp.float32) + bproj
        x = x + out

    o_ref[0] = x                                              # lane-dense (DIM, HW) store


# ------------------------------ parameter packing ------------------------------

def _bn_scale_shift(params, d):
    inv = 1.0 / jnp.sqrt(params[f"bn_var_{d}"] + BN_EPS)
    sc = params[f"bn_gamma_{d}"] * inv
    sh = params[f"bn_beta_{d}"] - params[f"bn_mean_{d}"] * sc
    return sc, sh


def pack_params(params):
    # pointwise weights -> (Cout, Cin), stacked [Wv; Wg; Wsca; Wproj] per block
    wm = jnp.stack([
        jnp.concatenate([params[f"wv1_{d}"].T, params[f"wg1_{d}"].T,
                         params[f"wsca_{d}"].T, params[f"wproj_{d}"].T], axis=0)
        for d in range(DEPTH)], axis=0)                               # (DEPTH, 4C, C)
    # depthwise taps, channel-as-sublane: (DEPTH, C, 9)
    wdw = jnp.stack([params[f"wd_{d}"].T for d in range(DEPTH)], axis=0)
    # per-channel vectors as columns: (DEPTH, C, 7)
    rows = []
    for d in range(DEPTH):
        sc, sh = _bn_scale_shift(params, d)
        rows.append(jnp.stack([sc, sh,
                               params[f"bv1_{d}"], params[f"bg1_{d}"],
                               params[f"bd_{d}"], params[f"bsca_{d}"],
                               params[f"bproj_{d}"]], axis=1))        # (C, 7)
    vec = jnp.stack(rows, axis=0)                                     # (DEPTH, C, 7)
    return wm, wdw, vec


# --------------------------------- forward wrapper ---------------------------------

def basic_layer_forward(x_nchw, params):
    n, c, h, w = x_nchw.shape
    assert (c, h, w) == (DIM, H, W)
    wm, wdw, vec = pack_params(params)
    x_flat = x_nchw.reshape(n, c, h * w)               # NCHW -> (N, C, H*W), free
    out = pl.pallas_call(
        _basic_layer_kernel,
        out_shape=jax.ShapeDtypeStruct((n, DIM, HW), jnp.float32),
        grid_spec=pltpu.PrefetchScalarGridSpec(
            num_scalar_prefetch=0,
            grid=(n,),                                 # one image per grid step
            in_specs=[
                pl.BlockSpec((1, DIM, HW), lambda i: (i, 0, 0)),
                pl.BlockSpec((DEPTH, 4 * DIM, DIM), lambda i: (0, 0, 0)),
                pl.BlockSpec((DEPTH, DIM, KS * KS), lambda i: (0, 0, 0)),
                pl.BlockSpec((DEPTH, DIM, 7), lambda i: (0, 0, 0)),
            ],
            out_specs=pl.BlockSpec((1, DIM, HW), lambda i: (i, 0, 0)),
        ),
        compiler_params=pltpu.CompilerParams(
            # v7x: one image per TensorCore; v5e/v6e: serial 2-step loop (~0.7 us
            # overhead total at this size — could collapse to grid=(1,) there).
            dimension_semantics=("parallel",),
        ),
    )(x_flat, wm, wdw, vec)
    return out.reshape(n, DIM, H, W)


# ------------------------- deterministic test parameters -------------------------

def init_params(key):
    # PyTorch's init zeroes conv biases and uses default BN stats; here we use small
    # random values everywhere so the numerical check is non-trivial.
    params = {}
    gain = (8 * NET_DEPTH) ** (-0.25)
    std_pw = gain * (2.0 / (DIM + DIM)) ** 0.5
    std_dw = gain * (2.0 / (KS * KS + KS * KS)) ** 0.5
    keys = jax.random.split(key, DEPTH * 14)
    ki = iter(keys)
    for d in range(DEPTH):
        params[f"bn_gamma_{d}"] = jax.random.uniform(next(ki), (DIM,), jnp.float32, 0.5, 1.5)
        params[f"bn_beta_{d}"] = jax.random.uniform(next(ki), (DIM,), jnp.float32, -0.1, 0.1)
        params[f"bn_mean_{d}"] = 0.1 * jax.random.normal(next(ki), (DIM,), jnp.float32)
        params[f"bn_var_{d}"] = jax.random.uniform(next(ki), (DIM,), jnp.float32, 0.5, 1.5)
        params[f"wv1_{d}"] = std_pw * jax.random.normal(next(ki), (DIM, DIM), jnp.float32)
        params[f"bv1_{d}"] = 0.01 * jax.random.normal(next(ki), (DIM,), jnp.float32)
        params[f"wd_{d}"] = std_dw * jax.random.normal(next(ki), (KS * KS, DIM), jnp.float32)
        params[f"bd_{d}"] = 0.01 * jax.random.normal(next(ki), (DIM,), jnp.float32)
        params[f"wg1_{d}"] = std_pw * jax.random.normal(next(ki), (DIM, DIM), jnp.float32)
        params[f"bg1_{d}"] = 0.01 * jax.random.normal(next(ki), (DIM,), jnp.float32)
        params[f"wsca_{d}"] = std_pw * jax.random.normal(next(ki), (DIM, DIM), jnp.float32)
        params[f"bsca_{d}"] = 0.01 * jax.random.normal(next(ki), (DIM,), jnp.float32)
        params[f"wproj_{d}"] = std_pw * jax.random.normal(next(ki), (DIM, DIM), jnp.float32)
        params[f"bproj_{d}"] = 0.01 * jax.random.normal(next(ki), (DIM,), jnp.float32)
    return params


# --------------------------- pure-JAX reference (check) ---------------------------

def basic_layer_reference(x_nchw, params):
    dn = ("NHWC", "HWIO", "NHWC")
    x = jnp.transpose(x_nchw, (0, 2, 3, 1))            # NHWC
    for d in range(DEPTH):
        sc, sh = _bn_scale_shift(params, d)
        y = x * sc + sh                                                     # BN (eval)
        v = jnp.einsum("nhwc,cd->nhwd", y, params[f"wv1_{d}"]) + params[f"bv1_{d}"]
        vp = jnp.pad(v, ((0, 0), (1, 1), (1, 1), (0, 0)), mode="reflect")
        rhs = params[f"wd_{d}"].reshape(KS, KS, 1, DIM)
        v = jax.lax.conv_general_dilated(vp, rhs, (1, 1), "VALID",
                                         dimension_numbers=dn,
                                         feature_group_count=DIM) + params[f"bd_{d}"]
        g = jax.nn.sigmoid(
            jnp.einsum("nhwc,cd->nhwd", y, params[f"wg1_{d}"]) + params[f"bg1_{d}"])
        out = v * g
        pooled = jnp.mean(out, axis=(1, 2), keepdims=True)
        att = jnp.einsum("nhwc,cd->nhwd", pooled, params[f"wsca_{d}"]) + params[f"bsca_{d}"]
        out = out * att
        out = jnp.einsum("nhwc,cd->nhwd", out, params[f"wproj_{d}"]) + params[f"bproj_{d}"]
        x = x + out
    return jnp.transpose(x, (0, 3, 1, 2))


# ---------------------------------------- main ----------------------------------------

if __name__ == "__main__":
    key = jax.random.PRNGKey(0)
    pkey, xkey = jax.random.split(key)
    params = init_params(pkey)
    x = jax.random.normal(xkey, (N, DIM, H, W), jnp.float32)   # PyTorch-style NCHW

    y = jax.jit(basic_layer_forward)(x, params)
    jax.block_until_ready(y)

    assert y.shape == (N, DIM, H, W)
    y_ref = basic_layer_reference(x, params)
    assert jnp.allclose(y, y_ref, atol=1e-4, rtol=1e-4), float(jnp.max(jnp.abs(y - y_ref)))
    print("KERNEL_OK")
</pallas_src>

<mosaic_0001>
module attributes {stable_mosaic.version = 11 : i64} {
  func.func @_basic_layer_kernel(%arg0: i32, %arg1: memref<1x32x256xf32, #tpu.memory_space<vmem>>, %arg2: memref<2x128x32xf32, #tpu.memory_space<vmem>>, %arg3: memref<2x32x9xf32, #tpu.memory_space<vmem>>, %arg4: memref<2x32x7xf32, #tpu.memory_space<vmem>>, %arg5: memref<1x32x256xf32, #tpu.memory_space<vmem>>) attributes {dimension_semantics = [#tpu.dimension_semantics<parallel>], iteration_bounds = array<i64: 2>, scalar_prefetch = 0 : i64, scratch_operands = 0 : i64, tpu.core_type = #tpu.core_type<tc>, window_params = [{transform_indices = @transform_0, window_bounds = array<i64: 1, 32, 256>}, {pipeline_mode = #tpu.pipeline_mode<synchronous>, transform_indices = @transform_1, window_bounds = array<i64: 2, 128, 32>}, {pipeline_mode = #tpu.pipeline_mode<synchronous>, transform_indices = @transform_2, window_bounds = array<i64: 2, 32, 9>}, {pipeline_mode = #tpu.pipeline_mode<synchronous>, transform_indices = @transform_3, window_bounds = array<i64: 2, 32, 7>}, {transform_indices = @transform_4, window_bounds = array<i64: 1, 32, 256>}]} {
    %c0 = arith.constant 0 : index
    %c0_0 = arith.constant 0 : index
    %c0_1 = arith.constant 0 : index
    %0 = vector.load %arg1[%c0, %c0_0, %c0_1] : memref<1x32x256xf32, #tpu.memory_space<vmem>>, vector<1x32x256xf32>
    %1 = vector.shape_cast %0 : vector<1x32x256xf32> to vector<32x256xf32>
    %2 = tpu.iota {dimensions = array<i32: 1>} : vector<32x256xi32>
    %c15_i32 = arith.constant 15 : i32
    %3 = vector.broadcast %c15_i32 : i32 to vector<32x256xi32>
    %4 = arith.andi %2, %3 : vector<32x256xi32>
    %c0_i32 = arith.constant 0 : i32
    %5 = vector.broadcast %c0_i32 : i32 to vector<32x256xi32>
    %6 = arith.cmpi eq, %4, %5 : vector<32x256xi32>
    %c15_i32_2 = arith.constant 15 : i32
    %7 = vector.broadcast %c15_i32_2 : i32 to vector<32x256xi32>
    %8 = arith.cmpi eq, %4, %7 : vector<32x256xi32>
    %c16_i32 = arith.constant 16 : i32
    %9 = vector.broadcast %c16_i32 : i32 to vector<32x256xi32>
    %10 = arith.cmpi slt, %2, %9 : vector<32x256xi32>
    %c240_i32 = arith.constant 240 : i32
    %11 = vector.broadcast %c240_i32 : i32 to vector<32x256xi32>
    %12 = arith.cmpi sge, %2, %11 : vector<32x256xi32>
    %c0_3 = arith.constant 0 : index
    %c0_4 = arith.constant 0 : index
    %c0_5 = arith.constant 0 : index
    %13 = vector.load %arg4[%c0_3, %c0_4, %c0_5] : memref<2x32x7xf32, #tpu.memory_space<vmem>>, vector<1x32x7xf32>
    %14 = vector.shape_cast %13 : vector<1x32x7xf32> to vector<32x7xf32>
    %15 = vector.extract_strided_slice %14 {offsets = [0, 0], sizes = [32, 1], strides = [1, 1]} : vector<32x7xf32> to vector<32x1xf32>
    %16 = vector.extract_strided_slice %14 {offsets = [0, 1], sizes = [32, 1], strides = [1, 1]} : vector<32x7xf32> to vector<32x1xf32>
    %17 = vector.extract_strided_slice %14 {offsets = [0, 2], sizes = [32, 1], strides = [1, 1]} : vector<32x7xf32> to vector<32x1xf32>
    %18 = vector.extract_strided_slice %14 {offsets = [0, 3], sizes = [32, 1], strides = [1, 1]} : vector<32x7xf32> to vector<32x1xf32>
    %19 = vector.extract_strided_slice %14 {offsets = [0, 4], sizes = [32, 1], strides = [1, 1]} : vector<32x7xf32> to vector<32x1xf32>
    %20 = vector.extract_strided_slice %14 {offsets = [0, 5], sizes = [32, 1], strides = [1, 1]} : vector<32x7xf32> to vector<32x1xf32>
    %21 = vector.extract_strided_slice %14 {offsets = [0, 6], sizes = [32, 1], strides = [1, 1]} : vector<32x7xf32> to vector<32x1xf32>
    %22 = vector.broadcast %15 : vector<32x1xf32> to vector<32x256xf32>
    %23 = arith.mulf %1, %22 : vector<32x256xf32>
    %24 = vector.broadcast %16 : vector<32x1xf32> to vector<32x256xf32>
    %25 = arith.addf %23, %24 : vector<32x256xf32>
    %c0_6 = arith.constant 0 : index
    %c0_7 = arith.constant 0 : index
    %c0_8 = arith.constant 0 : index
    %26 = vector.load %arg2[%c0_6, %c0_7, %c0_8] : memref<2x128x32xf32, #tpu.memory_space<vmem>>, vector<1x64x32xf32>
    %27 = vector.shape_cast %26 : vector<1x64x32xf32> to vector<64x32xf32>
    %cst = arith.constant dense<0.000000e+00> : vector<64x256xf32>
    %28 = tpu.matmul %27, %25, %cst {dimension_numbers = #tpu.dot_dimension_numbers<[1], [0], [0], [1], [0, 0, 1, 1], [], []>} : vector<64x32xf32>, vector<32x256xf32>, vector<64x256xf32> -> vector<64x256xf32>
    %29 = vector.extract_strided_slice %28 {offsets = [0, 0], sizes = [32, 256], strides = [1, 1]} : vector<64x256xf32> to vector<32x256xf32>
    %30 = vector.broadcast %17 : vector<32x1xf32> to vector<32x256xf32>
    %31 = arith.addf %29, %30 : vector<32x256xf32>
    %32 = vector.extract_strided_slice %28 {offsets = [32, 0], sizes = [32, 256], strides = [1, 1]} : vector<64x256xf32> to vector<32x256xf32>
    %33 = vector.broadcast %18 : vector<32x1xf32> to vector<32x256xf32>
    %34 = arith.addf %32, %33 : vector<32x256xf32>
    %35 = arith.negf %34 : vector<32x256xf32>
    %36 = math.exp %35 : vector<32x256xf32>
    %cst_9 = arith.constant 1.000000e+00 : f32
    %37 = vector.broadcast %cst_9 : f32 to vector<32x256xf32>
    %38 = arith.addf %37, %36 : vector<32x256xf32>
    %39 = arith.divf %37, %38 : vector<32x256xf32>
    %c0_10 = arith.constant 0 : index
    %c0_11 = arith.constant 0 : index
    %c0_12 = arith.constant 0 : index
    %40 = vector.load %arg3[%c0_10, %c0_11, %c0_12] : memref<2x32x9xf32, #tpu.memory_space<vmem>>, vector<1x32x9xf32>
    %41 = vector.shape_cast %40 : vector<1x32x9xf32> to vector<32x9xf32>
    %c1_i32 = arith.constant 1 : i32
    %42 = tpu.dynamic_rotate %31 by %c1_i32 dim 1 : vector<32x256xf32>, i32 -> vector<32x256xf32>
    %c255_i32 = arith.constant 255 : i32
    %43 = tpu.dynamic_rotate %31 by %c255_i32 dim 1 : vector<32x256xf32>, i32 -> vector<32x256xf32>
    %cst_13 = arith.constant 0.000000e+00 : f32
    %44 = vector.broadcast %cst_13 : f32 to vector<32x256xf32>
    %45 = arith.select %6, %43, %42 : vector<32x256xi1>, vector<32x256xf32>
    %c16_i32_14 = arith.constant 16 : i32
    %46 = tpu.dynamic_rotate %45 by %c16_i32_14 dim 1 : vector<32x256xf32>, i32 -> vector<32x256xf32>
    %c240_i32_15 = arith.constant 240 : i32
    %47 = tpu.dynamic_rotate %45 by %c240_i32_15 dim 1 : vector<32x256xf32>, i32 -> vector<32x256xf32>
    %48 = arith.select %10, %47, %46 : vector<32x256xi1>, vector<32x256xf32>
    %49 = arith.select %12, %46, %47 : vector<32x256xi1>, vector<32x256xf32>
    %50 = vector.extract_strided_slice %41 {offsets = [0, 0], sizes = [32, 1], strides = [1, 1]} : vector<32x9xf32> to vector<32x1xf32>
    %51 = vector.broadcast %50 : vector<32x1xf32> to vector<32x256xf32>
    %52 = arith.mulf %48, %51 : vector<32x256xf32>
    %53 = arith.addf %44, %52 : vector<32x256xf32>
    %54 = vector.extract_strided_slice %41 {offsets = [0, 3], sizes = [32, 1], strides = [1, 1]} : vector<32x9xf32> to vector<32x1xf32>
    %55 = vector.broadcast %54 : vector<32x1xf32> to vector<32x256xf32>
    %56 = arith.mulf %45, %55 : vector<32x256xf32>
    %57 = arith.addf %53, %56 : vector<32x256xf32>
    %58 = vector.extract_strided_slice %41 {offsets = [0, 6], sizes = [32, 1], strides = [1, 1]} : vector<32x9xf32> to vector<32x1xf32>
    %59 = vector.broadcast %58 : vector<32x1xf32> to vector<32x256xf32>
    %60 = arith.mulf %49, %59 : vector<32x256xf32>
    %61 = arith.addf %57, %60 : vector<32x256xf32>
    %c16_i32_16 = arith.constant 16 : i32
    %62 = tpu.dynamic_rotate %31 by %c16_i32_16 dim 1 : vector<32x256xf32>, i32 -> vector<32x256xf32>
    %c240_i32_17 = arith.constant 240 : i32
    %63 = tpu.dynamic_rotate %31 by %c240_i32_17 dim 1 : vector<32x256xf32>, i32 -> vector<32x256xf32>
    %64 = arith.select %10, %63, %62 : vector<32x256xi1>, vector<32x256xf32>
    %65 = arith.select %12, %62, %63 : vector<32x256xi1>, vector<32x256xf32>
    %66 = vector.extract_strided_slice %41 {offsets = [0, 1], sizes = [32, 1], strides = [1, 1]} : vector<32x9xf32> to vector<32x1xf32>
    %67 = vector.broadcast %66 : vector<32x1xf32> to vector<32x256xf32>
    %68 = arith.mulf %64, %67 : vector<32x256xf32>
    %69 = arith.addf %61, %68 : vector<32x256xf32>
    %70 = vector.extract_strided_slice %41 {offsets = [0, 4], sizes = [32, 1], strides = [1, 1]} : vector<32x9xf32> to vector<32x1xf32>
    %71 = vector.broadcast %70 : vector<32x1xf32> to vector<32x256xf32>
    %72 = arith.mulf %31, %71 : vector<32x256xf32>
    %73 = arith.addf %69, %72 : vector<32x256xf32>
    %74 = vector.extract_strided_slice %41 {offsets = [0, 7], sizes = [32, 1], strides = [1, 1]} : vector<32x9xf32> to vector<32x1xf32>
    %75 = vector.broadcast %74 : vector<32x1xf32> to vector<32x256xf32>
    %76 = arith.mulf %65, %75 : vector<32x256xf32>
    %77 = arith.addf %73, %76 : vector<32x256xf32>
    %78 = arith.select %8, %42, %43 : vector<32x256xi1>, vector<32x256xf32>
    %c16_i32_18 = arith.constant 16 : i32
    %79 = tpu.dynamic_rotate %78 by %c16_i32_18 dim 1 : vector<32x256xf32>, i32 -> vector<32x256xf32>
    %c240_i32_19 = arith.constant 240 : i32
    %80 = tpu.dynamic_rotate %78 by %c240_i32_19 dim 1 : vector<32x256xf32>, i32 -> vector<32x256xf32>
    %81 = arith.select %10, %80, %79 : vector<32x256xi1>, vector<32x256xf32>
    %82 = arith.select %12, %79, %80 : vector<32x256xi1>, vector<32x256xf32>
    %83 = vector.extract_strided_slice %41 {offsets = [0, 2], sizes = [32, 1], strides = [1, 1]} : vector<32x9xf32> to vector<32x1xf32>
    %84 = vector.broadcast %83 : vector<32x1xf32> to vector<32x256xf32>
    %85 = arith.mulf %81, %84 : vector<32x256xf32>
    %86 = arith.addf %77, %85 : vector<32x256xf32>
    %87 = vector.extract_strided_slice %41 {offsets = [0, 5], sizes = [32, 1], strides = [1, 1]} : vector<32x9xf32> to vector<32x1xf32>
    %88 = vector.broadcast %87 : vector<32x1xf32> to vector<32x256xf32>
    %89 = arith.mulf %78, %88 : vector<32x256xf32>
    %90 = arith.addf %86, %89 : vector<32x256xf32>
    %91 = vector.extract_strided_slice %41 {offsets = [0, 8], sizes = [32, 1], strides = [1, 1]} : vector<32x9xf32> to vector<32x1xf32>
    %92 = vector.broadcast %91 : vector<32x1xf32> to vector<32x256xf32>
    %93 = arith.mulf %82, %92 : vector<32x256xf32>
    %94 = arith.addf %90, %93 : vector<32x256xf32>
    %95 = vector.broadcast %19 : vector<32x1xf32> to vector<32x256xf32>
    %96 = arith.addf %94, %95 : vector<32x256xf32>
    %97 = arith.mulf %96, %39 : vector<32x256xf32>
    %c0_20 = arith.constant 0 : index
    %c64 = arith.constant 64 : index
    %c0_21 = arith.constant 0 : index
    %98 = vector.load %arg2[%c0_20, %c64, %c0_21] : memref<2x128x32xf32, #tpu.memory_space<vmem>>, vector<1x32x32xf32>
    %99 = vector.shape_cast %98 : vector<1x32x32xf32> to vector<32x32xf32>
    %cst_22 = arith.constant dense<0.000000e+00> : vector<32x256xf32>
    %100 = tpu.matmul %99, %97, %cst_22 {dimension_numbers = #tpu.dot_dimension_numbers<[1], [0], [0], [1], [0, 0, 1, 1], [], []>} : vector<32x32xf32>, vector<32x256xf32>, vector<32x256xf32> -> vector<32x256xf32>
    %cst_23 = arith.constant dense<0.000000e+00> : vector<32xf32>
    %101 = vector.multi_reduction <add>, %100, %cst_23 [1] : vector<32x256xf32> to vector<32xf32>
    %102 = vector.shape_cast %101 : vector<32xf32> to vector<32x1xf32>
    %cst_24 = arith.constant 3.906250e-03 : f32
    %103 = vector.broadcast %cst_24 : f32 to vector<32x1xf32>
    %104 = arith.mulf %102, %103 : vector<32x1xf32>
    %105 = arith.addf %104, %20 : vector<32x1xf32>
    %106 = vector.broadcast %105 : vector<32x1xf32> to vector<32x256xf32>
    %107 = arith.mulf %97, %106 : vector<32x256xf32>
    %c0_25 = arith.constant 0 : index
    %c96 = arith.constant 96 : index
    %c0_26 = arith.constant 0 : index
    %108 = vector.load %arg2[%c0_25, %c96, %c0_26] : memref<2x128x32xf32, #tpu.memory_space<vmem>>, vector<1x32x32xf32>
    %109 = vector.shape_cast %108 : vector<1x32x32xf32> to vector<32x32xf32>
    %cst_27 = arith.constant dense<0.000000e+00> : vector<32x256xf32>
    %110 = tpu.matmul %109, %107, %cst_27 {dimension_numbers = #tpu.dot_dimension_numbers<[1], [0], [0], [1], [0, 0, 1, 1], [], []>} : vector<32x32xf32>, vector<32x256xf32>, vector<32x256xf32> -> vector<32x256xf32>
    %111 = vector.broadcast %21 : vector<32x1xf32> to vector<32x256xf32>
    %112 = arith.addf %110, %111 : vector<32x256xf32>
    %113 = arith.addf %1, %112 : vector<32x256xf32>
    %c1 = arith.constant 1 : index
    %c0_28 = arith.constant 0 : index
    %c0_29 = arith.constant 0 : index
    %114 = vector.load %arg4[%c1, %c0_28, %c0_29] : memref<2x32x7xf32, #tpu.memory_space<vmem>>, vector<1x32x7xf32>
    %115 = vector.shape_cast %114 : vector<1x32x7xf32> to vector<32x7xf32>
    %116 = vector.extract_strided_slice %115 {offsets = [0, 0], sizes = [32, 1], strides = [1, 1]} : vector<32x7xf32> to vector<32x1xf32>
    %117 = vector.extract_strided_slice %115 {offsets = [0, 1], sizes = [32, 1], strides = [1, 1]} : vector<32x7xf32> to vector<32x1xf32>
    %118 = vector.extract_strided_slice %115 {offsets = [0, 2], sizes = [32, 1], strides = [1, 1]} : vector<32x7xf32> to vector<32x1xf32>
    %119 = vector.extract_strided_slice %115 {offsets = [0, 3], sizes = [32, 1], strides = [1, 1]} : vector<32x7xf32> to vector<32x1xf32>
    %120 = vector.extract_strided_slice %115 {offsets = [0, 4], sizes = [32, 1], strides = [1, 1]} : vector<32x7xf32> to vector<32x1xf32>
    %121 = vector.extract_strided_slice %115 {offsets = [0, 5], sizes = [32, 1], strides = [1, 1]} : vector<32x7xf32> to vector<32x1xf32>
    %122 = vector.extract_strided_slice %115 {offsets = [0, 6], sizes = [32, 1], strides = [1, 1]} : vector<32x7xf32> to vector<32x1xf32>
    %123 = vector.broadcast %116 : vector<32x1xf32> to vector<32x256xf32>
    %124 = arith.mulf %113, %123 : vector<32x256xf32>
    %125 = vector.broadcast %117 : vector<32x1xf32> to vector<32x256xf32>
    %126 = arith.addf %124, %125 : vector<32x256xf32>
    %c1_30 = arith.constant 1 : index
    %c0_31 = arith.constant 0 : index
    %c0_32 = arith.constant 0 : index
    %127 = vector.load %arg2[%c1_30, %c0_31, %c0_32] : memref<2x128x32xf32, #tpu.memory_space<vmem>>, vector<1x64x32xf32>
    %128 = vector.shape_cast %127 : vector<1x64x32xf32> to vector<64x32xf32>
    %cst_33 = arith.constant dense<0.000000e+00> : vector<64x256xf32>
    %129 = tpu.matmul %128, %126, %cst_33 {dimension_numbers = #tpu.dot_dimension_numbers<[1], [0], [0], [1], [0, 0, 1, 1], [], []>} : vector<64x32xf32>, vector<32x256xf32>, vector<64x256xf32> -> vector<64x256xf32>
    %130 = vector.extract_strided_slice %129 {offsets = [0, 0], sizes = [32, 256], strides = [1, 1]} : vector<64x256xf32> to vector<32x256xf32>
    %131 = vector.broadcast %118 : vector<32x1xf32> to vector<32x256xf32>
    %132 = arith.addf %130, %131 : vector<32x256xf32>
    %133 = vector.extract_strided_slice %129 {offsets = [32, 0], sizes = [32, 256], strides = [1, 1]} : vector<64x256xf32> to vector<32x256xf32>
    %134 = vector.broadcast %119 : vector<32x1xf32> to vector<32x256xf32>
    %135 = arith.addf %133, %134 : vector<32x256xf32>
    %136 = arith.negf %135 : vector<32x256xf32>
    %137 = math.exp %136 : vector<32x256xf32>
    %cst_34 = arith.constant 1.000000e+00 : f32
    %138 = vector.broadcast %cst_34 : f32 to vector<32x256xf32>
    %139 = arith.addf %138, %137 : vector<32x256xf32>
    %140 = arith.divf %138, %139 : vector<32x256xf32>
    %c1_35 = arith.constant 1 : index
    %c0_36 = arith.constant 0 : index
    %c0_37 = arith.constant 0 : index
    %141 = vector.load %arg3[%c1_35, %c0_36, %c0_37] : memref<2x32x9xf32, #tpu.memory_space<vmem>>, vector<1x32x9xf32>
    %142 = vector.shape_cast %141 : vector<1x32x9xf32> to vector<32x9xf32>
    %c1_i32_38 = arith.constant 1 : i32
    %143 = tpu.dynamic_rotate %132 by %c1_i32_38 dim 1 : vector<32x256xf32>, i32 -> vector<32x256xf32>
    %c255_i32_39 = arith.constant 255 : i32
    %144 = tpu.dynamic_rotate %132 by %c255_i32_39 dim 1 : vector<32x256xf32>, i32 -> vector<32x256xf32>
    %cst_40 = arith.constant 0.000000e+00 : f32
    %145 = vector.broadcast %cst_40 : f32 to vector<32x256xf32>
    %146 = arith.select %6, %144, %143 : vector<32x256xi1>, vector<32x256xf32>
    %c16_i32_41 = arith.constant 16 : i32
    %147 = tpu.dynamic_rotate %146 by %c16_i32_41 dim 1 : vector<32x256xf32>, i32 -> vector<32x256xf32>
    %c240_i32_42 = arith.constant 240 : i32
    %148 = tpu.dynamic_rotate %146 by %c240_i32_42 dim 1 : vector<32x256xf32>, i32 -> vector<32x256xf32>
    %149 = arith.select %10, %148, %147 : vector<32x256xi1>, vector<32x256xf32>
    %150 = arith.select %12, %147, %148 : vector<32x256xi1>, vector<32x256xf32>
    %151 = vector.extract_strided_slice %142 {offsets = [0, 0], sizes = [32, 1], strides = [1, 1]} : vector<32x9xf32> to vector<32x1xf32>
    %152 = vector.broadcast %151 : vector<32x1xf32> to vector<32x256xf32>
    %153 = arith.mulf %149, %152 : vector<32x256xf32>
    %154 = arith.addf %145, %153 : vector<32x256xf32>
    %155 = vector.extract_strided_slice %142 {offsets = [0, 3], sizes = [32, 1], strides = [1, 1]} : vector<32x9xf32> to vector<32x1xf32>
    %156 = vector.broadcast %155 : vector<32x1xf32> to vector<32x256xf32>
    %157 = arith.mulf %146, %156 : vector<32x256xf32>
    %158 = arith.addf %154, %157 : vector<32x256xf32>
    %159 = vector.extract_strided_slice %142 {offsets = [0, 6], sizes = [32, 1], strides = [1, 1]} : vector<32x9xf32> to vector<32x1xf32>
    %160 = vector.broadcast %159 : vector<32x1xf32> to vector<32x256xf32>
    %161 = arith.mulf %150, %160 : vector<32x256xf32>
    %162 = arith.addf %158, %161 : vector<32x256xf32>
    %c16_i32_43 = arith.constant 16 : i32
    %163 = tpu.dynamic_rotate %132 by %c16_i32_43 dim 1 : vector<32x256xf32>, i32 -> vector<32x256xf32>
    %c240_i32_44 = arith.constant 240 : i32
    %164 = tpu.dynamic_rotate %132 by %c240_i32_44 dim 1 : vector<32x256xf32>, i32 -> vector<32x256xf32>
    %165 = arith.select %10, %164, %163 : vector<32x256xi1>, vector<32x256xf32>
    %166 = arith.select %12, %163, %164 : vector<32x256xi1>, vector<32x256xf32>
    %167 = vector.extract_strided_slice %142 {offsets = [0, 1], sizes = [32, 1], strides = [1, 1]} : vector<32x9xf32> to vector<32x1xf32>
    %168 = vector.broadcast %167 : vector<32x1xf32> to vector<32x256xf32>
    %169 = arith.mulf %165, %168 : vector<32x256xf32>
    %170 = arith.addf %162, %169 : vector<32x256xf32>
    %171 = vector.extract_strided_slice %142 {offsets = [0, 4], sizes = [32, 1], strides = [1, 1]} : vector<32x9xf32> to vector<32x1xf32>
    %172 = vector.broadcast %171 : vector<32x1xf32> to vector<32x256xf32>
    %173 = arith.mulf %132, %172 : vector<32x256xf32>
    %174 = arith.addf %170, %173 : vector<32x256xf32>
    %175 = vector.extract_strided_slice %142 {offsets = [0, 7], sizes = [32, 1], strides = [1, 1]} : vector<32x9xf32> to vector<32x1xf32>
    %176 = vector.broadcast %175 : vector<32x1xf32> to vector<32x256xf32>
    %177 = arith.mulf %166, %176 : vector<32x256xf32>
    %178 = arith.addf %174, %177 : vector<32x256xf32>
    %179 = arith.select %8, %143, %144 : vector<32x256xi1>, vector<32x256xf32>
    %c16_i32_45 = arith.constant 16 : i32
    %180 = tpu.dynamic_rotate %179 by %c16_i32_45 dim 1 : vector<32x256xf32>, i32 -> vector<32x256xf32>
    %c240_i32_46 = arith.constant 240 : i32
    %181 = tpu.dynamic_rotate %179 by %c240_i32_46 dim 1 : vector<32x256xf32>, i32 -> vector<32x256xf32>
    %182 = arith.select %10, %181, %180 : vector<32x256xi1>, vector<32x256xf32>
    %183 = arith.select %12, %180, %181 : vector<32x256xi1>, vector<32x256xf32>
    %184 = vector.extract_strided_slice %142 {offsets = [0, 2], sizes = [32, 1], strides = [1, 1]} : vector<32x9xf32> to vector<32x1xf32>
    %185 = vector.broadcast %184 : vector<32x1xf32> to vector<32x256xf32>
    %186 = arith.mulf %182, %185 : vector<32x256xf32>
    %187 = arith.addf %178, %186 : vector<32x256xf32>
    %188 = vector.extract_strided_slice %142 {offsets = [0, 5], sizes = [32, 1], strides = [1, 1]} : vector<32x9xf32> to vector<32x1xf32>
    %189 = vector.broadcast %188 : vector<32x1xf32> to vector<32x256xf32>
    %190 = arith.mulf %179, %189 : vector<32x256xf32>
    %191 = arith.addf %187, %190 : vector<32x256xf32>
    %192 = vector.extract_strided_slice %142 {offsets = [0, 8], sizes = [32, 1], strides = [1, 1]} : vector<32x9xf32> to vector<32x1xf32>
    %193 = vector.broadcast %192 : vector<32x1xf32> to vector<32x256xf32>
    %194 = arith.mulf %183, %193 : vector<32x256xf32>
    %195 = arith.addf %191, %194 : vector<32x256xf32>
    %196 = vector.broadcast %120 : vector<32x1xf32> to vector<32x256xf32>
    %197 = arith.addf %195, %196 : vector<32x256xf32>
    %198 = arith.mulf %197, %140 : vector<32x256xf32>
    %c1_47 = arith.constant 1 : index
    %c64_48 = arith.constant 64 : index
    %c0_49 = arith.constant 0 : index
    %199 = vector.load %arg2[%c1_47, %c64_48, %c0_49] : memref<2x128x32xf32, #tpu.memory_space<vmem>>, vector<1x32x32xf32>
    %200 = vector.shape_cast %199 : vector<1x32x32xf32> to vector<32x32xf32>
    %cst_50 = arith.constant dense<0.000000e+00> : vector<32x256xf32>
    %201 = tpu.matmul %200, %198, %cst_50 {dimension_numbers = #tpu.dot_dimension_numbers<[1], [0], [0], [1], [0, 0, 1, 1], [], []>} : vector<32x32xf32>, vector<32x256xf32>, vector<32x256xf32> -> vector<32x256xf32>
    %cst_51 = arith.constant dense<0.000000e+00> : vector<32xf32>
    %202 = vector.multi_reduction <add>, %201, %cst_51 [1] : vector<32x256xf32> to vector<32xf32>
    %203 = vector.shape_cast %202 : vector<32xf32> to vector<32x1xf32>
    %cst_52 = arith.constant 3.906250e-03 : f32
    %204 = vector.broadcast %cst_52 : f32 to vector<32x1xf32>
    %205 = arith.mulf %203, %204 : vector<32x1xf32>
    %206 = arith.addf %205, %121 : vector<32x1xf32>
    %207 = vector.broadcast %206 : vector<32x1xf32> to vector<32x256xf32>
    %208 = arith.mulf %198, %207 : vector<32x256xf32>
    %c1_53 = arith.constant 1 : index
    %c96_54 = arith.constant 96 : index
    %c0_55 = arith.constant 0 : index
    %209 = vector.load %arg2[%c1_53, %c96_54, %c0_55] : memref<2x128x32xf32, #tpu.memory_space<vmem>>, vector<1x32x32xf32>
    %210 = vector.shape_cast %209 : vector<1x32x32xf32> to vector<32x32xf32>
    %cst_56 = arith.constant dense<0.000000e+00> : vector<32x256xf32>
    %211 = tpu.matmul %210, %208, %cst_56 {dimension_numbers = #tpu.dot_dimension_numbers<[1], [0], [0], [1], [0, 0, 1, 1], [], []>} : vector<32x32xf32>, vector<32x256xf32>, vector<32x256xf32> -> vector<32x256xf32>
    %212 = vector.broadcast %122 : vector<32x1xf32> to vector<32x256xf32>
    %213 = arith.addf %211, %212 : vector<32x256xf32>
    %214 = arith.addf %113, %213 : vector<32x256xf32>
    %c0_57 = arith.constant 0 : index
    %c0_58 = arith.constant 0 : index
    %c0_59 = arith.constant 0 : index
    %215 = vector.load %arg5[%c0_57, %c0_58, %c0_59] : memref<1x32x256xf32, #tpu.memory_space<vmem>>, vector<1x32x256xf32>
    %216 = vector.shape_cast %215 : vector<1x32x256xf32> to vector<32x256xf32>
    %217 = vector.shape_cast %214 : vector<32x256xf32> to vector<1x32x256xf32>
    tpu.vector_store %arg5[%c0_57, %c0_58, %c0_59], %217 {strides = array<i32>} : memref<1x32x256xf32, #tpu.memory_space<vmem>>, vector<1x32x256xf32>,
    return
  }
  func.func @transform_0(%arg0: i32) -> (i32, i32, i32) {
    %c0_i32 = arith.constant 0 : i32
    %c0_i32_0 = arith.constant 0 : i32
    %c0_i32_1 = arith.constant 0 : i32
    return %arg0, %c0_i32, %c0_i32_0 : i32, i32, i32
  }
  func.func @transform_1(%arg0: i32) -> (i32, i32, i32) {
    %c0_i32 = arith.constant 0 : i32
    %c0_i32_0 = arith.constant 0 : i32
    %c0_i32_1 = arith.constant 0 : i32
    %c0_i32_2 = arith.constant 0 : i32
    return %c0_i32, %c0_i32_0, %c0_i32_1 : i32, i32, i32
  }
  func.func @transform_2(%arg0: i32) -> (i32, i32, i32) {
    %c0_i32 = arith.constant 0 : i32
    %c0_i32_0 = arith.constant 0 : i32
    %c0_i32_1 = arith.constant 0 : i32
    %c0_i32_2 = arith.constant 0 : i32
    return %c0_i32, %c0_i32_0, %c0_i32_1 : i32, i32, i32
  }
  func.func @transform_3(%arg0: i32) -> (i32, i32, i32) {
    %c0_i32 = arith.constant 0 : i32
    %c0_i32_0 = arith.constant 0 : i32
    %c0_i32_1 = arith.constant 0 : i32
    %c0_i32_2 = arith.constant 0 : i32
    return %c0_i32, %c0_i32_0, %c0_i32_1 : i32, i32, i32
  }
  func.func @transform_4(%arg0: i32) -> (i32, i32, i32) {
    %c0_i32 = arith.constant 0 : i32
    %c0_i32_0 = arith.constant 0 : i32
    %c0_i32_1 = arith.constant 0 : i32
    return %arg0, %c0_i32, %c0_i32_0 : i32, i32, i32
  }
}

</mosaic_0001>

<bundles_post_ra>
// kernel: basic_layer_forward.1
= control target key start
LH: loop header
LB: loop body
LE: loop exit
PB: predicated region body
PF: predicated region fallthrough
CT: control target
= control target key end

     0   :  { %s2992_s15 = smov 0   ;;  %s5571_s0 = inlined_call_operand.vmem [shape: f32[2,32,256], index: 0, kind: input, shape index: {}]   ;;  %s5572_s1 = inlined_call_operand.vmem [shape: f32[2,128,32], index: 1, kind: input, shape index: {}]   ;;  %s5573_s2 = inlined_call_operand.vmem [shape: f32[2,32,9], index: 2, kind: input, shape index: {}]   ;;  %s5574_s3 = inlined_call_operand.vmem [shape: f32[2,32,7], index: 3, kind: input, shape index: {}]   ;;  %s5575_s4 = inlined_call_operand.vmem [shape: f32[2,32,256], index: 4, kind: output, shape index: {}]  }
   0x1 LB: > { %s2637_s16 = sadd.s32 4294967295, %s2952_s15   ;;  %p2641_p0 = scmp.ge.s32.totalorder %s2952_s15, 1  ;;  %s2952_s15 = sphi %s2992_s15, %s14_s15  }
   0x2   : > { %p162_p1 = scmp.lt.s32.totalorder %s2952_s15, 3 }
   0x4   : > { %p163_p2 = pnand %p2641_p0, %p162_p1 }
   0x6   : > { %166 = sbr.rel (%p163_p2) target bundleno = 2255 (0x8cf), region = 36 }
   0xb   : > { %v3003_v0 = vld [vmem:[%s5574_s3 + $0x18] sm:$0xff]  ;;  %v5588_v1 = vmov 0   ;;  %v5584_v2 = vmov 1   ;;  %v3012_v3 = vld [vmem:[%s5574_s3 + $0x10] sm:$0xff]  ;;  %v3019_v4 = vld [vmem:[%s5574_s3 + $0x8] sm:$0xff]  ;;  %v5582_v6 = vmov 2  }
   0xc   : > { %2775 = vset.pattern.permute.xlu0 %v5588_v1  ;;  %2776 = vset.pattern.permute.xlu1 %v5584_v2  ;;  %v3027_v5 = vld [vmem:[%s5574_s3] sm:$0xff]  ;;  %v5580_v7 = vmov 3   ;;  %v3045_v8 = vld [vmem:[%s5573_s2 + $0x18] sm:$0xff]  ;;  %v5586_v9 = vmov 6   ;;  %v3056_v10 = vld [vmem:[%s5573_s2 + $0x10] sm:$0xff]  ;;  %v5578_v13 = vmov 7  }
   0xd   : > { %240 = vperm.xlu0 %2775, %v3003_v0   ;;  %264 = vperm.xlu1 %2776, %v3003_v0   ;;  %v3064_v11 = vld [vmem:[%s5573_s2] sm:$0xff]  ;;  %v3077_v12 = vld [vmem:[%s5573_s2 + $0x8] sm:$0xff]  ;;  %p188_p3 = scmp.lt.s32.totalorder %s2637_s16, 1  ;;  %v5592_v31 = vmov 4   ;;  %vm5642_vm0 = vcmask 261120   ;;  %v277_v49 = vld [vmem:[%s5572_s1 + $0x10] sm:$0xff] }
   0xe   : > { %2778 = vset.pattern.permute.xlu2 %v5584_v2  ;;  %v275_v47 = vld [vmem:[%s5572_s1] sm:$0xff]  ;;  %v276_v48 = vld [vmem:[%s5572_s1 + $0x8] sm:$0xff]  ;;  %v278_v50 = vld [vmem:[%s5572_s1 + $0x18] sm:$0xff]  ;;  %v5590_v53 = vmov 5   ;;  %v5576_v55 = vmov 8   ;;  %s2963_s29 = smov 1  }
   0xf   : > { %260 = vperm.xlu2 %2778, %v3012_v3   ;;  %s6118_s16 = smov (!%p188_p3, %s2637_s16), 1  ;;  %v279_v51 = vld [vmem:[%s5572_s1 + $0x20] sm:$0xff]  ;;  %v280_v52 = vld [vmem:[%s5572_s1 + $0x28] sm:$0xff]  ;;  %v281_v54 = vld [vmem:[%s5572_s1 + $0x30] sm:$0xff]  ;;  %s2964_s30 = smov 127  }
  0x10   : > { %s2752_s7 = sshll.u32 %s6118_s16, 6  ;;  %v282_v56 = vld [vmem:[%s5572_s1 + $0x38] sm:$0xff]  ;;  %s2965_s5 = smov 112  }
  0x11   : > { %s3104_s10 = scalar_lea.vmem %s5571_s0, %s2752_s7  ;;  %s2966_s6 = smov 16  }
  0x12   : > { %v204_v14 = vld [vmem:[%s3104_s10 + $0x30] sm:$0xff]  ;;  %v205_v15 = vld [vmem:[%s3104_s10 + $0x38] sm:$0xff]  ;;  %v202_v23 = vld [vmem:[%s3104_s10 + $0x20] sm:$0xff] }
  0x13   : > { %v203_v24 = vld [vmem:[%s3104_s10 + $0x28] sm:$0xff]  ;;  %v198_v33 = vld [vmem:[%s3104_s10] sm:$0xff]  ;;  %v200_v35 = vld [vmem:[%s3104_s10 + $0x10] sm:$0xff] }
  0x14   : > { %v199_v34 = vld [vmem:[%s3104_s10 + $0x8] sm:$0xff]  ;;  %v201_v36 = vld [vmem:[%s3104_s10 + $0x18] sm:$0xff] }
  0x15   : > { %235 = vperm.xlu0 %2775, %v3012_v3   ;;  %2777 = vset.pattern.permute.xlu1 %v5588_v1 }
  0x16   : > { %230 = vperm.xlu1 %2777, %v3019_v4  }
  0x17   : > { %2779 = vset.pattern.permute.xlu2 %v5588_v1 }
  0x18   : > { %225 = vperm.xlu2 %2779, %v3027_v5  }
  0x1d   : > { %2780 = vset.pattern.permute.xlu0 %v5584_v2 }
  0x1e   : > { %256 = vperm.xlu0 %2780, %v3019_v4   ;;  %2781 = vset.pattern.permute.xlu1 %v5584_v2 }
  0x1f   : > { %252 = vperm.xlu1 %2781, %v3027_v5  }
  0x20   : > { %2782 = vset.pattern.permute.xlu2 %v5582_v6 }
  0x21   : > { %403 = vperm.xlu2 %2782, %v3003_v0  }
  0x26   : > { %2784 = vset.pattern.permute.xlu0 %v5580_v7 }
  0x27   : > { %427 = vperm.xlu0 %2784, %v3003_v0   ;;  %2783 = vset.pattern.permute.xlu1 %v5582_v6 }
  0x28   : > { %399 = vperm.xlu1 %2783, %v3012_v3  }
  0x29   : > { %395 = vperm.xlu2 %2782, %v3019_v4  }
  0x2f   : > { %2788 = vset.pattern.permute.xlu0 %v5586_v9 }
  0x30   : > { %798 = vperm.xlu0 %2788, %v3045_v8   ;;  %2785 = vset.pattern.permute.xlu1 %v5580_v7 }
  0x31   : > { %423 = vperm.xlu1 %2785, %v3012_v3   ;;  %2786 = vset.pattern.permute.xlu2 %v5580_v7 }
  0x32   : > { %419 = vperm.xlu2 %2786, %v3019_v4  }
  0x38   : > { %794 = vperm.xlu0 %2788, %v3056_v10  }
  0x39   : > { %415 = vperm.xlu1 %2785, %v3027_v5  }
  0x3a   : > { %766 = vperm.xlu2 %2786, %v3045_v8  }
  0x40   : > { %2790 = vset.pattern.permute.xlu0 %v5588_v1 }
  0x41   : > { %719 = vperm.xlu0 %2790, %v3064_v11   ;;  %2787 = vset.pattern.permute.xlu1 %v5588_v1 }
  0x42   : > { %734 = vperm.xlu1 %2787, %v3045_v8   ;;  %762 = vperm.xlu2 %2786, %v3056_v10  }
  0x49   : > { %2797 = vset.pattern.permute.xlu0 %v5584_v2 }
  0x4a   : > { %882 = vperm.xlu0 %2797, %v3064_v11   ;;  %729 = vperm.xlu1 %2787, %v3056_v10  }
  0x4b   : > { %758 = vperm.xlu2 %2786, %v3077_v12  }
  0x52   : > { %2798 = vset.pattern.permute.xlu0 %v5578_v13  ;;  %724 = vperm.xlu1 %2787, %v3077_v12  }
  0x53   : > { %958 = vperm.xlu0 %2798, %v3045_v8   ;;  %2789 = vset.pattern.permute.xlu2 %v5584_v2 }
  0x54   : > { %894 = vperm.xlu2 %2789, %v3045_v8  }
  0x5a   : > { %2791 = vset.pattern.permute.xlu1 %v5580_v7 }
  0x5b   : > { %946 = vperm.xlu0 %2798, %v3064_v11   ;;  %754 = vperm.xlu1 %2791, %v3064_v11  }
  0x5c   : > { %2792 = vset.pattern.permute.xlu2 %v5586_v9 }
  0x5d   : > { %790 = vperm.xlu2 %2792, %v3077_v12  }
  0x63   : > { %2805 = vset.pattern.permute.xlu0 %v5582_v6  ;;  %2794 = vset.pattern.permute.xlu1 %v5586_v9 }
  0x64   : > { %391 = vperm.xlu0 %2805, %v3027_v5   ;;  %786 = vperm.xlu1 %2794, %v3064_v11  }
  0x65   : > { %2793 = vset.pattern.permute.xlu2 %v5584_v2 }
  0x66   : > { %890 = vperm.xlu2 %2793, %v3056_v10  }
  0x69   : > { %v261_v20 = vpop.permute.xlu2 %260 }
  0x6c   : > { %1054 = vperm.xlu0 %2805, %v3077_v12   ;;  %2795 = vset.pattern.permute.xlu1 %v5584_v2 }
  0x6d   : > { %886 = vperm.xlu1 %2795, %v3077_v12  }
  0x6e   : > { %2796 = vset.pattern.permute.xlu2 %v5592_v31 }
  0x6f   : > { %922 = vperm.xlu2 %2796, %v3056_v10  }
  0x72   : > { %v226_v32 = vpop.permute.xlu2 %225 }
  0x73   : > { %v243_v37 = vmul.f32 %v226_v32, %v198_v33  ;;  %v244_v38 = vmul.f32 %v226_v32, %v199_v34 }
  0x74   : > { %2810 = vset.pattern.permute.xlu0 %v5576_v55 }
  0x75   : > { %2799 = vset.pattern.permute.xlu1 %v5592_v31  ;;  %1122 = vperm.xlu0 %2810, %v3056_v10  }
  0x76   : > { %918 = vperm.xlu1 %2799, %v3077_v12  }
  0x77   : > { %2800 = vset.pattern.permute.xlu2 %v5578_v13 }
  0x78   : > { %954 = vperm.xlu2 %2800, %v3056_v10  }
  0x7b   : > { %v3192_v59 = vpop.permute.xlu2 %403 }
  0x7d   : > { %2811 = vset.pattern.permute.xlu0 %v5592_v31 }
  0x7e   : > { %2802 = vset.pattern.permute.xlu1 %v5578_v13 }
  0x7f   : > { %v241_v16 = vpop.permute.xlu0 %240  ;;  %v265_v17 = vpop.permute.xlu1 %264  ;;  %950 = vperm.xlu1 %2802, %v3077_v12  }
  0x80   : > { %v249_v18 = vmul.f32 %v241_v16, %v204_v14  ;;  %v250_v19 = vmul.f32 %v241_v16, %v205_v15  ;;  %2801 = vset.pattern.permute.xlu2 %v5582_v6 }
  0x81   : > { %1062 = vperm.xlu2 %2801, %v3045_v8  }
  0x82   : > { %v273_v21 = vadd.f32 %v265_v17, %v249_v18  ;;  %v274_v22 = vadd.f32 %v265_v17, %v250_v19 }
  0x83   : > { %v396_v61 = vpop.permute.xlu2 %395 }
  0x84   : > { %320 = vmatpush.msra.mxu0 %v273_v21  ;;  %361 = vmatpush.msra.mxu1 %v274_v22 }
  0x87   : > { %v236_v25 = vpop.permute.xlu0 %235  ;;  %2803 = vset.pattern.permute.xlu1 %v5582_v6 }
  0x88   : > { %v231_v26 = vpop.permute.xlu1 %230  ;;  %v247_v27 = vmul.f32 %v236_v25, %v202_v23  ;;  %v248_v28 = vmul.f32 %v236_v25, %v203_v24  ;;  %1058 = vperm.xlu1 %2803, %v3056_v10  }
  0x89   : > { %v245_v39 = vmul.f32 %v231_v26, %v200_v35  ;;  %v246_v40 = vmul.f32 %v231_v26, %v201_v36  ;;  %2804 = vset.pattern.permute.xlu2 %v5590_v53 }
  0x8a   : > { %v271_v29 = vadd.f32 %v261_v20, %v247_v27  ;;  %v272_v30 = vadd.f32 %v261_v20, %v248_v28  ;;  %1094 = vperm.xlu2 %2804, %v3045_v8  }
  0x8c   : > { %321 = vmatpush.msra.mxu0 %v271_v29  ;;  %362 = vmatpush.msra.mxu1 %v272_v30  ;;  %v3198_v63 = vpop.permute.xlu2 %419 }
  0x90   : > { %v257_v41 = vpop.permute.xlu0 %256  ;;  %2806 = vset.pattern.permute.xlu1 %v5590_v53 }
  0x91   : > { %v253_v42 = vpop.permute.xlu1 %252  ;;  %v269_v43 = vadd.f32 %v257_v41, %v245_v39  ;;  %v270_v44 = vadd.f32 %v257_v41, %v246_v40  ;;  %1090 = vperm.xlu1 %2806, %v3056_v10  }
  0x92   : > { %v267_v45 = vadd.f32 %v253_v42, %v243_v37  ;;  %v268_v46 = vadd.f32 %v253_v42, %v244_v38  ;;  %2807 = vset.pattern.permute.xlu2 %v5576_v55 }
  0x93   : > { %322 = vmatpush.msra.mxu0 %v269_v43  ;;  %363 = vmatpush.msra.mxu1 %v270_v44 }
  0x94   : > { %1126 = vperm.xlu2 %2807, %v3045_v8   ;;  %v3202_v14 = vpop.permute.xlu2 %766 }
  0x95   : > { %323 = vmatpush.msra.mxu0 %v267_v45  ;;  %364 = vmatpush.msra.mxu1 %v268_v46  ;;  %5692 = vst [vmem:[#allocation4_spill] sm:$0xff] %v3202_v14 }
  0x96   : > { %2646 = vmatmul.msk.f32.vlgmr.msra.gmra.mxu0 %vm5642_vm0, %v275_v47  ;;  %2654 = vmatmul.msk.f32.vlgmr.msra.gmra.mxu1 %vm5642_vm0, %v275_v47 }
  0x99   : > { %2808 = vset.pattern.permute.xlu1 %v5582_v6  ;;  %v3185_v57 = vpop.permute.xlu0 %427  ;;  %v5712_v6 = vmov 0 }
  0x9a   : > { %1050 = vperm.xlu1 %2808, %v3064_v11   ;;  %v400_v15 = vpop.permute.xlu1 %399 }
  0x9c   : > { %2809 = vset.pattern.permute.xlu2 %v5590_v53  ;;  %v3206_v17 = vpop.permute.xlu2 %762 }
  0x9d   : > { %1086 = vperm.xlu2 %2809, %v3077_v12  }
  0x9e   : > { %2647 = vmatmul.msk.f32.gmra.mxu0 %vm5642_vm0, %v276_v48  ;;  %2655 = vmatmul.msk.f32.gmra.mxu1 %vm5642_vm0, %v276_v48 }
  0xa2   : > { %2812 = vset.pattern.permute.xlu1 %v5590_v53  ;;  %v3190_v58 = vpop.permute.xlu0 %798 }
  0xa3   : > { %5690 = vst [vmem:[#allocation2_spill] sm:$0xff] %v3190_v58  ;;  %v3208_v18 = vpop.permute.xlu1 %423 }
  0xa5   : > { %2813 = vset.pattern.permute.xlu2 %v5576_v55  ;;  %v3212_v20 = vpop.permute.xlu2 %758 }
  0xa6   : > { %2648 = vmatmul.msk.f32.gmra.mxu0 %vm5642_vm0, %v277_v49  ;;  %2656 = vmatmul.msk.f32.gmra.mxu1 %vm5642_vm0, %v277_v49 }
  0xaa   : > { %v3194_v60 = vpop.permute.xlu0 %794 }
  0xab   : > { %v3214_v21 = vpop.permute.xlu1 %415 }
  0xae   : > { %2649 = vmatmul.msk.f32.gmra.mxu0 %vm5642_vm0, %v278_v50  ;;  %2657 = vmatmul.msk.f32.gmra.mxu1 %vm5642_vm0, %v278_v50  ;;  %v3226_v27 = vpop.permute.xlu2 %894 }
  0xaf   : > { %5697 = vst [vmem:[#allocation9_spill] sm:$0xff] %v3226_v27 }
  0xb3   : > { %v3196_v62 = vpop.permute.xlu0 %719 }
  0xb4   : > { %v3228_v28 = vpop.permute.xlu1 %734 }
  0xb5   : > { %5698 = vst [vmem:[#allocation10_spill] sm:$0xff] %v3228_v28 }
  0xb6   : > { %2650 = vmatmul.msk.f32.gmra.mxu0 %vm5642_vm0, %v279_v51  ;;  %2658 = vmatmul.msk.f32.gmra.mxu1 %vm5642_vm0, %v279_v51 }
  0xb7   : > { %v3236_v30 = vpop.permute.xlu2 %790 }
  0xbc   : > { %v3200_v10 = vpop.permute.xlu0 %882  ;;  %v3240_v33 = vpop.permute.xlu1 %729 }
  0xbd   : > { %5691 = vst [vmem:[#allocation3_spill] sm:$0xff] %v3200_v10 }
  0xbe   : > { %2651 = vmatmul.msk.f32.gmra.mxu0 %vm5642_vm0, %v280_v52  ;;  %2659 = vmatmul.msk.f32.gmra.mxu1 %vm5642_vm0, %v280_v52 }
  0xc0   : > { %v3250_v36 = vpop.permute.xlu2 %890 }
  0xc4   : > { %v3258_v37 = vpop.permute.xlu1 %724 }
  0xc5   : > { %v3204_v16 = vpop.permute.xlu0 %958 }
  0xc6   : > { %2652 = vmatmul.msk.f32.gmra.mxu0 %vm5642_vm0, %v281_v54  ;;  %2660 = vmatmul.msk.f32.gmra.mxu1 %vm5642_vm0, %v281_v54  ;;  %5693 = vst [vmem:[#allocation5_spill] sm:$0xff] %v3204_v16 }
  0xc9   : > { %v3266_v40 = vpop.permute.xlu2 %922 }
  0xcd   : > { %v3210_v19 = vpop.permute.xlu0 %946  ;;  %v3270_v42 = vpop.permute.xlu1 %754 }
  0xce   : > { %2653 = vmatmul.msk.f32.gmra.mxu0 %vm5642_vm0, %v282_v56  ;;  %2661 = vmatmul.msk.f32.gmra.mxu1 %vm5642_vm0, %v282_v56  ;;  %5694 = vst [vmem:[#allocation6_spill] sm:$0xff] %v3210_v19 }
  0xd2   : > { %v3280_v44 = vpop.permute.xlu2 %954 }
  0xd6   : > { %v392_v22 = vpop.permute.xlu0 %391  ;;  %v3282_v45 = vpop.permute.xlu1 %786 }
  0xdb   : > { %v3290_v46 = vpop.permute.xlu2 %1062 }
  0xdc   : > { %5699 = vst [vmem:[#allocation11_spill] sm:$0xff] %v3290_v46 }
  0xdf   : > { %v3292_v47 = vpop.permute.xlu1 %886 }
  0xe4   : > { %v3298_v49 = vpop.permute.xlu2 %1094 }
  0xe5   : > { %5700 = vst [vmem:[#allocation12_spill] sm:$0xff] %v3298_v49 }
  0xe8   : > { %v3307_v51 = vpop.permute.xlu1 %918 }
  0xee   : > { %v3312_v56 = vpop.permute.xlu2 %1126 }
  0xef   : > { %5703 = vst [vmem:[#allocation15_spill] sm:$0xff] %v3312_v56 }
 0x113   : > { %v325_v23 = vpop.f32.mrf.mxu0  ;;  %v366_v24 = vpop.f32.mrf.mxu1 }
 0x114   : > { %v3216_v25 = vadd.f32 %v392_v22, %v325_v23  ;;  %v3218_v26 = vadd.f32 %v392_v22, %v366_v24  ;;  %v3334_v24 = vpop.permute.xlu0 %1054 }
 0x116   : > { %5695 = vst [vmem:[#allocation7_spill] sm:$0xff] %v3216_v25  ;;  %602 = vrot.lane.b32.xlu0 %v3218_v26, %s2963_s29  ;;  %619 = vrot.lane.b32.xlu1 %v3216_v25, %s2964_s30 }
 0x117   : > { %5696 = vst [vmem:[#allocation8_spill] sm:$0xff] %v3218_v26  ;;  %594 = vrot.lane.b32.xlu2 %v3216_v25, %s2963_s29 }
 0x11b   : > { %v328_v29 = vpop.f32.mrf.mxu0  ;;  %v369_v34 = vpop.f32.mrf.mxu1 }
 0x11c   : > { %v3238_v32 = vadd.f32 %v396_v61, %v328_v29  ;;  %v3248_v35 = vadd.f32 %v396_v61, %v369_v34  ;;  %v3318_v61 = vpop.permute.xlu1 %950  ;;  %v206_v29 = vlaneseq }
 0x11e   : > { %849 = vrot.lane.b32.xlu0 %v3218_v26, %s2965_s5  ;;  %825 = vrot.lane.b32.xlu1 %v3218_v26, %s2966_s6 }
 0x11f   : > { %627 = vrot.lane.b32.xlu2 %v3218_v26, %s2964_s30  ;;  %v5721_v26 = vmov 0 }
 0x123   : > { %v331_v38 = vpop.f32.mrf.mxu0  ;;  %v372_v41 = vpop.f32.mrf.mxu1 }
 0x124   : > { %v3260_v39 = vadd.f32 %v400_v15, %v331_v38  ;;  %v3272_v43 = vadd.f32 %v400_v15, %v372_v41  ;;  %v3324_v15 = vpop.permute.xlu2 %1086  ;;  %v3338_v38 = vand.u32 127, %v206_v29  ;;  %v3340_v41 = vpop.permute.xlu0 %1122  ;;  %v5709_v29 = vmov 0 }
 0x125   : > { %5706 = vst [vmem:[#allocation18_spill] sm:$0xff] %v3340_v41 }
 0x126   : > { %621 = vrot.lane.b32.xlu0 %v3238_v32, %s2964_s30  ;;  %596 = vrot.lane.b32.xlu1 %v3238_v32, %s2963_s29  ;;  %v209_v55 = vand.u32 15, %v3338_v38  ;;  %vm5640_vm1 = vcmp.lt.s32.totalorder %v3338_v38, 1  ;;  %vm5639_vm2 = vcmp.lt.s32.totalorder %v3338_v38, 127  ;;  %vm5652_vm7 = vcmp.lt.s32.totalorder %v3338_v38, 16 }
 0x127   : > { %817 = vrot.lane.b32.xlu2 %v3216_v25, %s2966_s6  ;;  %vm5644_vm8 = vcmp.lt.s32.totalorder %v3338_v38, 112 }
 0x128   : > { %vm3353_vm3 = vcmp.eq.s32.totalorder %v209_v55, 0  ;;  %vm3393_vm6 = vcmp.eq.s32.totalorder %v209_v55, 15 }
 0x129   : > { %v5710_v29 = vsel %vm3353_vm3, 4294967295, %v5709_v29  ;;  %v5722_v26 = vsel %vm3393_vm6, 4294967295, %v5721_v26 }
 0x12a   : > { %5711 = vst [vmem:[#allocation21_spill] sm:$0xff] %v5710_v29 }
 0x12b   : > { %v375_v48 = vpop.f32.mrf.mxu1  ;;  %v334_v52 = vpop.f32.mrf.mxu0  ;;  %5723 = vst [vmem:[#allocation27_spill] sm:$0xff] %v5722_v26 }
 0x12c   : > { %v3301_v50 = vadd.f32 %v3192_v59, %v375_v48  ;;  %v3310_v54 = vadd.f32 %v3192_v59, %v334_v52  ;;  %v3326_v59 = vpop.permute.xlu1 %1058  ;;  %v3345_v52 = vadd.s32 128, %v3338_v38 }
 0x12d   : > { %5704 = vst [vmem:[#allocation16_spill] sm:$0xff] %v3326_v59 }
 0x12e   : > { %843 = vrot.lane.b32.xlu0 %v3238_v32, %s2965_s5  ;;  %629 = vrot.lane.b32.xlu1 %v3248_v35, %s2964_s30  ;;  %5701 = vst [vmem:[#allocation13_spill] sm:$0xff] %v3301_v50  ;;  %v210_v13 = vand.u32 15, %v3345_v52  ;;  %vm5653_vm9 = vcmp.ge.s32.totalorder %v3345_v52, 240 }
 0x12f   : > { %841 = vrot.lane.b32.xlu2 %v3216_v25, %s2965_s5  ;;  %5702 = vst [vmem:[#allocation14_spill] sm:$0xff] %v3310_v54 }
 0x130   : > { %vm3357_vm4 = vcmp.eq.s32.totalorder %v210_v13, 0  ;;  %vm3385_vm5 = vcmp.eq.s32.totalorder %v210_v13, 15 }
 0x131   : > { %v5713_v6 = vsel %vm3357_vm4, 4294967295, %v5712_v6 }
 0x132   : > { %5714 = vst [vmem:[#allocation22_spill] sm:$0xff] %v5713_v6  ;;  %v5739_v6 = vmov 5  }
 0x134   : > { %v3332_v23 = vpop.permute.xlu1 %1090 }
 0x135   : > { %5705 = vst [vmem:[#allocation17_spill] sm:$0xff] %v3332_v23 }
 0x136   : > { %819 = vrot.lane.b32.xlu1 %v3238_v32, %s2966_s6  ;;  %598 = vrot.lane.b32.xlu0 %v3260_v39, %s2963_s29 }
 0x137   : > { %604 = vrot.lane.b32.xlu2 %v3248_v35, %s2963_s29 }
 0x13c   : > { %v3342_v48 = vpop.permute.xlu1 %1050 }
 0x13d   : > { %5707 = vst [vmem:[#allocation19_spill] sm:$0xff] %v3342_v48 }
 0x13e   : > { %851 = vrot.lane.b32.xlu1 %v3248_v35, %s2965_s5  ;;  %631 = vrot.lane.b32.xlu0 %v3272_v43, %s2964_s30 }
 0x13f   : > { %827 = vrot.lane.b32.xlu2 %v3248_v35, %s2966_s6 }
 0x146   : > { %606 = vrot.lane.b32.xlu1 %v3272_v43, %s2963_s29  ;;  %845 = vrot.lane.b32.xlu0 %v3260_v39, %s2965_s5 }
 0x147   : > { %623 = vrot.lane.b32.xlu2 %v3260_v39, %s2964_s30 }
 0x14e   : > { %821 = vrot.lane.b32.xlu1 %v3260_v39, %s2966_s6 }
 0x14f   : > { %829 = vrot.lane.b32.xlu2 %v3272_v43, %s2966_s6 }
 0x156   : > { %853 = vrot.lane.b32.xlu1 %v3272_v43, %s2965_s5 }
 0x157   : > { %608 = vrot.lane.b32.xlu2 %v3301_v50, %s2963_s29 }
 0x15e   : > { %600 = vrot.lane.b32.xlu1 %v3310_v54, %s2963_s29 }
 0x15f   : > { %633 = vrot.lane.b32.xlu2 %v3301_v50, %s2964_s30 }
 0x166   : > { %625 = vrot.lane.b32.xlu1 %v3310_v54, %s2964_s30 }
 0x167   : > { %831 = vrot.lane.b32.xlu2 %v3301_v50, %s2966_s6 }
 0x16e   : > { %823 = vrot.lane.b32.xlu1 %v3310_v54, %s2966_s6 }
 0x16f   : > { %855 = vrot.lane.b32.xlu2 %v3301_v50, %s2965_s5 }
 0x171   : > { %v595_v22 = vpop.permute.xlu2 %594 }
 0x176   : > { %847 = vrot.lane.b32.xlu1 %v3310_v54, %s2965_s5 }
 0x179   : > { %v628_v34 = vpop.permute.xlu2 %627 }
 0x181   : > { %v3349_v7 = vpop.permute.xlu2 %817 }
 0x182   : > { %5708 = vst [vmem:[#allocation20_spill] sm:$0xff] %v3349_v7 }
 0x188   : > { %v603_v2 = vpop.permute.xlu0 %602  ;;  %v620_v9 = vpop.permute.xlu1 %619 }
 0x189   : > { %v611_v1 = vsel %vm5640_vm1, %v595_v22, %v603_v2  ;;  %v615_v53 = vsel %vm5640_vm1, %v603_v2, %v595_v22  ;;  %v636_v31 = vsel %vm5639_vm2, %v620_v9, %v628_v34  ;;  %v640_v41 = vsel %vm5639_vm2, %v628_v34, %v620_v9  ;;  %v3383_v2 = vpop.permute.xlu2 %841 }
 0x18a   : > { %v3371_v56 = vsel %vm3353_vm3, %v636_v31, %v615_v53  ;;  %v3375_v48 = vsel %vm3357_vm4, %v640_v41, %v611_v1  ;;  %5715 = vst [vmem:[#allocation23_spill] sm:$0xff] %v3383_v2  ;;  %v5716_v9 = vmov 0  ;;  %v3399_v25 = vsel %vm3385_vm5, %v611_v1, %v640_v41 }
 0x18b   : > { %676 = vrot.lane.b32.xlu2 %v3371_v56, %s2965_s5  ;;  %652 = vrot.lane.b32.xlu0 %v3371_v56, %s2966_s6  ;;  %v5717_v9 = vsel %vm3385_vm5, 4294967295, %v5716_v9  ;;  %5724 = vst [vmem:[#allocation28_spill] sm:$0xff] %v3399_v25  ;;  %v3407_v13 = vsel %vm3393_vm6, %v615_v53, %v636_v31 }
 0x18c   : > { %660 = vrot.lane.b32.xlu1 %v3375_v48, %s2966_s6  ;;  %5718 = vst [vmem:[#allocation24_spill] sm:$0xff] %v5717_v9 }
 0x18d   : > { %5725 = vst [vmem:[#allocation29_spill] sm:$0xff] %v3407_v13 }
 0x190   : > { %v3389_v22 = vpop.permute.xlu0 %849  ;;  %v3391_v34 = vpop.permute.xlu1 %825 }
 0x191   : > { %5719 = vst [vmem:[#allocation25_spill] sm:$0xff] %v3389_v22  ;;  %v605_v46 = vpop.permute.xlu2 %604 }
 0x192   : > { %5720 = vst [vmem:[#allocation26_spill] sm:$0xff] %v3391_v34 }
 0x193   : > { %993 = vrot.lane.b32.xlu2 %v3399_v25, %s2966_s6  ;;  %684 = vrot.lane.b32.xlu0 %v3375_v48, %s2965_s5 }
 0x194   : > { %985 = vrot.lane.b32.xlu1 %v3407_v13, %s2966_s6 }
 0x198   : > { %v622_v55 = vpop.permute.xlu0 %621  ;;  %v597_v49 = vpop.permute.xlu1 %596 }
 0x199   : > { %v612_v41 = vsel %vm5640_vm1, %v597_v49, %v605_v46  ;;  %v616_v31 = vsel %vm5640_vm1, %v605_v46, %v597_v49  ;;  %v3433_v19 = vpop.permute.xlu2 %827 }
 0x19b   : > { %1017 = vrot.lane.b32.xlu2 %v3399_v25, %s2965_s5 }
 0x19c   : > { %1009 = vrot.lane.b32.xlu1 %v3407_v13, %s2965_s5 }
 0x1a0   : > { %v630_v1 = vpop.permute.xlu1 %629  ;;  %v3423_v54 = vpop.permute.xlu0 %843 }
 0x1a1   : > { %v637_v53 = vsel %vm5639_vm2, %v622_v55, %v630_v1  ;;  %v641_v10 = vsel %vm5639_vm2, %v630_v1, %v622_v55  ;;  %v624_v16 = vpop.permute.xlu2 %623 }
 0x1a2   : > { %v3427_v25 = vsel %vm3353_vm3, %v637_v53, %v616_v31  ;;  %v3431_v13 = vsel %vm3357_vm4, %v641_v10, %v612_v41  ;;  %v3445_v49 = vsel %vm3393_vm6, %v616_v31, %v637_v53  ;;  %v3453_v55 = vsel %vm3385_vm5, %v612_v41, %v641_v10 }
 0x1a3   : > { %678 = vrot.lane.b32.xlu2 %v3427_v25, %s2965_s5  ;;  %654 = vrot.lane.b32.xlu0 %v3427_v25, %s2966_s6 }
 0x1a4   : > { %662 = vrot.lane.b32.xlu1 %v3431_v13, %s2966_s6 }
 0x1a8   : > { %v3441_v46 = vpop.permute.xlu1 %819  ;;  %v599_v1 = vpop.permute.xlu0 %598 }
 0x1a9   : > { %v3463_v53 = vpop.permute.xlu2 %829 }
 0x1ab   : > { %987 = vrot.lane.b32.xlu2 %v3445_v49, %s2966_s6  ;;  %686 = vrot.lane.b32.xlu0 %v3431_v13, %s2965_s5 }
 0x1ac   : > { %995 = vrot.lane.b32.xlu1 %v3453_v55, %s2966_s6 }
 0x1b0   : > { %v3457_v50 = vpop.permute.xlu1 %851  ;;  %v632_v31 = vpop.permute.xlu0 %631 }
 0x1b1   : > { %v638_v10 = vsel %vm5639_vm2, %v624_v16, %v632_v31  ;;  %v642_v41 = vsel %vm5639_vm2, %v632_v31, %v624_v16 }
 0x1b3   : > { %1011 = vrot.lane.b32.xlu2 %v3445_v49, %s2965_s5  ;;  %1019 = vrot.lane.b32.xlu0 %v3453_v55, %s2965_s5 }
 0x1b8   : > { %v607_v34 = vpop.permute.xlu1 %606 }
 0x1b9   : > { %v613_v7 = vsel %vm5640_vm1, %v599_v1, %v607_v34  ;;  %v617_v2 = vsel %vm5640_vm1, %v607_v34, %v599_v1  ;;  %v609_v34 = vpop.permute.xlu2 %608 }
 0x1ba   : > { %v3475_v22 = vsel %vm3353_vm3, %v638_v10, %v617_v2  ;;  %v3479_v27 = vsel %vm3357_vm4, %v642_v41, %v613_v7  ;;  %v3491_v1 = vsel %vm3385_vm5, %v613_v7, %v642_v41  ;;  %v3499_v31 = vsel %vm3393_vm6, %v617_v2, %v638_v10 }
 0x1bb   : > { %680 = vrot.lane.b32.xlu2 %v3475_v22, %s2965_s5  ;;  %656 = vrot.lane.b32.xlu0 %v3475_v22, %s2966_s6  ;;  %5726 = vst [vmem:[#allocation30_spill] sm:$0xff] %v3491_v1 }
 0x1bc   : > { %664 = vrot.lane.b32.xlu1 %v3479_v27, %s2966_s6  ;;  %5727 = vst [vmem:[#allocation31_spill] sm:$0xff] %v3499_v31 }
 0x1c0   : > { %v3487_v16 = vpop.permute.xlu1 %821 }
 0x1c1   : > { %v634_v28 = vpop.permute.xlu2 %633 }
 0x1c3   : > { %997 = vrot.lane.b32.xlu2 %v3491_v1, %s2966_s6  ;;  %688 = vrot.lane.b32.xlu0 %v3479_v27, %s2965_s5 }
 0x1c4   : > { %989 = vrot.lane.b32.xlu1 %v3499_v31, %s2966_s6 }
 0x1c8   : > { %v3503_v58 = vpop.permute.xlu1 %853 }
 0x1c9   : > { %v3510_v41 = vpop.permute.xlu2 %831 }
 0x1ca   : > { %5728 = vst [vmem:[#allocation32_spill] sm:$0xff] %v3510_v41 }
 0x1cb   : > { %1013 = vrot.lane.b32.xlu0 %v3499_v31, %s2965_s5 }
 0x1cc   : > { %1021 = vrot.lane.b32.xlu1 %v3491_v1, %s2965_s5 }
 0x1d0   : > { %v601_v7 = vpop.permute.xlu1 %600 }
 0x1d1   : > { %v614_v2 = vsel %vm5640_vm1, %v601_v7, %v609_v34  ;;  %v618_v10 = vsel %vm5640_vm1, %v609_v34, %v601_v7  ;;  %v5731_v34 = vmov 4  }
 0x1d4   : > { %1082 = vperm.xlu1 %2812, %v3064_v11  }
 0x1d8   : > { %v626_v14 = vpop.permute.xlu1 %625 }
 0x1d9   : > { %v639_v23 = vsel %vm5639_vm2, %v626_v14, %v634_v28  ;;  %v643_v31 = vsel %vm5639_vm2, %v634_v28, %v626_v14  ;;  %v3535_v14 = vpop.permute.xlu2 %855 }
 0x1da   : > { %v3522_v1 = vsel %vm3357_vm4, %v643_v31, %v614_v2  ;;  %v3526_v41 = vsel %vm3353_vm3, %v639_v23, %v618_v10  ;;  %5732 = vst [vmem:[#allocation35_spill] sm:$0xff] %v3535_v14  ;;  %v3540_v28 = vsel %vm3393_vm6, %v618_v10, %v639_v23  ;;  %v3556_v23 = vsel %vm3385_vm5, %v614_v2, %v643_v31 }
 0x1db   : > { %5729 = vst [vmem:[#allocation33_spill] sm:$0xff] %v3522_v1  ;;  %666 = vrot.lane.b32.xlu0 %v3522_v1, %s2966_s6  ;;  %658 = vrot.lane.b32.xlu2 %v3526_v41, %s2966_s6  ;;  %v770_v2 = vmul.f32 %v3270_v42, %v3375_v48 }
 0x1dc   : > { %5730 = vst [vmem:[#allocation34_spill] sm:$0xff] %v3526_v41  ;;  %682 = vrot.lane.b32.xlu1 %v3526_v41, %s2965_s5 }
 0x1dd   : > { %2814 = vset.pattern.permute.xlu1 %v5731_v34  ;;  %5733 = vst [vmem:[#allocation36_spill] sm:$0xff] %v3540_v28 }
 0x1de   : > { %5736 = vst [vmem:[#allocation39_spill] sm:$0xff] %v3556_v23 }
 0x1e0   : > { %v3548_v29 = vpop.permute.xlu1 %823 }
 0x1e1   : > { %5734 = vst [vmem:[#allocation37_spill] sm:$0xff] %v3548_v29  ;;  %v769_v29 = vmul.f32 %v3270_v42, %v3371_v56 }
 0x1e3   : > { %926 = vperm.xlu0 %2811, %v3045_v8   ;;  %1118 = vperm.xlu2 %2813, %v3077_v12   ;;  %v3562_v12 = vpop.permute.xlu0 %845 }
 0x1e4   : > { %991 = vrot.lane.b32.xlu1 %v3540_v28, %s2966_s6 }
 0x1e5   : > { %v677_v7 = vpop.permute.xlu2 %676 }
 0x1e8   : > { %v3564_v10 = vpop.permute.xlu1 %847 }
 0x1e9   : > { %5737 = vst [vmem:[#allocation40_spill] sm:$0xff] %v3564_v10 }
 0x1eb   : > { %914 = vperm.xlu0 %2811, %v3064_v11   ;;  %690 = vrot.lane.b32.xlu2 %v3522_v1, %s2965_s5 }
 0x1ec   : > { %1015 = vrot.lane.b32.xlu1 %v3540_v28, %s2965_s5  ;;  %v378_v28 = vpop.f32.mrf.mxu1 }
 0x1ed   : > { %v3552_v8 = vpop.permute.xlu2 %993 }
 0x1ee   : > { %5735 = vst [vmem:[#allocation38_spill] sm:$0xff] %v3552_v8  ;;  %v337_v8 = vpop.f32.mrf.mxu0 }
 0x1f3   : > { %1154 = vperm.xlu0 %2811, %v3012_v3   ;;  %999 = vrot.lane.b32.xlu2 %v3556_v23, %s2966_s6 }
 0x1f4   : > { %1158 = vperm.xlu1 %2814, %v3003_v0   ;;  %v381_v42 = vpop.f32.mrf.mxu1 }
 0x1f5   : > { %v3566_v26 = vpop.permute.xlu2 %1017 }
 0x1f6   : > { %5738 = vst [vmem:[#allocation41_spill] sm:$0xff] %v3566_v26 }
 0x1fb   : > { %1023 = vrot.lane.b32.xlu2 %v3556_v23, %s2965_s5  ;;  %2817 = vset.pattern.permute.xlu0 %v5739_v6 }
 0x1fc   : > { %1150 = vperm.xlu1 %2814, %v3019_v4  }
 0x1fd   : > { %v653_v31 = vpop.permute.xlu0 %652  ;;  %v679_v4 = vpop.permute.xlu2 %678 }
 0x1fe   : > { %v661_v3 = vpop.permute.xlu1 %660 }
 0x1ff   : > { %v668_v0 = vsel %vm5652_vm7, %v653_v31, %v661_v3  ;;  %v672_v10 = vsel %vm5652_vm7, %v661_v3, %v653_v31 }
 0x200   : > { %v738_v9 = vmul.f32 %v3196_v62, %v668_v0 }
 0x202   : > { %v778_v26 = vadd.f32 %v770_v2, %v738_v9 }
 0x203   : > { %1114 = vperm.xlu2 %2813, %v3064_v11  }
 0x204   : > { %2818 = vset.pattern.permute.xlu1 %v5739_v6 }
 0x205   : > { %v685_v23 = vpop.permute.xlu0 %684 }
 0x206   : > { %v693_v48 = vsel %vm5644_vm8, %v677_v7, %v685_v23  ;;  %v697_v9 = vsel %vm5644_vm8, %v685_v23, %v677_v7  ;;  %v3588_v2 = vpop.permute.xlu1 %985  ;;  %v340_v7 = vpop.f32.mrf.mxu0 }
 0x207   : > { %v701_v11 = vsel %vm5652_vm7, %v693_v48, %v672_v10  ;;  %v710_v14 = vsel %vm5653_vm9, %v668_v0, %v697_v9  ;;  %v801_v1 = vmul.f32 %v3282_v45, %v693_v48  ;;  %v3607_v0 = vpop.permute.xlu2 %987  ;;  %v384_v48 = vpop.f32.mrf.mxu1  ;;  %v931_v9 = vmul.f32 %v3307_v51, %v3238_v32 }
 0x208   : > { %v737_v41 = vmul.f32 %v3196_v62, %v701_v11  ;;  %v802_v31 = vmul.f32 %v3282_v45, %v710_v14  ;;  %v430_v62 = vadd.f32 %v3214_v21, %v337_v8  ;;  %v858_v32 = vsel %vm5644_vm8, %v3423_v54, %v3457_v50 }
 0x20a   : > { %v777_v3 = vadd.f32 %v769_v29, %v737_v41  ;;  %v3599_v59 = vadd.f32 %v802_v31, %v778_v26  ;;  %v2662_v29 = vmul.f32 -1.442695, %v430_v62  ;;  %v431_v41 = vadd.f32 %v3214_v21, %v378_v28 }
 0x20b   : > { %2815 = vset.pattern.permute.xlu2 %v5731_v34  ;;  %v435_v21 = vadd.f32 %v3208_v18, %v384_v48  ;;  %v772_v28 = vmul.f32 %v3212_v20, %v3431_v13 }
 0x20c   : > { %v3602_v23 = vadd.f32 %v801_v1, %v777_v3  ;;  %1146 = vperm.xlu2 %2815, %v3027_v5   ;;  %v432_v1 = vadd.f32 %v3198_v63, %v340_v7  ;;  %2866 = vpow2.f32 %v2662_v29  ;;  %v2663_v8 = vmul.f32 -1.442695, %v431_v41 }
 0x20d   : > { %v834_v7 = vsel %vm5652_vm7, %v3441_v46, %v3433_v19  ;;  %v862_v41 = vsel %vm5644_vm8, %v3457_v50, %v3423_v54 }
 0x20e   : > { %v3605_v10 = vpop.permute.xlu1 %1009  ;;  %v343_v45 = vpop.f32.mrf.mxu0  ;;  %v2664_v11 = vmul.f32 -1.442695, %v432_v1  ;;  %v900_v54 = vmul.f32 %v3292_v47, %v834_v7  ;;  %2868 = vpow2.f32 %v2663_v8 }
 0x20f   : > { %v3613_v14 = vpop.permute.xlu2 %1011  ;;  %v434_v3 = vadd.f32 %v3208_v18, %v343_v45  ;;  %v771_v45 = vmul.f32 %v3212_v20, %v3427_v25 }
 0x210   : > { %2870 = vpow2.f32 %v2664_v11 }
 0x211   : > { %v2666_v50 = vmul.f32 -1.442695, %v434_v3 }
 0x213   : > { %2872 = vpow2.f32 %v2666_v50 }
 0x214   : > { %2816 = vset.pattern.permute.xlu2 %v5739_v6 }
 0x215   : > { %v655_v56 = vpop.permute.xlu0 %654 }
 0x216   : > { %v663_v26 = vpop.permute.xlu1 %662 }
 0x217   : > { %v669_v5 = vsel %vm5652_vm7, %v655_v56, %v663_v26  ;;  %v673_v29 = vsel %vm5652_vm7, %v663_v26, %v655_v56  ;;  %v346_v26 = vpop.f32.mrf.mxu0  ;;  %v3664_v3 = vpop.permute.xlu2 %680 }
 0x218   : > { %v740_v31 = vmul.f32 %v3258_v37, %v669_v5 }
 0x21a   : > { %v780_v48 = vadd.f32 %v772_v28, %v740_v31  ;;  %v387_v28 = vpop.f32.mrf.mxu1 }
 0x21d   : > { %v687_v62 = vpop.permute.xlu0 %686 }
 0x21e   : > { %v694_v18 = vsel %vm5644_vm8, %v679_v4, %v687_v62  ;;  %v698_v13 = vsel %vm5644_vm8, %v687_v62, %v679_v4  ;;  %v838_v4 = vsel %vm5652_vm7, %v3433_v19, %v3441_v46  ;;  %v433_v62 = vadd.f32 %v3198_v63, %v381_v42  ;;  %v996_v31 = vpop.permute.xlu1 %995 }
 0x21f   : > { %v703_v1 = vsel %vm5652_vm7, %v694_v18, %v673_v29  ;;  %v712_v56 = vsel %vm5653_vm9, %v669_v5, %v698_v13  ;;  %v867_v29 = vsel %vm5652_vm7, %v858_v32, %v838_v4  ;;  %v2867_v5 = vpop.eup %2866  ;;  %v876_v13 = vsel %vm5653_vm9, %v834_v7, %v862_v41 }
 0x220   : > { %v739_v20 = vmul.f32 %v3258_v37, %v703_v1  ;;  %v804_v25 = vmul.f32 %v3236_v30, %v712_v56  ;;  %v803_v19 = vmul.f32 %v3236_v30, %v694_v18  ;;  %v932_v37 = vmul.f32 %v3307_v51, %v3248_v35 }
 0x221   : > { %v2667_v63 = vmul.f32 -1.442695, %v435_v21  ;;  %v436_v42 = vadd.f32 %v3185_v57, %v346_v26  ;;  %v899_v1 = vmul.f32 %v3292_v47, %v867_v29  ;;  %v964_v30 = vmul.f32 %v3318_v61, %v876_v13 }
 0x222   : > { %v779_v6 = vadd.f32 %v771_v45, %v739_v20  ;;  %v812_v46 = vadd.f32 %v804_v25, %v780_v48  ;;  %v2665_v45 = vmul.f32 -1.442695, %v433_v62  ;;  %v3671_v35 = vsel %vm5652_vm7, %v3607_v0, %v996_v31  ;;  %v2869_v20 = vpop.eup %2868 }
 0x223   : > { %v1006_v11 = vsel %vm5652_vm7, %v996_v31, %v3607_v0  ;;  %2874 = vpow2.f32 %v2667_v63  ;;  %v2668_v47 = vmul.f32 -1.442695, %v436_v42  ;;  %v437_v18 = vadd.f32 %v3185_v57, %v387_v28  ;;  %v2871_v25 = vpop.eup %2870  ;;  %v3700_v31 = vpop.permute.xlu2 %997 }
 0x224   : > { %v811_v56 = vadd.f32 %v803_v19, %v779_v6  ;;  %v908_v7 = vadd.f32 %v900_v54, %v812_v46  ;;  %v963_v26 = vmul.f32 %v3318_v61, %v858_v32  ;;  %v1068_v0 = vmul.f32 %v3334_v24, %v3671_v35  ;;  %v2873_v29 = vpop.eup %2872 }
 0x225   : > { %v3673_v51 = vpop.permute.xlu0 %1019  ;;  %v1100_v62 = vmul.f32 %v3324_v15, %v3453_v55  ;;  %v3694_v13 = vadd.f32 1.0, %v2867_v5  ;;  %2876 = vpow2.f32 %v2665_v45  ;;  %v2669_v19 = vmul.f32 -1.442695, %v437_v18 }
 0x226   : > { %v907_v8 = vadd.f32 %v899_v1, %v811_v56  ;;  %v940_v21 = vadd.f32 %v932_v37, %v908_v7  ;;  %v3682_v6 = vsel %vm5644_vm8, %v3613_v14, %v3673_v51  ;;  %2878 = vpow2.f32 %v2668_v47 }
 0x227   : > { %v1035_v41 = vsel %vm5652_vm7, %v3682_v6, %v1006_v11  ;;  %v1099_v61 = vmul.f32 %v3324_v15, %v3445_v49  ;;  %v3702_v37 = vadd.f32 1.0, %v2869_v20  ;;  %2880 = vrcp.f32 %v3694_v13 }
 0x228   : > { %v939_v4 = vadd.f32 %v931_v9, %v907_v8  ;;  %v972_v48 = vadd.f32 %v964_v30, %v940_v21  ;;  %v1067_v57 = vmul.f32 %v3334_v24, %v1035_v41  ;;  %v3707_v5 = vadd.f32 1.0, %v2871_v25 }
 0x229   : > { %v2875_v46 = vpop.eup %2874  ;;  %v3709_v42 = vadd.f32 1.0, %v2873_v29  ;;  %2882 = vpow2.f32 %v2669_v19  ;;  %v773_v8 = vmul.f32 %v3206_v17, %v3475_v22  ;;  %v774_v21 = vmul.f32 %v3206_v17, %v3479_v27 }
 0x22a   : > { %v1076_v50 = vadd.f32 %v1068_v0, %v972_v48  ;;  %v971_v54 = vadd.f32 %v963_v26, %v939_v4  ;;  %v3711_v49 = vadd.f32 1.0, %v2875_v46  ;;  %2884 = vrcp.f32 %v3702_v37 }
 0x22b   : > { %v2877_v15 = vpop.eup %2876  ;;  %2886 = vrcp.f32 %v3707_v5  ;;  %v859_v41 = vsel %vm5644_vm8, %v3562_v12, %v3503_v58  ;;  %v835_v22 = vsel %vm5652_vm7, %v3487_v16, %v3463_v53  ;;  %v839_v48 = vsel %vm5652_vm7, %v3463_v53, %v3487_v16 }
 0x22c   : > { %v1075_v9 = vadd.f32 %v1067_v57, %v971_v54  ;;  %v3698_v32 = vadd.f32 %v1100_v62, %v1076_v50  ;;  %v2879_v1 = vpop.eup %2878  ;;  %v3717_v56 = vadd.f32 1.0, %v2877_v15  ;;  %2888 = vrcp.f32 %v3709_v42 }
 0x22d   : > { %v657_v55 = vpop.permute.xlu0 %656  ;;  %v3721_v45 = vpop.eup %2880  ;;  %2890 = vrcp.f32 %v3711_v49  ;;  %v3724_v30 = vadd.f32 1.0, %v2879_v1  ;;  %v869_v16 = vsel %vm5652_vm7, %v859_v41, %v839_v48  ;;  %v934_v46 = vmul.f32 %v3266_v40, %v3272_v43 }
 0x22e   : > { %5740 = vst [vmem:[#allocation42_spill] sm:$0xff] %v3698_v32  ;;  %v665_v63 = vpop.permute.xlu1 %664  ;;  %v3704_v24 = vadd.f32 %v1099_v61, %v1075_v9  ;;  %2892 = vrcp.f32 %v3717_v56  ;;  %v471_v29 = vmul.f32 %v3721_v45, %v3694_v13  ;;  %v933_v1 = vmul.f32 %v3266_v40, %v3260_v39  ;;  %v5762_v32 = vld [vmem:[#allocation35_spill] sm:$0xff] }
 0x22f   : > { %v670_v28 = vsel %vm5652_vm7, %v657_v55, %v665_v63  ;;  %v2883_v18 = vpop.eup %2882  ;;  %v674_v26 = vsel %vm5652_vm7, %v665_v63, %v657_v55  ;;  %2894 = vrcp.f32 %v3724_v30  ;;  %v901_v63 = vmul.f32 %v3250_v36, %v869_v16  ;;  %v5747_v16 = vld [vmem:[#allocation17_spill] sm:$0xff] }
 0x230   : > { %5741 = vst [vmem:[#allocation43_spill] sm:$0xff] %v3704_v24  ;;  %v742_v7 = vmul.f32 %v3240_v33, %v670_v28  ;;  %v3756_v25 = vpop.eup %2884  ;;  %v3767_v53 = vadd.f32 1.0, %v2883_v18  ;;  %vm535_vm12 = vweird.f32 %v3709_v42  ;;  %vm550_vm15 = vweird.f32 %v3711_v49 }
 0x231   : > { %v3764_v57 = vpop.eup %2886  ;;  %v486_v39 = vmul.f32 %v3756_v25, %v3702_v37  ;;  %vm565_vm2 = vweird.f32 %v3724_v30 }
 0x232   : > { %v782_v62 = vadd.f32 %v774_v21, %v742_v7  ;;  %v3773_v19 = vpop.eup %2888  ;;  %2896 = vrcp.f32 %v3767_v53  ;;  %vm580_vm1 = vweird.f32 %v3767_v53 }
 0x233   : > { %5742 = vst [vmem:[#allocation44_spill] sm:$0xff] %v3773_v19  ;;  %v3777_v9 = vpop.eup %2890  ;;  %vm536_vm10 = vweird.f32 %v3773_v19 }
 0x234   : > { %5743 = vst [vmem:[#allocation45_spill] sm:$0xff] %v3777_v9  ;;  %v3802_v40 = vpop.eup %2892  ;;  %vm551_vm11 = vweird.f32 %v3777_v9  ;;  %vm3967_vm0 = vmor %vm535_vm12, %vm536_vm10 }
 0x235   : > { %v689_v11 = vpop.permute.xlu0 %688  ;;  %v3730_v47 = vpop.permute.xlu2 %658 }
 0x236   : > { %v695_v4 = vsel %vm5644_vm8, %v3664_v3, %v689_v11  ;;  %v699_v17 = vsel %vm5644_vm8, %v689_v11, %v3664_v3  ;;  %v990_v27 = vpop.permute.xlu1 %989  ;;  %v863_v3 = vsel %vm5644_vm8, %v3503_v58, %v3562_v12  ;;  %v902_v58 = vmul.f32 %v3250_v36, %v835_v22 }
 0x237   : > { %v705_v0 = vsel %vm5652_vm7, %v695_v4, %v674_v26  ;;  %v714_v20 = vsel %vm5653_vm9, %v670_v28, %v699_v17  ;;  %v878_v55 = vsel %vm5653_vm9, %v835_v22, %v863_v3  ;;  %v965_v26 = vmul.f32 %v3280_v44, %v859_v41 }
 0x238   : > { %v741_v50 = vmul.f32 %v3240_v33, %v705_v0  ;;  %v806_v54 = vmul.f32 %v3194_v60, %v714_v20  ;;  %v805_v33 = vmul.f32 %v3194_v60, %v695_v4  ;;  %v3791_v60 = vsel %vm5652_vm7, %v990_v27, %v3700_v31  ;;  %v5745_v20 = vld [vmem:[#allocation16_spill] sm:$0xff] }
 0x239   : > { %v966_v21 = vmul.f32 %v3280_v44, %v878_v55  ;;  %v1007_v4 = vsel %vm5652_vm7, %v3700_v31, %v990_v27  ;;  %v501_v22 = vmul.f32 %v3764_v57, %v3707_v5  ;;  %v1070_v3 = vmul.f32 %v5745_v20, %v3791_v60 }
 0x23a   : > { %v781_v12 = vadd.f32 %v773_v8, %v741_v50  ;;  %v814_v61 = vadd.f32 %v806_v54, %v782_v62  ;;  %v472_v8 = vsub.f32 1.0, %v471_v29  ;;  %v546_v31 = vmul.f32 %v3777_v9, %v3711_v49  ;;  %v3827_v50 = vpop.eup %2894  ;;  %v5746_v54 = vld [vmem:[#allocation30_spill] sm:$0xff] }
 0x23b   : > { %v531_v41 = vmul.f32 %v3773_v19, %v3709_v42  ;;  %v1102_v29 = vmul.f32 %v5747_v16, %v5746_v54  ;;  %v516_v55 = vmul.f32 %v3802_v40, %v3717_v56  ;;  %v556_v54 = vand.u32 2147483648, %v3711_v49 }
 0x23c   : > { %v813_v15 = vadd.f32 %v805_v33, %v781_v12  ;;  %v910_v28 = vadd.f32 %v902_v58, %v814_v61  ;;  %v3832_v61 = vpop.eup %2896  ;;  %v586_v62 = vand.u32 2147483648, %v3767_v53  ;;  %vm566_vm14 = vweird.f32 %v3827_v50 }
 0x23d   : > { %v3793_v43 = vpop.permute.xlu0 %1013  ;;  %v3795_v7 = vpop.permute.xlu2 %1118  ;;  %vm581_vm13 = vweird.f32 %v3832_v61  ;;  %vm3999_vm10 = vmor %vm565_vm2, %vm566_vm14 }
 0x23e   : > { %5744 = vst [vmem:[#allocation46_spill] sm:$0xff] %v3795_v7  ;;  %v909_v36 = vadd.f32 %v901_v63, %v813_v15  ;;  %v942_v11 = vadd.f32 %v934_v46, %v910_v28  ;;  %v3798_v18 = vpop.permute.xlu1 %1021  ;;  %v502_v46 = vsub.f32 1.0, %v501_v22  ;;  %v473_v63 = vmul.f32 %v3721_v45, %v472_v8  ;;  %v5748_v28 = vld [vmem:[#allocation31_spill] sm:$0xff] }
 0x23f   : > { %v3812_v17 = vsel %vm5644_vm8, %v3793_v43, %v3798_v18  ;;  %v576_v8 = vmul.f32 %v3832_v61, %v3767_v53  ;;  %v3869_v22 = vor.u32 1.1754944e-38, %v556_v54  ;;  %v3972_v7 = vor.u32 1.1754944e-38, %v586_v62 }
 0x240   : > { %v941_v48 = vadd.f32 %v933_v1, %v909_v36  ;;  %v974_v0 = vadd.f32 %v966_v21, %v942_v11  ;;  %v1037_v44 = vsel %vm5652_vm7, %v3812_v17, %v1007_v4  ;;  %v1101_v1 = vmul.f32 %v5747_v16, %v5748_v28 }
 0x241   : > { %v1069_v12 = vmul.f32 %v5745_v20, %v1037_v44  ;;  %v487_v11 = vsub.f32 1.0, %v486_v39  ;;  %v547_v4 = vsub.f32 1.0, %v546_v31  ;;  %v561_v44 = vmul.f32 %v3827_v50, %v3724_v30  ;;  %5751 = vst [vmem:[#allocation17_spill] sm:$0xff] %v3869_v22  ;;  %v5767_v22 = vld [vmem:[#allocation25_spill] sm:$0xff] }
 0x242   : > { %v1078_v58 = vadd.f32 %v1070_v3, %v974_v0  ;;  %v973_v33 = vadd.f32 %v965_v26, %v941_v48  ;;  %v532_v0 = vsub.f32 1.0, %v531_v41  ;;  %v503_v39 = vmul.f32 %v3764_v57, %v502_v46  ;;  %v5757_v26 = vld [vmem:[#allocation4_spill] sm:$0xff] }
 0x243   : > { %v517_v41 = vsub.f32 1.0, %v516_v55  ;;  %v548_v28 = vmul.f32 %v3777_v9, %v547_v4  ;;  %v562_v15 = vsub.f32 1.0, %v561_v44 }
 0x244   : > { %v1077_v21 = vadd.f32 %v1069_v12, %v973_v33  ;;  %v3840_v36 = vadd.f32 %v1102_v29, %v1078_v58  ;;  %v571_v29 = vand.u32 2147483648, %v3724_v30  ;;  %v3859_v12 = vadd.f32 %v3721_v45, %v473_v63 }
 0x245   : > { %v691_v48 = vpop.permute.xlu2 %690  ;;  %v3862_v33 = vmul.f32 %v3756_v25, %v487_v11  ;;  %v3874_v11 = vadd.f32 %v3764_v57, %v503_v39  ;;  %v518_v4 = vmul.f32 %v3802_v40, %v517_v41  ;;  %v3886_v44 = vadd.f32 %v3777_v9, %v548_v28  ;;  %v5756_v28 = vld [vmem:[#allocation33_spill] sm:$0xff]  ;;  %v5787_v9 = vld [vmem:[#allocation11_spill] sm:$0xff] }
 0x246   : > { %v3844_v20 = vpop.permute.xlu1 %1082  ;;  %v3846_v3 = vadd.f32 %v1101_v1, %v1077_v21  ;;  %5749 = vst [vmem:[#allocation16_spill] sm:$0xff] %v3859_v12  ;;  %v533_v1 = vmul.f32 %v3773_v19, %v532_v0  ;;  %v577_v21 = vsub.f32 1.0, %v576_v8  ;;  %v3879_v58 = vor.u32 1.1754944e-38, %v571_v29 }
 0x247   : > { %5750 = vst [vmem:[#allocation30_spill] sm:$0xff] %v3862_v33  ;;  %v563_v31 = vmul.f32 %v3827_v50, %v562_v15  ;;  %v776_v55 = vmul.f32 %v5757_v26, %v5756_v28  ;;  %v5761_v15 = vld [vmem:[#allocation37_spill] sm:$0xff] }
 0x248   : > { %5752 = vst [vmem:[#allocation31_spill] sm:$0xff] %v3874_v11  ;;  %v3890_v54 = vadd.f32 %v3773_v19, %v533_v1  ;;  %v578_v16 = vmul.f32 %v3832_v61, %v577_v21  ;;  %v5758_v1 = vld [vmem:[#allocation10_spill] sm:$0xff] }
 0x249   : > { %5753 = vst [vmem:[#allocation47_spill] sm:$0xff] %v3879_v58  ;;  %v5768_v58 = vld [vmem:[#allocation23_spill] sm:$0xff] }
 0x24a   : > { %5754 = vst [vmem:[#allocation48_spill] sm:$0xff] %v3886_v44 }
 0x24b   : > { %5755 = vst [vmem:[#allocation49_spill] sm:$0xff] %v3890_v54 }
 0x24d   : > { %v667_v8 = vpop.permute.xlu0 %666  ;;  %v3915_v34 = vpop.permute.xlu2 %999 }
 0x24e   : > { %v671_v39 = vsel %vm5652_vm7, %v3730_v47, %v667_v8  ;;  %v675_v41 = vsel %vm5652_vm7, %v667_v8, %v3730_v47  ;;  %v683_v29 = vpop.permute.xlu1 %682  ;;  %v5759_v47 = vld [vmem:[#allocation34_spill] sm:$0xff]  ;;  %v5760_v8 = vld [vmem:[#allocation32_spill] sm:$0xff] }
 0x24f   : > { %v744_v46 = vmul.f32 %v5758_v1, %v671_v39  ;;  %v696_v27 = vsel %vm5644_vm8, %v683_v29, %v691_v48  ;;  %v700_v63 = vsel %vm5644_vm8, %v691_v48, %v683_v29  ;;  %v775_v21 = vmul.f32 %v5757_v26, %v5759_v47  ;;  %v5763_v48 = vld [vmem:[#allocation40_spill] sm:$0xff]  ;;  %v5764_v47 = vld [vmem:[#allocation2_spill] sm:$0xff] }
 0x250   : > { %v836_v0 = vsel %vm5652_vm7, %v5761_v15, %v5760_v8  ;;  %v707_v28 = vsel %vm5652_vm7, %v696_v27, %v675_v41  ;;  %v716_v12 = vsel %vm5653_vm9, %v671_v39, %v700_v63  ;;  %v860_v29 = vsel %vm5644_vm8, %v5763_v48, %v5762_v32 }
 0x251   : > { %v784_v24 = vadd.f32 %v776_v55, %v744_v46  ;;  %v743_v26 = vmul.f32 %v5758_v1, %v707_v28  ;;  %v808_v11 = vmul.f32 %v5764_v47, %v716_v12  ;;  %v840_v33 = vsel %vm5652_vm7, %v5760_v8, %v5761_v15  ;;  %v5766_v46 = vld [vmem:[#allocation9_spill] sm:$0xff]  ;;  %v5770_v15 = vld [vmem:[#allocation26_spill] sm:$0xff] }
 0x252   : > { %v864_v63 = vsel %vm5644_vm8, %v5762_v32, %v5763_v48  ;;  %v3936_v39 = vadd.f32 %v3832_v61, %v578_v16  ;;  %v3939_v41 = vadd.f32 %v3827_v50, %v563_v31  ;;  %v904_v55 = vmul.f32 %v5766_v46, %v836_v0  ;;  %v5769_v16 = vld [vmem:[#allocation20_spill] sm:$0xff] }
 0x253   : > { %v783_v1 = vadd.f32 %v775_v21, %v743_v26  ;;  %v807_v12 = vmul.f32 %v5764_v47, %v696_v27  ;;  %v816_v28 = vadd.f32 %v808_v11, %v784_v24  ;;  %v857_v8 = vsel %vm5644_vm8, %v5768_v58, %v5767_v22 }
 0x254   : > { %5765 = vst [vmem:[#allocation33_spill] sm:$0xff] %v3939_v41  ;;  %v861_v32 = vsel %vm5644_vm8, %v5767_v22, %v5768_v58  ;;  %v837_v31 = vsel %vm5652_vm7, %v5770_v15, %v5769_v16  ;;  %v871_v21 = vsel %vm5652_vm7, %v860_v29, %v840_v33  ;;  %v833_v24 = vsel %vm5652_vm7, %v5769_v16, %v5770_v15  ;;  %v5774_v58 = vld [vmem:[#allocation13_spill] sm:$0xff]  ;;  %vm3978_vm8 = vmor %vm550_vm15, %vm551_vm11  ;;  %v5788_v41 = vld [vmem:[#allocation36_spill] sm:$0xff] }
 0x255   : > { %v880_v27 = vsel %vm5653_vm9, %v836_v0, %v864_v63  ;;  %v815_v11 = vadd.f32 %v807_v12, %v783_v1  ;;  %v927_v48 = vpop.permute.xlu0 %926  ;;  %v912_v26 = vadd.f32 %v904_v55, %v816_v28  ;;  %v5771_v22 = vmov 0  ;;  %v5781_v16 = vld [vmem:[#allocation5_spill] sm:$0xff]  ;;  %vm4014_vm11 = vmor %vm580_vm1, %vm581_vm13  ;;  %v5784_v63 = vld [vmem:[#allocation6_spill] sm:$0xff]  ;;  %v1024_v44 = vpop.permute.xlu2 %1023 }
 0x256   : > { %v5772_v22 = vsel %vm3967_vm0, 4294967295, %v5771_v22  ;;  %v936_v33 = vmul.f32 %v927_v48, %v5774_v58  ;;  %v992_v47 = vpop.permute.xlu1 %991  ;;  %v5775_v0 = vmov 0  ;;  %v3987_v55 = vadd.f32 %v3802_v40, %v518_v4  ;;  %v5834_v28 = vld [vmem:[#allocation30_spill] sm:$0xff] }
 0x257   : > { %5773 = vst [vmem:[#allocation4_spill] sm:$0xff] %v5772_v22  ;;  %v5776_v0 = vsel %vm3978_vm8, 4294967295, %v5775_v0  ;;  %v865_v62 = vsel %vm5652_vm7, %v857_v8, %v837_v31  ;;  %v903_v1 = vmul.f32 %v5766_v46, %v871_v21  ;;  %v1004_v12 = vsel %vm5652_vm7, %v992_v47, %v3915_v34 }
 0x258   : > { %5777 = vst [vmem:[#allocation10_spill] sm:$0xff] %v5776_v0  ;;  %v874_v46 = vsel %vm5653_vm9, %v833_v24, %v861_v32  ;;  %v968_v15 = vmul.f32 %v5781_v16, %v880_v27  ;;  %v944_v31 = vadd.f32 %v936_v33, %v912_v26  ;;  %v961_v4 = vmul.f32 %v5784_v63, %v857_v8  ;;  %v5785_v32 = vld [vmem:[#allocation14_spill] sm:$0xff]  ;;  %v5786_v26 = vld [vmem:[#allocation3_spill] sm:$0xff]  ;;  %v5789_v8 = vld [vmem:[#allocation12_spill] sm:$0xff] }
 0x259   : > { %5778 = vst [vmem:[#allocation34_spill] sm:$0xff] %v3987_v55  ;;  %v911_v55 = vadd.f32 %v903_v1, %v815_v11  ;;  %v935_v54 = vmul.f32 %v927_v48, %v5785_v32  ;;  %v897_v33 = vmul.f32 %v5786_v26, %v865_v62  ;;  %v898_v19 = vmul.f32 %v5786_v26, %v833_v24  ;;  %v5790_v1 = vld [vmem:[#allocation41_spill] sm:$0xff] }
 0x25a   : > { %v976_v22 = vadd.f32 %v968_v15, %v944_v31  ;;  %v1072_v0 = vmul.f32 %v5787_v9, %v1004_v12  ;;  %v962_v58 = vmul.f32 %v5784_v63, %v874_v46  ;;  %v1103_v11 = vmul.f32 %v5789_v8, %v5788_v41  ;;  %v5793_v15 = vld [vmem:[#allocation39_spill] sm:$0xff]  ;;  %v5794_v63 = vld [vmem:[#allocation38_spill] sm:$0xff] }
 0x25b   : > { %vm5791_vm1 = vcmp.lt.s32.totalorder %v3338_v38, 112  ;;  %v967_v62 = vmul.f32 %v5781_v16, %v860_v29  ;;  %v1104_v31 = vmul.f32 %v5789_v8, %v5793_v15  ;;  %v4051_v41 = vsel %vm5652_vm7, %v3588_v2, %v5794_v63  ;;  %v5821_v16 = vld [vmem:[#allocation33_spill] sm:$0xff] }
 0x25c   : > { %v4038_v48 = vsel %vm5791_vm1, %v3605_v10, %v5790_v1  ;;  %vm5792_vm2 = vmmov %vm5791_vm1  ;;  %v1080_v46 = vadd.f32 %v1072_v0, %v976_v22  ;;  %v1005_v32 = vsel %vm5652_vm7, %v5794_v63, %v3588_v2  ;;  %v943_v26 = vadd.f32 %v935_v54, %v911_v55  ;;  %v5798_v54 = vld [vmem:[#allocation7_spill] sm:$0xff]  ;;  %v5799_v55 = vld [vmem:[#allocation8_spill] sm:$0xff] }
 0x25d   : > { %v1031_v24 = vsel %vm5792_vm2, %v3798_v18, %v3793_v43  ;;  %v915_v27 = vpop.permute.xlu0 %914  ;;  %v905_v43 = vadd.f32 %v897_v33, %v3602_v23  ;;  %v906_v18 = vadd.f32 %v898_v19, %v3599_v59  ;;  %v5795_v29 = vand.u32 2147483647, %v3767_v53  ;;  %vm5800_vm13 = vmmov %vm5791_vm1 }
 0x25e   : > { %v1033_v22 = vsel %vm5652_vm7, %v4038_v48, %v1005_v32  ;;  %v1046_v2 = vsel %vm5653_vm9, %v3791_v60, %v1031_v24  ;;  %v929_v0 = vmul.f32 %v915_v27, %v5798_v54  ;;  %v930_v23 = vmul.f32 %v915_v27, %v5799_v55  ;;  %v1016_v33 = vpop.permute.xlu1 %1015  ;;  %vm5801_vm14 = vmmov %vm5791_vm1 }
 0x25f   : > { %vm4061_vm12 = vcmp.eq.f32.partialorder %v5795_v29, 8.507059e+37  ;;  %v1008_v59 = vsel %vm5652_vm7, %v3915_v34, %v992_v47  ;;  %v1028_v53 = vsel %vm5800_vm13, %v1016_v33, %v1024_v44  ;;  %v1032_v19 = vsel %vm5801_vm14, %v1024_v44, %v1016_v33  ;;  %v5802_v34 = vld [vmem:[#allocation19_spill] sm:$0xff]  ;;  %v5810_v29 = vld [vmem:[#allocation18_spill] sm:$0xff] }
 0x260   : > { %v1112_v8 = vadd.f32 %v1104_v31, %v1080_v46  ;;  %v937_v15 = vadd.f32 %v929_v0, %v905_v43  ;;  %v938_v60 = vadd.f32 %v930_v23, %v906_v18  ;;  %v1039_v24 = vsel %vm5652_vm7, %v1028_v53, %v1008_v59  ;;  %v5803_v44 = vld [vmem:[#allocation15_spill] sm:$0xff]  ;;  %v5816_v0 = vld [vmem:[#allocation29_spill] sm:$0xff]  ;;  %v1115_v23 = vpop.permute.xlu2 %1114 }
 0x261   : > { %v1048_v27 = vsel %vm5653_vm9, %v1004_v12, %v1032_v19  ;;  %v1066_v47 = vmul.f32 %v5802_v34, %v4051_v41  ;;  %v975_v63 = vadd.f32 %v967_v62, %v943_v26  ;;  %v1071_v32 = vmul.f32 %v5787_v9, %v1039_v24  ;;  %vm5811_vm9 = vmmov %vm5801_vm14 }
 0x262   : > { %v1136_v31 = vmul.f32 %v5803_v44, %v1048_v27  ;;  %v5804_v46 = vand.u32 2147483647, %v3724_v30  ;;  %v5807_v18 = vand.u32 2147483647, %v3711_v49  ;;  %v1065_v9 = vmul.f32 %v5802_v34, %v1033_v22  ;;  %vm5812_vm14 = vmmov %vm5811_vm9 }
 0x263   : > { %v969_v62 = vadd.f32 %v961_v4, %v937_v15  ;;  %v970_v26 = vadd.f32 %v962_v58, %v938_v60  ;;  %v1134_v30 = vmul.f32 %v5810_v29, %v1046_v2  ;;  %vm520_vm1 = vweird.f32 %v3717_v56 }
 0x264   : > { %vm4092_vm2 = vcmp.eq.f32.partialorder %v5804_v46, 8.507059e+37  ;;  %vm4098_vm13 = vcmp.eq.f32.partialorder %v5807_v18, 8.507059e+37  ;;  %v1029_v49 = vsel %vm5811_vm9, %v5790_v1, %v3605_v10  ;;  %v1030_v54 = vsel %vm5812_vm14, %v3673_v51, %v3613_v14  ;;  %v5817_v51 = vld [vmem:[#allocation28_spill] sm:$0xff]  ;;  %v5823_v46 = vld [vmem:[#allocation47_spill] sm:$0xff] }
 0x265   : > { %v1133_v4 = vmul.f32 %v5810_v29, %v3812_v17  ;;  %v1079_v58 = vadd.f32 %v1071_v32, %v975_v63  ;;  %v5813_v22 = vand.u32 2147483647, %v3709_v42  ;;  %vm475_vm15 = vweird.f32 %v3694_v13  ;;  %v1155_v59 = vpop.permute.xlu0 %1154  ;;  %v5820_v63 = vld [vmem:[#allocation46_spill] sm:$0xff] }
 0x266   : > { %v1097_v10 = vmul.f32 %v3844_v20, %v5816_v0  ;;  %v1073_v1 = vadd.f32 %v1065_v9, %v969_v62  ;;  %v1074_v55 = vadd.f32 %v1066_v47, %v970_v26  ;;  %v1142_v14 = vadd.f32 %v1134_v30, %v3840_v36  ;;  %v1159_v34 = vpop.permute.xlu1 %1158  ;;  %v5825_v9 = vld [vmem:[#allocation45_spill] sm:$0xff]  ;;  %v5839_v0 = vld [vmem:[#allocation44_spill] sm:$0xff] }
 0x267   : > { %vm4120_vm7 = vcmp.eq.f32.partialorder %v5813_v22, 8.507059e+37  ;;  %vm490_vm9 = vweird.f32 %v3702_v37  ;;  %v1098_v17 = vmul.f32 %v3844_v20, %v5817_v51  ;;  %v1135_v33 = vmul.f32 %v5803_v44, %v1028_v53 }
 0x268   : > { %v1144_v19 = vadd.f32 %v1136_v31, %v1112_v8  ;;  %v1111_v15 = vadd.f32 %v1103_v11, %v1079_v58  ;;  %vm5818_vm14 = vcmp.ge.s32.totalorder %v3345_v52, 240  ;;  %v1141_v24 = vadd.f32 %v1133_v4, %v3846_v3  ;;  %v1147_v58 = vpop.permute.xlu2 %1146 }
 0x269   : > { %v1044_v60 = vsel %vm5818_vm14, %v3671_v35, %v1030_v54  ;;  %v1166_v27 = vadd.f32 %v1155_v59, %v1142_v14  ;;  %v5819_v36 = vsel %vm4014_vm11, %v3832_v61, %v3936_v39  ;;  %v1105_v11 = vadd.f32 %v1097_v10, %v1073_v1  ;;  %v5840_v10 = vld [vmem:[#allocation49_spill] sm:$0xff] }
 0x26a   : > { %v588_v20 = vsel %vm4061_vm12, %v3972_v7, %v5819_v36  ;;  %v1168_v53 = vadd.f32 %v1159_v34, %v1144_v19  ;;  %v1143_v8 = vadd.f32 %v1135_v33, %v1111_v15  ;;  %v1106_v47 = vadd.f32 %v1098_v17, %v1074_v55  ;;  %v5846_v33 = vld [vmem:[#allocation34_spill] sm:$0xff]  ;;  %v2931_v17 = vld [vmem:[%s5574_s3 + $0x10] sm:$0xff] }
 0x26b   : > { %v1131_v35 = vmul.f32 %v5820_v63, %v3682_v6  ;;  %v1132_v3 = vmul.f32 %v5820_v63, %v1044_v60  ;;  %v1042_v21 = vsel %vm5818_vm14, %v4051_v41, %v1029_v49  ;;  %v1129_v32 = vmul.f32 %v1115_v23, %v4038_v48  ;;  %v5826_v41 = vld [vmem:[#allocation48_spill] sm:$0xff]  ;;  %v5828_v48 = vld [vmem:[#allocation17_spill] sm:$0xff]  ;;  %v5851_v60 = vld [vmem:[#allocation43_spill] sm:$0xff] }
 0x26c   : > { %v1130_v61 = vmul.f32 %v1115_v23, %v1042_v21  ;;  %v1165_v39 = vadd.f32 %v1155_v59, %v1141_v24  ;;  %v4151_v44 = vmul.f32 %v1168_v53, %v588_v20  ;;  %v1167_v7 = vadd.f32 %v1159_v34, %v1143_v8  ;;  %v5842_v23 = vld [vmem:[#allocation31_spill] sm:$0xff]  ;;  %v5858_v8 = vld [vmem:[#allocation16_spill] sm:$0xff]  ;;  %v2933_v34 = vld [vmem:[%s5574_s3] sm:$0xff] }
 0x26d   : > { %v5822_v31 = vsel %vm3999_vm10, %v3827_v50, %v5821_v16  ;;  %v5827_v62 = vsel %vm3978_vm8, %v5825_v9, %v5826_v41  ;;  %v5829_v29 = vand.u32 2147483648, %v3709_v42  ;;  %vm5830_vm11 = vweird.f32 %v3764_v57 }
 0x26e   : > { %v573_v6 = vsel %vm4092_vm2, %v5823_v46, %v5822_v31  ;;  %v558_v26 = vsel %vm4098_vm13, %v5828_v48, %v5827_v62  ;;  %vm5831_vm10 = vweird.f32 %v3707_v5  ;;  %v489_v43 = vadd.f32 %v3756_v25, %v5834_v28  ;;  %1234 = vmatpush.msra.mxu3 %v4151_v44  ;;  %v1151_v36 = vpop.permute.xlu1 %1150  ;;  %v1177_v62 = vld [vmem:[%s5572_s1 + $0x40] sm:$0xff]  ;;  %v1180_v48 = vld [vmem:[%s5572_s1 + $0x58] sm:$0xff] }
 0x26f   : > { %v542_v30 = vor.u32 1.1754944e-38, %v5829_v29  ;;  %vm4175_vm12 = vmor %vm5831_vm10, %vm5830_vm11  ;;  %v4182_v49 = vmul.f32 %v1167_v7, %v573_v6  ;;  %v4184_v12 = vmul.f32 %v1166_v27, %v558_v26  ;;  %vm5835_vm8 = vweird.f32 %v3802_v40 }
 0x270   : > { %vm4190_vm2 = vmor %vm520_vm1, %vm5835_vm8  ;;  %v1137_v54 = vadd.f32 %v1129_v32, %v1105_v11  ;;  %v1138_v4 = vadd.f32 %v1130_v61, %v1106_v47  ;;  %v5841_v1 = vsel %vm3967_vm0, %v5839_v0, %v5840_v10  ;;  %v508_v14 = vsel %vm4175_vm12, %v3764_v57, %v5842_v23 }
 0x271   : > { %v543_v55 = vsel %vm4120_vm7, %v542_v30, %v5841_v1  ;;  %v5843_v51 = vand.u32 2147483647, %v3707_v5  ;;  %v523_v59 = vsel %vm4190_vm2, %v3802_v40, %v5846_v33  ;;  %vm5847_vm0 = vweird.f32 %v3721_v45  ;;  %1205 = vmatpush.msra.mxu2 %v4182_v49  ;;  %1235 = vmatpush.msra.mxu3 %v4184_v12  ;;  %v5852_v40 = vld [vmem:[#allocation42_spill] sm:$0xff] }
 0x272   : > { %vm4219_vm7 = vmor %vm475_vm15, %vm5847_vm0  ;;  %v4225_v57 = vmul.f32 %v1165_v39, %v543_v55  ;;  %v5850_v19 = vand.u32 2147483648, %v3707_v5  ;;  %v1139_v24 = vadd.f32 %v1131_v35, %v5851_v60  ;;  %v1140_v27 = vadd.f32 %v1132_v3, %v5852_v40  ;;  %v2930_v55 = vld [vmem:[%s5574_s3 + $0x8] sm:$0xff] }
 0x273   : > { %vm4207_vm1 = vcmp.eq.f32.partialorder %v5843_v51, 8.507059e+37  ;;  %vm5853_vm13 = vweird.f32 %v3756_v25  ;;  %v5856_v20 = vand.u32 2147483647, %v3717_v56  ;;  %v5857_v53 = vand.u32 2147483648, %v3717_v56 }
 0x274   : > { %v512_v15 = vor.u32 1.1754944e-38, %v5850_v19  ;;  %vm4235_vm15 = vmor %vm490_vm9, %vm5853_vm13  ;;  %v478_v11 = vsel %vm4219_vm7, %v3721_v45, %v5858_v8  ;;  %1206 = vmatpush.msra.mxu2 %v4225_v57  ;;  %v1163_v63 = vadd.f32 %v1151_v36, %v1139_v24  ;;  %v1164_v35 = vadd.f32 %v1151_v36, %v1140_v27  ;;  %v4329_v8 = vld [vmem:[%s5574_s3 + $0x20] sm:$0xff] }
 0x275   : > { %vm525_vm14 = vcmp.eq.f32.partialorder %v5856_v20, 8.507059e+37  ;;  %v527_v5 = vor.u32 1.1754944e-38, %v5857_v53  ;;  %v493_v47 = vsel %vm4235_vm15, %v3756_v25, %v489_v43  ;;  %v1161_v3 = vadd.f32 %v1147_v58, %v1137_v54  ;;  %v4313_v20 = vld [vmem:[%s5574_s3 + $0x38] sm:$0xff] }
 0x276   : > { %v1162_v21 = vadd.f32 %v1147_v58, %v1138_v4  ;;  %v513_v32 = vsel %vm4207_vm1, %v512_v15, %v508_v14  ;;  %v5859_v61 = vand.u32 2147483648, %v3694_v13  ;;  %v5860_v7 = vand.u32 2147483648, %v3702_v37  ;;  %v2932_v15 = vld [vmem:[%s5574_s3 + $0x18] sm:$0xff] }
 0x277   : > { %v528_v56 = vsel %vm525_vm14, %v527_v5, %v523_v59  ;;  %v4257_v16 = vmul.f32 %v1163_v63, %v513_v32  ;;  %v5861_v25 = vand.u32 2147483647, %v3694_v13  ;;  %v5862_v46 = vand.u32 2147483647, %v3702_v37  ;;  %v1178_v13 = vld [vmem:[%s5572_s1 + $0x48] sm:$0xff]  ;;  %v1179_v37 = vld [vmem:[%s5572_s1 + $0x50] sm:$0xff] }
 0x278   : > { %v482_v39 = vor.u32 1.1754944e-38, %v5859_v61  ;;  %v497_v45 = vor.u32 1.1754944e-38, %v5860_v7  ;;  %v4259_v31 = vmul.f32 %v1164_v35, %v528_v56  ;;  %vm5863_vm10 = vcmask 261120   ;;  %v4321_v5 = vld [vmem:[%s5574_s3 + $0x30] sm:$0xff]  ;;  %v4339_v56 = vld [vmem:[%s5574_s3 + $0x28] sm:$0xff] }
 0x279   : > { %vm480_vm9 = vcmp.eq.f32.partialorder %v5861_v25, 8.507059e+37  ;;  %vm495_vm11 = vcmp.eq.f32.partialorder %v5862_v46, 8.507059e+37  ;;  %1207 = vmatpush.msra.mxu2 %v4257_v16  ;;  %vm5864_vm12 = vmmov %vm5863_vm10  ;;  %v5871_v59 = vmov 0   ;;  %v5872_v40 = vmov 6   ;;  %v1302_v25 = vld [vmem:[%s5572_s1 + $0x78] sm:$0xff] }
 0x27a   : > { %v483_v6 = vsel %vm480_vm9, %v482_v39, %v478_v11  ;;  %v498_v18 = vsel %vm495_vm11, %v497_v45, %v493_v47  ;;  %1236 = vmatpush.msra.mxu3 %v4259_v31  ;;  %vm5865_vm8 = vmmov %vm5863_vm10  ;;  %v5873_v53 = vmov 1   ;;  %v1299_v39 = vld [vmem:[%s5572_s1 + $0x60] sm:$0xff]  ;;  %v5874_v7 = vmov 2   ;;  %v4385_v46 = vld [vmem:[%s5573_s2 + $0x38] sm:$0xff] }
 0x27b   : > { %v4267_v9 = vmul.f32 %v1161_v3, %v483_v6  ;;  %v4269_v41 = vmul.f32 %v1162_v21, %v498_v18  ;;  %vm5866_vm2 = vmmov %vm5865_vm8  ;;  %v5877_v45 = vmov 3   ;;  %v4393_v6 = vld [vmem:[%s5573_s2 + $0x30] sm:$0xff]  ;;  %v4401_v18 = vld [vmem:[%s5573_s2 + $0x20] sm:$0xff] }
 0x27c   : > { %vm5867_vm1 = vmmov %vm5866_vm2 }
 0x27d   : > { %1208 = vmatpush.msra.mxu2 %v4267_v9  ;;  %1237 = vmatpush.msra.mxu3 %v4269_v41  ;;  %vm5868_vm0 = vmmov %vm5867_vm1 }
 0x27e   : > { %2670 = vmatmul.msk.f32.vlgmr.msra.gmra.mxu2 %vm5863_vm10, %v1177_v62  ;;  %2674 = vmatmul.msk.f32.vlgmr.msra.gmra.mxu3 %vm5864_vm12, %v1177_v62  ;;  %vm5869_vm7 = vmmov %vm5868_vm0 }
 0x27f   : > { %vm5870_vm13 = vmmov %vm5868_vm0 }
 0x280   : > { %vm5875_vm15 = vmmov %vm5868_vm0 }
 0x281   : > { %vm5876_vm14 = vmmov %vm5868_vm0 }
 0x282   : > { %vm5878_vm9 = vmmov %vm5868_vm0 }
 0x283   : > { %vm5879_vm11 = vmmov %vm5868_vm0 }
 0x284   : > { %vm5880_vm10 = vmmov %vm5868_vm0 }
 0x285   : > { %vm5881_vm12 = vmmov %vm5868_vm0 }
 0x286   : > { %2671 = vmatmul.msk.f32.gmra.mxu2 %vm5865_vm8, %v1178_v13  ;;  %2675 = vmatmul.msk.f32.gmra.mxu3 %vm5866_vm2, %v1178_v13  ;;  %vm5882_vm8 = vmmov %vm5868_vm0 }
 0x287   : > { %vm5883_vm2 = vmmov %vm5868_vm0 }
 0x28e   : > { %2672 = vmatmul.msk.f32.gmra.mxu2 %vm5867_vm1, %v1179_v37  ;;  %2676 = vmatmul.msk.f32.gmra.mxu3 %vm5868_vm0, %v1179_v37  ;;  %vm5894_vm1 = vmmov %vm5868_vm0 }
 0x296   : > { %2673 = vmatmul.msk.f32.gmra.mxu2 %vm5869_vm7, %v1180_v48  ;;  %2677 = vmatmul.msk.f32.gmra.mxu3 %vm5870_vm13, %v1180_v48  ;;  %v5884_v48 = vmov 7   ;;  %vm5896_vm7 = vmmov %vm5868_vm0 }
 0x297   : > { %vm5897_vm13 = vmmov %vm5868_vm0 }
 0x301   : > { %v1210_v26 = vpop.f32.mrf.mxu2  ;;  %v1239_v29 = vpop.f32.mrf.mxu3 }
 0x302   : > { %v1251_v22 = vadd.f32 %v1239_v29, %v1210_v26  ;;  %v4412_v29 = vld [vmem:[%s5573_s2 + $0x28] sm:$0xff] }
 0x309   : > { %v1213_v30 = vpop.f32.mrf.mxu2  ;;  %v1242_v50 = vpop.f32.mrf.mxu3 }
 0x30a   : > { %v1254_v28 = vadd.f32 %v1242_v50, %v1213_v30 }
 0x30c   : > { %1255 = vadd.xlane.f32.xlu0 %v1254_v28 }
 0x311   : > { %v1216_v43 = vpop.f32.mrf.mxu2  ;;  %v1245_v42 = vpop.f32.mrf.mxu3 }
 0x312   : > { %v1257_v54 = vadd.f32 %v1245_v42, %v1216_v43 }
 0x314   : > { %1258 = vadd.xlane.f32.xlu2 %v1257_v54 }
 0x319   : > { %v1219_v4 = vpop.f32.mrf.mxu2  ;;  %v1248_v58 = vpop.f32.mrf.mxu3 }
 0x31a   : > { %v1260_v0 = vadd.f32 %v1248_v58, %v1219_v4 }
 0x31c   : > { %1252 = vadd.xlane.f32.xlu2 %v1251_v22  ;;  %1261 = vadd.xlane.f32.xlu1 %v1260_v0 }
 0x37f   : > { %v1256_v10 = vpop.xlane.xlu0 %1255 }
 0x380   : > { %v1264_v1 = vmul.f32 0.00390625, %v1256_v10 }
 0x382   : > { %v1268_v23 = vadd.f32 %v2930_v55, %v1264_v1 }
 0x384   : > { %1278 = vperm.xlu0 %2817, %v1268_v23  }
 0x387   : > { %v1259_v14 = vpop.xlane.xlu2 %1258 }
 0x388   : > { %v1265_v51 = vmul.f32 0.00390625, %v1259_v14 }
 0x38a   : > { %v1269_v33 = vadd.f32 %v2931_v17, %v1265_v51 }
 0x38c   : > { %1283 = vperm.xlu2 %2816, %v1269_v33   ;;  %2822 = vset.pattern.permute.xlu0 %v5871_v59  ;;  %v2934_v33 = vld [vmem:[%s3104_s10 + $0x20] sm:$0xff] }
 0x38d   : > { %1414 = vperm.xlu0 %2822, %v4321_v5  }
 0x38f   : > { %v1262_v2 = vpop.xlane.xlu1 %1261  ;;  %v1253_v24 = vpop.xlane.xlu2 %1252 }
 0x390   : > { %v1266_v19 = vmul.f32 0.00390625, %v1262_v2  ;;  %v1263_v27 = vmul.f32 0.00390625, %v1253_v24  ;;  %v2935_v2 = vld [vmem:[%s3104_s10 + $0x28] sm:$0xff]  ;;  %v2936_v24 = vld [vmem:[%s3104_s10 + $0x10] sm:$0xff] }
 0x392   : > { %v1270_v60 = vadd.f32 %v2932_v15, %v1266_v19  ;;  %v1267_v36 = vadd.f32 %v2933_v34, %v1263_v27 }
 0x394   : > { %1288 = vperm.xlu1 %2818, %v1270_v60   ;;  %2819 = vset.pattern.permute.xlu2 %v5872_v40 }
 0x395   : > { %1316 = vperm.xlu2 %2819, %v2932_v15   ;;  %2825 = vset.pattern.permute.xlu0 %v5873_v53 }
 0x396   : > { %1435 = vperm.xlu0 %2825, %v4339_v56  }
 0x39c   : > { %1273 = vperm.xlu1 %2818, %v1267_v36  }
 0x39d   : > { %1308 = vperm.xlu2 %2819, %v2930_v55  }
 0x39e   : > { %2830 = vset.pattern.permute.xlu0 %v5877_v45 }
 0x39f   : > { %1606 = vperm.xlu0 %2830, %v4313_v20  }
 0x3a4   : > { %2820 = vset.pattern.permute.xlu1 %v5872_v40 }
 0x3a5   : > { %1312 = vperm.xlu1 %2820, %v2931_v17   ;;  %1304 = vperm.xlu2 %2819, %v2933_v34   ;;  %v2937_v34 = vld [vmem:[%s3104_s10 + $0x18] sm:$0xff] }
 0x3a7   : > { %2832 = vset.pattern.permute.xlu0 %v5872_v40 }
 0x3a8   : > { %1975 = vperm.xlu0 %2832, %v4385_v46  }
 0x3ad   : > { %2821 = vset.pattern.permute.xlu1 %v5871_v59  ;;  %2824 = vset.pattern.permute.xlu2 %v5871_v59 }
 0x3ae   : > { %1419 = vperm.xlu1 %2821, %v4313_v20   ;;  %1409 = vperm.xlu2 %2824, %v4339_v56  }
 0x3b0   : > { %1971 = vperm.xlu0 %2832, %v4393_v6  }
 0x3b6   : > { %2823 = vset.pattern.permute.xlu1 %v5873_v53  ;;  %1404 = vperm.xlu2 %2824, %v4329_v8  }
 0x3b7   : > { %1443 = vperm.xlu1 %2823, %v4313_v20  }
 0x3b8   : > { %2834 = vset.pattern.permute.xlu0 %v5871_v59 }
 0x3b9   : > { %1896 = vperm.xlu0 %2834, %v4401_v18  }
 0x3be   : > { %2826 = vset.pattern.permute.xlu2 %v5874_v7 }
 0x3bf   : > { %1439 = vperm.xlu1 %2823, %v4321_v5   ;;  %1582 = vperm.xlu2 %2826, %v4313_v20  }
 0x3c1   : > { %2841 = vset.pattern.permute.xlu0 %v5873_v53 }
 0x3c2   : > { %2059 = vperm.xlu0 %2841, %v4401_v18  }
 0x3c7   : > { %1431 = vperm.xlu1 %2823, %v4329_v8   ;;  %1574 = vperm.xlu2 %2826, %v4339_v56  }
 0x3ca   : > { %2842 = vset.pattern.permute.xlu0 %v5884_v48 }
 0x3cb   : > { %2135 = vperm.xlu0 %2842, %v4385_v46  }
 0x3cf   : > { %2827 = vset.pattern.permute.xlu1 %v5874_v7  ;;  %2829 = vset.pattern.permute.xlu2 %v5877_v45 }
 0x3d0   : > { %1578 = vperm.xlu1 %2827, %v4321_v5   ;;  %1598 = vperm.xlu2 %2829, %v4339_v56  }
 0x3d3   : > { %2123 = vperm.xlu0 %2842, %v4401_v18  }
 0x3d8   : > { %2828 = vset.pattern.permute.xlu1 %v5877_v45  ;;  %1943 = vperm.xlu2 %2829, %v4385_v46  }
 0x3d9   : > { %1594 = vperm.xlu1 %2828, %v4329_v8  }
 0x3db   : > { %2849 = vset.pattern.permute.xlu0 %v5874_v7 }
 0x3dc   : > { %1570 = vperm.xlu0 %2849, %v4329_v8  }
 0x3e0   : > { %1939 = vperm.xlu2 %2829, %v4393_v6  }
 0x3e1   : > { %1602 = vperm.xlu1 %2828, %v4321_v5  }
 0x3e4   : > { %2231 = vperm.xlu0 %2849, %v4412_v29  }
 0x3e6   : > { %v1284_v11 = vpop.permute.xlu2 %1283 }
 0x3e7   : > { %v1295_v21 = vmul.f32 %v1284_v11, %v4225_v57  ;;  %v1296_v32 = vmul.f32 %v1284_v11, %v4184_v12  ;;  %v2938_v11 = vld [vmem:[%s3104_s10 + $0x30] sm:$0xff] }
 0x3e8   : > { %1935 = vperm.xlu2 %2829, %v4412_v29  }
 0x3e9   : > { %2831 = vset.pattern.permute.xlu1 %v5871_v59 }
 0x3ea   : > { %1911 = vperm.xlu1 %2831, %v4385_v46  }
 0x3f0   : > { %2833 = vset.pattern.permute.xlu2 %v5873_v53 }
 0x3f1   : > { %2071 = vperm.xlu2 %2833, %v4385_v46  }
 0x3f2   : > { %1906 = vperm.xlu1 %2831, %v4393_v6  }
 0x3f6   : > { %v1279_v3 = vpop.permute.xlu0 %1278 }
 0x3f9   : > { %2836 = vset.pattern.permute.xlu2 %v5872_v40 }
 0x3fa   : > { %1901 = vperm.xlu1 %2831, %v4412_v29   ;;  %1967 = vperm.xlu2 %2836, %v4412_v29  }
 0x3ff   : > { %v1415_v0 = vpop.permute.xlu0 %1414 }
 0x402   : > { %2835 = vset.pattern.permute.xlu1 %v5877_v45  ;;  %2837 = vset.pattern.permute.xlu2 %v5873_v53 }
 0x403   : > { %1931 = vperm.xlu1 %2835, %v4401_v18   ;;  %2067 = vperm.xlu2 %2837, %v4393_v6  }
 0x406   : > { %v1289_v47 = vpop.permute.xlu1 %1288 }
 0x407   : > { %v1297_v63 = vmul.f32 %v1289_v47, %v4182_v49  ;;  %v1298_v35 = vmul.f32 %v1289_v47, %v4151_v44  ;;  %v1293_v49 = vmul.f32 %v1279_v3, %v4257_v16  ;;  %v1294_v44 = vmul.f32 %v1279_v3, %v4259_v31  ;;  %v1300_v16 = vld [vmem:[%s5572_s1 + $0x68] sm:$0xff]  ;;  %v1301_v31 = vld [vmem:[%s5572_s1 + $0x70] sm:$0xff]  ;;  %v2940_v3 = vld [vmem:[%s3104_s10] sm:$0xff] }
 0x409   : > { %1343 = vmatpush.msrb.mxu2 %v1297_v63  ;;  %1372 = vmatpush.msrb.mxu3 %v1298_v35  ;;  %v2939_v63 = vld [vmem:[%s3104_s10 + $0x38] sm:$0xff] }
 0x40b   : > { %1344 = vmatpush.msrb.mxu2 %v1295_v21  ;;  %1373 = vmatpush.msrb.mxu3 %v1296_v32  ;;  %v2941_v32 = vld [vmem:[%s3104_s10 + $0x8] sm:$0xff] }
 0x40c   : > { %2838 = vset.pattern.permute.xlu1 %v5872_v40 }
 0x40d   : > { %1345 = vmatpush.msrb.mxu2 %v1293_v49  ;;  %1374 = vmatpush.msrb.mxu3 %v1294_v44 }
 0x40e   : > { %v1274_v57 = vpop.permute.xlu1 %1273  ;;  %1963 = vperm.xlu1 %2838, %v4401_v18  }
 0x40f   : > { %v1291_v12 = vmul.f32 %v1274_v57, %v4267_v9  ;;  %v1292_v61 = vmul.f32 %v1274_v57, %v4269_v41  ;;  %v1317_v9 = vpop.permute.xlu2 %1316 }
 0x411   : > { %1346 = vmatpush.msrb.mxu2 %v1291_v12  ;;  %1375 = vmatpush.msrb.mxu3 %v1292_v61 }
 0x412   : > { %2678 = vmatmul.msk.f32.vlgmr.msrb.gmra.mxu2 %vm5875_vm15, %v1299_v39  ;;  %2682 = vmatmul.msk.f32.vlgmr.msrb.gmra.mxu3 %vm5876_vm14, %v1299_v39  ;;  %vm5898_vm15 = vmmov %vm5868_vm0 }
 0x413   : > { %vm5899_vm14 = vmmov %vm5868_vm0 }
 0x416   : > { %2839 = vset.pattern.permute.xlu1 %v5873_v53 }
 0x417   : > { %v1313_v41 = vpop.permute.xlu1 %1312  ;;  %v1309_v62 = vpop.permute.xlu2 %1308  ;;  %2063 = vperm.xlu1 %2839, %v4412_v29  }
 0x41a   : > { %2679 = vmatmul.msk.f32.gmra.mxu2 %vm5878_vm9, %v1300_v16  ;;  %2683 = vmatmul.msk.f32.gmra.mxu3 %vm5879_vm11, %v1300_v16  ;;  %vm5900_vm9 = vmmov %vm5868_vm0 }
 0x41b   : > { %vm5901_vm11 = vmmov %vm5868_vm0 }
 0x41f   : > { %v1305_v28 = vpop.permute.xlu2 %1304 }
 0x420   : > { %v1420_v26 = vpop.permute.xlu1 %1419 }
 0x422   : > { %2680 = vmatmul.msk.f32.gmra.mxu2 %vm5880_vm10, %v1301_v31  ;;  %2684 = vmatmul.msk.f32.gmra.mxu3 %vm5881_vm12, %v1301_v31  ;;  %vm5903_vm10 = vmmov %vm5868_vm0 }
 0x423   : > { %vm5904_vm12 = vmmov %vm5868_vm0 }
 0x427   : > { %v1410_v4 = vpop.permute.xlu2 %1409 }
 0x429   : > { %v1444_v43 = vpop.permute.xlu1 %1443 }
 0x42a   : > { %2681 = vmatmul.msk.f32.gmra.mxu2 %vm5882_vm8, %v1302_v25  ;;  %2685 = vmatmul.msk.f32.gmra.mxu3 %vm5883_vm2, %v1302_v25  ;;  %vm5905_vm8 = vmmov %vm5868_vm0 }
 0x42b   : > { %vm5906_vm2 = vmmov %vm5868_vm0 }
 0x42f   : > { %v1405_v44 = vpop.permute.xlu2 %1404 }
 0x431   : > { %v1440_v10 = vpop.permute.xlu1 %1439 }
 0x495   : > { %v1348_v13 = vpop.f32.mrf.mxu2  ;;  %v1377_v37 = vpop.f32.mrf.mxu3 }
 0x496   : > { %v1349_v23 = vadd.f32 %v1348_v13, %v1305_v28  ;;  %v1378_v14 = vadd.f32 %v1377_v37, %v1305_v28 }
 0x498   : > { %v4447_v21 = vadd.f32 %v2940_v3, %v1349_v23  ;;  %v4450_v49 = vadd.f32 %v2941_v32, %v1378_v14 }
 0x49a   : > { %5891 = vst [vmem:[#allocation25_spill] sm:$0xff] %v4447_v21 }
 0x49b   : > { %5892 = vst [vmem:[#allocation23_spill] sm:$0xff] %v4450_v49 }
 0x49d   : > { %v1351_v30 = vpop.f32.mrf.mxu2  ;;  %v1380_v50 = vpop.f32.mrf.mxu3 }
 0x49e   : > { %v1352_v1 = vadd.f32 %v1351_v30, %v1309_v62  ;;  %v1381_v55 = vadd.f32 %v1380_v50, %v1309_v62  ;;  %v1423_v62 = vmul.f32 %v1405_v44, %v4450_v49  ;;  %v5893_v30 = vmov 8  }
 0x49f   : > { %2854 = vset.pattern.permute.xlu0 %v5893_v30 }
 0x4a0   : > { %v4435_v27 = vadd.f32 %v2936_v24, %v1352_v1  ;;  %v4438_v36 = vadd.f32 %v2937_v34, %v1381_v55  ;;  %2299 = vperm.xlu0 %2854, %v4393_v6   ;;  %v2696_v1 = vld [vmem:[%s5572_s1 + $0xb0] sm:$0xff] }
 0x4a2   : > { %5887 = vst [vmem:[#allocation35_spill] sm:$0xff] %v4435_v27  ;;  %v1424_v31 = vmul.f32 %v1410_v4, %v4435_v27  ;;  %v1425_v25 = vmul.f32 %v1410_v4, %v4438_v36  ;;  %v2691_v4 = vld [vmem:[%s5572_s1 + $0x88] sm:$0xff] }
 0x4a3   : > { %5888 = vst [vmem:[#allocation40_spill] sm:$0xff] %v4438_v36 }
 0x4a5   : > { %v1354_v42 = vpop.f32.mrf.mxu2  ;;  %v1383_v54 = vpop.f32.mrf.mxu3 }
 0x4a6   : > { %v1355_v58 = vadd.f32 %v1354_v42, %v1313_v41  ;;  %v1384_v22 = vadd.f32 %v1383_v54, %v1313_v41  ;;  %v1436_v41 = vpop.permute.xlu0 %1435  ;;  %v2690_v42 = vld [vmem:[%s5572_s1 + $0x80] sm:$0xff]  ;;  %v5895_v54 = vmov 4  }
 0x4a7   : > { %v1448_v50 = vadd.f32 %v1436_v41, %v1424_v31  ;;  %v1449_v28 = vadd.f32 %v1436_v41, %v1425_v25  ;;  %2843 = vset.pattern.permute.xlu1 %v5895_v54  ;;  %2840 = vset.pattern.permute.xlu2 %v5895_v54 }
 0x4a8   : > { %v4428_v59 = vadd.f32 %v2934_v33, %v1355_v58  ;;  %v4431_v19 = vadd.f32 %v2935_v2, %v1384_v22  ;;  %2095 = vperm.xlu1 %2843, %v4412_v29   ;;  %2855 = vset.pattern.permute.xlu0 %v5895_v54  ;;  %v2692_v58 = vld [vmem:[%s5572_s1 + $0x90] sm:$0xff]  ;;  %v2693_v22 = vld [vmem:[%s5572_s1 + $0x98] sm:$0xff] }
 0x4a9   : > { %2103 = vperm.xlu0 %2855, %v4385_v46   ;;  %2099 = vperm.xlu2 %2840, %v4393_v6  }
 0x4aa   : > { %5885 = vst [vmem:[#allocation32_spill] sm:$0xff] %v4428_v59  ;;  %v1426_v61 = vmul.f32 %v1415_v0, %v4428_v59  ;;  %v1427_v39 = vmul.f32 %v1415_v0, %v4431_v19  ;;  %v5902_v0 = vmov 5  }
 0x4ab   : > { %5886 = vst [vmem:[#allocation37_spill] sm:$0xff] %v4431_v19 }
 0x4ac   : > { %v1450_v13 = vadd.f32 %v1440_v10, %v1426_v61  ;;  %v1451_v37 = vadd.f32 %v1440_v10, %v1427_v39  ;;  %v2695_v10 = vld [vmem:[%s5572_s1 + $0xa8] sm:$0xff] }
 0x4ad   : > { %v1357_v51 = vpop.f32.mrf.mxu2  ;;  %v1386_v17 = vpop.f32.mrf.mxu3 }
 0x4ae   : > { %v1358_v15 = vadd.f32 %v1357_v51, %v1317_v9  ;;  %v1387_v60 = vadd.f32 %v1386_v17, %v1317_v9  ;;  %v1422_v9 = vmul.f32 %v1405_v44, %v4447_v21  ;;  %v4535_v23 = vpop.permute.xlu0 %1606 }
 0x4b0   : > { %v4441_v47 = vadd.f32 %v2938_v11, %v1358_v15  ;;  %v4444_v35 = vadd.f32 %v2939_v63, %v1387_v60  ;;  %2846 = vset.pattern.permute.xlu1 %v5884_v48 }
 0x4b1   : > { %2127 = vperm.xlu1 %2846, %v4412_v29   ;;  %2844 = vset.pattern.permute.xlu2 %v5884_v48  ;;  %v2694_v48 = vld [vmem:[%s5572_s1 + $0xa0] sm:$0xff] }
 0x4b2   : > { %5889 = vst [vmem:[#allocation2_spill] sm:$0xff] %v4441_v47  ;;  %v1428_v57 = vmul.f32 %v1420_v26, %v4441_v47  ;;  %v1429_v12 = vmul.f32 %v1420_v26, %v4444_v35  ;;  %v1432_v26 = vpop.permute.xlu1 %1431  ;;  %2131 = vperm.xlu2 %2844, %v4393_v6  }
 0x4b3   : > { %5890 = vst [vmem:[#allocation9_spill] sm:$0xff] %v4444_v35  ;;  %v1446_v53 = vadd.f32 %v1432_v26, %v1422_v9 }
 0x4b4   : > { %v1452_v45 = vadd.f32 %v1444_v43, %v1428_v57  ;;  %v1453_v16 = vadd.f32 %v1444_v43, %v1429_v12  ;;  %v1447_v43 = vadd.f32 %v1432_v26, %v1423_v62 }
 0x4b6   : > { %1499 = vmatpush.msrb.mxu0 %v1452_v45  ;;  %1540 = vmatpush.msrb.mxu1 %v1453_v16  ;;  %v4540_v17 = vpop.permute.xlu0 %1975 }
 0x4b7   : > { %5910 = vst [vmem:[#allocation20_spill] sm:$0xff] %v4540_v17 }
 0x4b8   : > { %1500 = vmatpush.msrb.mxu0 %v1450_v13  ;;  %1541 = vmatpush.msrb.mxu1 %v1451_v37 }
 0x4b9   : > { %2847 = vset.pattern.permute.xlu1 %v5874_v7 }
 0x4ba   : > { %1501 = vmatpush.msrb.mxu0 %v1448_v50  ;;  %1542 = vmatpush.msrb.mxu1 %v1449_v28 }
 0x4bb   : > { %2235 = vperm.xlu1 %2847, %v4393_v6   ;;  %2845 = vset.pattern.permute.xlu2 %v5874_v7 }
 0x4bc   : > { %1502 = vmatpush.msrb.mxu0 %v1446_v53  ;;  %1543 = vmatpush.msrb.mxu1 %v1447_v43 }
 0x4bd   : > { %2698 = vmatmul.msk.f32.vlgmr.msrb.gmra.mxu0 %vm5894_vm1, %v2690_v42  ;;  %2706 = vmatmul.msk.f32.vlgmr.msrb.gmra.mxu1 %vm5868_vm0, %v2690_v42  ;;  %vm5907_vm1 = vmmov %vm5868_vm0 }
 0x4be   : > { %2239 = vperm.xlu2 %2845, %v4385_v46   ;;  %v4546_v15 = vpop.permute.xlu0 %1971 }
 0x4c3   : > { %2850 = vset.pattern.permute.xlu1 %v5902_v0 }
 0x4c4   : > { %2267 = vperm.xlu1 %2850, %v4393_v6   ;;  %v1579_v6 = vpop.permute.xlu1 %1578 }
 0x4c5   : > { %2699 = vmatmul.msk.f32.gmra.mxu0 %vm5896_vm7, %v2691_v4  ;;  %2707 = vmatmul.msk.f32.gmra.mxu1 %vm5897_vm13, %v2691_v4  ;;  %vm5908_vm7 = vmmov %vm5868_vm0 }
 0x4c6   : > { %2848 = vset.pattern.permute.xlu2 %v5902_v0  ;;  %vm5909_vm13 = vmmov %vm5868_vm0  ;;  %v4552_v34 = vpop.permute.xlu0 %1896 }
 0x4c7   : > { %2271 = vperm.xlu2 %2848, %v4385_v46  }
 0x4cc   : > { %2852 = vset.pattern.permute.xlu1 %v5874_v7  ;;  %v4524_v7 = vpop.permute.xlu2 %1582  ;;  %v4528_v55 = vpop.permute.xlu1 %1594 }
 0x4cd   : > { %2700 = vmatmul.msk.f32.gmra.mxu0 %vm5898_vm15, %v2692_v58  ;;  %2708 = vmatmul.msk.f32.gmra.mxu1 %vm5899_vm14, %v2692_v58  ;;  %vm5930_vm15 = vcmp.lt.s32.totalorder %v3338_v38, 1 }
 0x4ce   : > { %2227 = vperm.xlu1 %2852, %v4401_v18   ;;  %v4558_v3 = vpop.permute.xlu0 %2059  ;;  %vm5931_vm14 = vmmov %vm5930_vm15 }
 0x4cf   : > { %2851 = vset.pattern.permute.xlu2 %v5893_v30 }
 0x4d0   : > { %2303 = vperm.xlu2 %2851, %v4385_v46   ;;  %v2697_v46 = vld [vmem:[%s5572_s1 + $0xb8] sm:$0xff] }
 0x4d4   : > { %v1575_v14 = vpop.permute.xlu2 %1574  ;;  %v4538_v51 = vpop.permute.xlu1 %1602 }
 0x4d5   : > { %2701 = vmatmul.msk.f32.gmra.mxu0 %vm5900_vm9, %v2693_v22  ;;  %2709 = vmatmul.msk.f32.gmra.mxu1 %vm5901_vm11, %v2693_v22  ;;  %vm5932_vm9 = vcmp.lt.s32.totalorder %v3338_v38, 127 }
 0x4d6   : > { %2856 = vset.pattern.permute.xlu1 %v5902_v0  ;;  %v4564_v57 = vpop.permute.xlu0 %2135  ;;  %vm5933_vm11 = vmmov %vm5932_vm9 }
 0x4d7   : > { %5913 = vst [vmem:[#allocation5_spill] sm:$0xff] %v4564_v57 }
 0x4d8   : > { %2853 = vset.pattern.permute.xlu2 %v5902_v0 }
 0x4d9   : > { %2263 = vperm.xlu2 %2853, %v4412_v29  }
 0x4dc   : > { %v4542_v33 = vpop.permute.xlu2 %1598  ;;  %v4544_v2 = vpop.permute.xlu1 %1911 }
 0x4dd   : > { %2702 = vmatmul.msk.f32.gmra.mxu0 %vm5903_vm10, %v2694_v48  ;;  %2710 = vmatmul.msk.f32.gmra.mxu1 %vm5904_vm12, %v2694_v48  ;;  %5911 = vst [vmem:[#allocation26_spill] sm:$0xff] %v4544_v2  ;;  %vm5936_vm10 = vcmp.lt.s32.totalorder %v3338_v38, 112 }
 0x4de   : > { %v4570_v39 = vpop.permute.xlu0 %2123  ;;  %vm5938_vm12 = vmmov %vm5936_vm10 }
 0x4df   : > { %5915 = vst [vmem:[#allocation14_spill] sm:$0xff] %v4570_v39 }
 0x4e1   : > { %2857 = vset.pattern.permute.xlu2 %v5893_v30 }
 0x4e4   : > { %v4548_v60 = vpop.permute.xlu2 %1943  ;;  %v4550_v24 = vpop.permute.xlu1 %1906 }
 0x4e5   : > { %2703 = vmatmul.msk.f32.gmra.mxu0 %vm5905_vm8, %v2695_v10  ;;  %2711 = vmatmul.msk.f32.gmra.mxu1 %vm5906_vm2, %v2695_v10  ;;  %5912 = vst [vmem:[#allocation13_spill] sm:$0xff] %v4548_v60  ;;  %vm5939_vm8 = vcmp.lt.s32.totalorder %v3338_v38, 16 }
 0x4e6   : > { %v1571_v31 = vpop.permute.xlu0 %1570  ;;  %vm5940_vm2 = vmmov %vm5939_vm8 }
 0x4ec   : > { %v4554_v11 = vpop.permute.xlu2 %1939  ;;  %v4556_v63 = vpop.permute.xlu1 %1901 }
 0x4ed   : > { %2704 = vmatmul.msk.f32.gmra.mxu0 %vm5907_vm1, %v2696_v1  ;;  %2712 = vmatmul.msk.f32.gmra.mxu1 %vm5868_vm0, %v2696_v1  ;;  %vm5941_vm1 = vmmov %vm5940_vm2  ;;  %vm5942_vm0 = vcmp.ge.s32.totalorder %v3345_v52, 240 }
 0x4f4   : > { %v4560_v32 = vpop.permute.xlu2 %1935  ;;  %v4562_v44 = vpop.permute.xlu1 %1931 }
 0x4f5   : > { %2705 = vmatmul.msk.f32.gmra.mxu0 %vm5908_vm7, %v2697_v46  ;;  %2713 = vmatmul.msk.f32.gmra.mxu1 %vm5909_vm13, %v2697_v46  ;;  %vm5948_vm7 = vmmov %vm5931_vm14 }
 0x4f6   : > { %vm5949_vm13 = vmmov %vm5948_vm7 }
 0x4fc   : > { %v4566_v12 = vpop.permute.xlu2 %2071  ;;  %v4568_v61 = vpop.permute.xlu1 %1963 }
 0x4fd   : > { %5914 = vst [vmem:[#allocation6_spill] sm:$0xff] %v4566_v12 }
 0x504   : > { %v4572_v45 = vpop.permute.xlu2 %1967  ;;  %v4574_v16 = vpop.permute.xlu1 %2063 }
 0x50c   : > { %v4586_v13 = vpop.permute.xlu2 %2067 }
 0x514   : > { %v2100_v42 = vpop.permute.xlu2 %2099 }
 0x51a   : > { %v2096_v37 = vpop.permute.xlu1 %2095 }
 0x53a   : > { %v1504_v25 = vpop.f32.mrf.mxu0  ;;  %v1545_v9 = vpop.f32.mrf.mxu1 }
 0x53b   : > { %v4576_v41 = vadd.f32 %v1571_v31, %v1504_v25  ;;  %v4578_v62 = vadd.f32 %v1571_v31, %v1545_v9 }
 0x53d   : > { %5916 = vst [vmem:[#allocation3_spill] sm:$0xff] %v4576_v41  ;;  %1782 = vrot.lane.b32.xlu0 %v4578_v62, %s2963_s29  ;;  %1798 = vrot.lane.b32.xlu1 %v4576_v41, %s2964_s30 }
 0x53e   : > { %5917 = vst [vmem:[#allocation11_spill] sm:$0xff] %v4578_v62  ;;  %1774 = vrot.lane.b32.xlu2 %v4576_v41, %s2963_s29 }
 0x542   : > { %v1507_v26 = vpop.f32.mrf.mxu0  ;;  %v1548_v30 = vpop.f32.mrf.mxu1 }
 0x543   : > { %v1587_v50 = vadd.f32 %v1575_v14, %v1507_v26  ;;  %v1588_v28 = vadd.f32 %v1575_v14, %v1548_v30  ;;  %v4644_v30 = vpop.permute.xlu1 %2127 }
 0x545   : > { %2026 = vrot.lane.b32.xlu0 %v4578_v62, %s2965_s5  ;;  %2002 = vrot.lane.b32.xlu1 %v4578_v62, %s2966_s6  ;;  %v4592_v53 = vmul.f32 %v2096_v37, %v1587_v50  ;;  %v4594_v43 = vmul.f32 %v2096_v37, %v1588_v28 }
 0x546   : > { %1806 = vrot.lane.b32.xlu2 %v4578_v62, %s2964_s30 }
 0x54a   : > { %v1510_v4 = vpop.f32.mrf.mxu0  ;;  %v1551_v58 = vpop.f32.mrf.mxu1 }
 0x54b   : > { %v1589_v22 = vadd.f32 %v1579_v6, %v1510_v4  ;;  %v1590_v48 = vadd.f32 %v1579_v6, %v1551_v58  ;;  %v4616_v6 = vpop.permute.xlu2 %2131 }
 0x54d   : > { %1800 = vrot.lane.b32.xlu0 %v1587_v50, %s2964_s30  ;;  %1776 = vrot.lane.b32.xlu1 %v1587_v50, %s2963_s29  ;;  %v4600_v10 = vmul.f32 %v2100_v42, %v1589_v22  ;;  %v4602_v1 = vmul.f32 %v2100_v42, %v1590_v48 }
 0x54e   : > { %1994 = vrot.lane.b32.xlu2 %v4576_v41, %s2966_s6 }
 0x54f   : > { %5918 = vst [vmem:[#allocation36_spill] sm:$0xff] %v4600_v10 }
 0x550   : > { %5919 = vst [vmem:[#allocation12_spill] sm:$0xff] %v4602_v1 }
 0x552   : > { %v1554_v46 = vpop.f32.mrf.mxu1  ;;  %v1513_v25 = vpop.f32.mrf.mxu0 }
 0x553   : > { %v4621_v14 = vpop.permute.xlu2 %2239  ;;  %v4624_v31 = vadd.f32 %v4524_v7, %v1554_v46  ;;  %v4633_v37 = vadd.f32 %v4524_v7, %v1513_v25 }
 0x554   : > { %5920 = vst [vmem:[#allocation41_spill] sm:$0xff] %v4621_v14 }
 0x555   : > { %2020 = vrot.lane.b32.xlu0 %v1587_v50, %s2965_s5  ;;  %1808 = vrot.lane.b32.xlu1 %v1588_v28, %s2964_s30  ;;  %5921 = vst [vmem:[#allocation39_spill] sm:$0xff] %v4624_v31 }
 0x556   : > { %2018 = vrot.lane.b32.xlu2 %v4576_v41, %s2965_s5  ;;  %5923 = vst [vmem:[#allocation7_spill] sm:$0xff] %v4633_v37 }
 0x55b   : > { %v4630_v9 = vpop.permute.xlu2 %2271 }
 0x55c   : > { %5922 = vst [vmem:[#allocation38_spill] sm:$0xff] %v4630_v9 }
 0x55d   : > { %1996 = vrot.lane.b32.xlu1 %v1587_v50, %s2966_s6  ;;  %1778 = vrot.lane.b32.xlu0 %v1589_v22, %s2963_s29  ;;  %v4650_v50 = vpop.permute.xlu1 %2235 }
 0x55e   : > { %1784 = vrot.lane.b32.xlu2 %v1588_v28, %s2963_s29  ;;  %5925 = vst [vmem:[#allocation19_spill] sm:$0xff] %v4650_v50 }
 0x563   : > { %v4638_v26 = vpop.permute.xlu2 %2303 }
 0x564   : > { %5924 = vst [vmem:[#allocation8_spill] sm:$0xff] %v4638_v26 }
 0x565   : > { %2028 = vrot.lane.b32.xlu1 %v1588_v28, %s2965_s5  ;;  %1810 = vrot.lane.b32.xlu0 %v1590_v48, %s2964_s30  ;;  %v4658_v4 = vpop.permute.xlu1 %2267 }
 0x566   : > { %2004 = vrot.lane.b32.xlu2 %v1588_v28, %s2966_s6  ;;  %v4652_v28 = vpop.permute.xlu0 %2231  ;;  %5926 = vst [vmem:[#allocation15_spill] sm:$0xff] %v4658_v4 }
 0x56b   : > { %v2264_v7 = vpop.permute.xlu2 %2263 }
 0x56d   : > { %1786 = vrot.lane.b32.xlu1 %v1590_v48, %s2963_s29  ;;  %2022 = vrot.lane.b32.xlu0 %v1589_v22, %s2965_s5 }
 0x56e   : > { %1802 = vrot.lane.b32.xlu2 %v1589_v22, %s2964_s30  ;;  %v4660_v58 = vpop.permute.xlu0 %2299 }
 0x56f   : > { %5927 = vst [vmem:[#allocation18_spill] sm:$0xff] %v4660_v58 }
 0x575   : > { %1998 = vrot.lane.b32.xlu1 %v1589_v22, %s2966_s6  ;;  %1788 = vrot.lane.b32.xlu0 %v4624_v31, %s2963_s29 }
 0x576   : > { %2006 = vrot.lane.b32.xlu2 %v1590_v48, %s2966_s6  ;;  %v4664_v46 = vpop.permute.xlu0 %2103 }
 0x577   : > { %5929 = vst [vmem:[#allocation28_spill] sm:$0xff] %v4664_v46 }
 0x57d   : > { %2030 = vrot.lane.b32.xlu1 %v1590_v48, %s2965_s5  ;;  %v4662_v48 = vpop.permute.xlu1 %2227 }
 0x57e   : > { %1780 = vrot.lane.b32.xlu2 %v4633_v37, %s2963_s29  ;;  %5928 = vst [vmem:[#allocation29_spill] sm:$0xff] %v4662_v48 }
 0x585   : > { %1804 = vrot.lane.b32.xlu1 %v4633_v37, %s2964_s30 }
 0x586   : > { %1812 = vrot.lane.b32.xlu2 %v4624_v31, %s2964_s30 }
 0x58d   : > { %2000 = vrot.lane.b32.xlu1 %v4633_v37, %s2966_s6 }
 0x58e   : > { %2008 = vrot.lane.b32.xlu2 %v4624_v31, %s2966_s6 }
 0x595   : > { %2024 = vrot.lane.b32.xlu1 %v4633_v37, %s2965_s5 }
 0x596   : > { %2032 = vrot.lane.b32.xlu2 %v4624_v31, %s2965_s5 }
 0x598   : > { %v1775_v42 = vpop.permute.xlu2 %1774 }
 0x5a0   : > { %v1807_v22 = vpop.permute.xlu2 %1806 }
 0x5a8   : > { %v1995_v25 = vpop.permute.xlu2 %1994 }
 0x5af   : > { %v1783_v35 = vpop.permute.xlu0 %1782  ;;  %v1799_v47 = vpop.permute.xlu1 %1798 }
 0x5b0   : > { %v1790_v19 = vsel %vm5930_vm15, %v1775_v42, %v1783_v35  ;;  %v1794_v59 = vsel %vm5931_vm14, %v1783_v35, %v1775_v42  ;;  %v1814_v36 = vsel %vm5932_vm9, %v1799_v47, %v1807_v22  ;;  %v1818_v27 = vsel %vm5933_vm11, %v1807_v22, %v1799_v47  ;;  %v2019_v35 = vpop.permute.xlu2 %2018  ;;  %vm5950_vm15 = vmmov %vm5932_vm9 }
 0x5b1   : > { %v4676_v21 = vsel %vm3357_vm4, %v1818_v27, %v1790_v19  ;;  %v4680_v26 = vsel %vm3353_vm3, %v1814_v36, %v1794_v59  ;;  %v4716_v60 = vsel %vm3385_vm5, %v1790_v19, %v1818_v27  ;;  %vm5951_vm14 = vmmov %vm5932_vm9 }
 0x5b2   : > { %1838 = vrot.lane.b32.xlu1 %v4676_v21, %s2966_s6  ;;  %1854 = vrot.lane.b32.xlu2 %v4680_v26, %s2965_s5  ;;  %5947 = vst [vmem:[#allocation10_spill] sm:$0xff] %v4716_v60  ;;  %vm5952_vm9 = vmmov %vm5941_vm1 }
 0x5b3   : > { %1830 = vrot.lane.b32.xlu0 %v4680_v26, %s2966_s6  ;;  %vm5953_vm11 = vmmov %vm5941_vm1 }
 0x5b7   : > { %v2027_v42 = vpop.permute.xlu0 %2026  ;;  %v2003_v47 = vpop.permute.xlu1 %2002 }
 0x5b8   : > { %v4690_v22 = vsel %vm5936_vm10, %v2019_v35, %v2027_v42  ;;  %v2038_v58 = vsel %vm5938_vm12, %v2027_v42, %v2019_v35  ;;  %v4696_v9 = vsel %vm5939_vm8, %v1995_v25, %v2003_v47  ;;  %v2014_v14 = vsel %vm5940_vm2, %v2003_v47, %v1995_v25  ;;  %vm5954_vm12 = vmmov %vm5936_vm10 }
 0x5b9   : > { %5937 = vst [vmem:[#allocation46_spill] sm:$0xff] %v4690_v22  ;;  %v4703_v57 = vsel %vm5941_vm1, %v4690_v22, %v2014_v14  ;;  %v4708_v12 = vsel %vm5942_vm0, %v4696_v9, %v2038_v58  ;;  %v4712_v35 = vsel %vm3393_vm6, %v1794_v59, %v1814_v36  ;;  %v1785_v14 = vpop.permute.xlu2 %1784  ;;  %vm5955_vm8 = vmmov %vm5941_vm1 }
 0x5ba   : > { %5943 = vst [vmem:[#allocation33_spill] sm:$0xff] %v4708_v12  ;;  %2162 = vrot.lane.b32.xlu1 %v4712_v35, %s2966_s6  ;;  %2170 = vrot.lane.b32.xlu2 %v4716_v60, %s2966_s6  ;;  %vm5956_vm2 = vmmov %vm5942_vm0 }
 0x5bb   : > { %5945 = vst [vmem:[#allocation47_spill] sm:$0xff] %v4712_v35  ;;  %1862 = vrot.lane.b32.xlu0 %v4676_v21, %s2965_s5  ;;  %vm5957_vm1 = vmmov %vm5951_vm14 }
 0x5bc   : > { %vm5958_vm0 = vmmov %vm5957_vm1 }
 0x5bf   : > { %v1801_v58 = vpop.permute.xlu0 %1800  ;;  %v1777_v25 = vpop.permute.xlu1 %1776 }
 0x5c0   : > { %v1791_v27 = vsel %vm5948_vm7, %v1777_v25, %v1785_v14  ;;  %v1795_v36 = vsel %vm5949_vm13, %v1785_v14, %v1777_v25  ;;  %vm5959_vm13 = vmmov %vm5948_vm7 }
 0x5c1   : > { %v2005_v19 = vpop.permute.xlu2 %2004 }
 0x5c2   : > { %2186 = vrot.lane.b32.xlu1 %v4712_v35, %s2965_s5  ;;  %2194 = vrot.lane.b32.xlu2 %v4716_v60, %s2965_s5 }
 0x5c7   : > { %v1809_v59 = vpop.permute.xlu1 %1808  ;;  %v2021_v2 = vpop.permute.xlu0 %2020 }
 0x5c8   : > { %v1815_v47 = vsel %vm5950_vm15, %v1801_v58, %v1809_v59  ;;  %v1819_v31 = vsel %vm5951_vm14, %v1809_v59, %v1801_v58  ;;  %vm5960_vm15 = vmmov %vm5955_vm8 }
 0x5c9   : > { %v4738_v46 = vsel %vm3357_vm4, %v1819_v31, %v1791_v27  ;;  %v4742_v37 = vsel %vm3353_vm3, %v1815_v47, %v1795_v36  ;;  %v2157_v60 = vsel %vm3385_vm5, %v1791_v27, %v1819_v31  ;;  %v2156_v14 = vsel %vm3393_vm6, %v1795_v36, %v1815_v47  ;;  %v1803_v36 = vpop.permute.xlu2 %1802  ;;  %vm5961_vm14 = vmmov %vm5955_vm8 }
 0x5ca   : > { %1840 = vrot.lane.b32.xlu1 %v4738_v46, %s2966_s6  ;;  %1856 = vrot.lane.b32.xlu2 %v4742_v37, %s2965_s5  ;;  %v4752_v58 = vmul.f32 %v2264_v7, %v2157_v60  ;;  %v4756_v25 = vmul.f32 %v2264_v7, %v2156_v14 }
 0x5cb   : > { %1832 = vrot.lane.b32.xlu0 %v4742_v37, %s2966_s6 }
 0x5cf   : > { %v1997_v59 = vpop.permute.xlu1 %1996  ;;  %v1779_v47 = vpop.permute.xlu0 %1778 }
 0x5d0   : > { %v4760_v31 = vsel %vm5952_vm9, %v1997_v59, %v2005_v19  ;;  %v2015_v27 = vsel %vm5953_vm11, %v2005_v19, %v1997_v59  ;;  %vm5964_vm9 = vmmov %vm5936_vm10 }
 0x5d1   : > { %v2007_v12 = vpop.permute.xlu2 %2006  ;;  %vm5966_vm11 = vmmov %vm5964_vm9 }
 0x5d2   : > { %2172 = vrot.lane.b32.xlu1 %v2157_v60, %s2966_s6  ;;  %2164 = vrot.lane.b32.xlu2 %v2156_v14, %s2966_s6 }
 0x5d3   : > { %1864 = vrot.lane.b32.xlu0 %v4738_v46, %s2965_s5 }
 0x5d7   : > { %v2029_v35 = vpop.permute.xlu1 %2028  ;;  %v1811_v39 = vpop.permute.xlu0 %1810 }
 0x5d8   : > { %v4770_v7 = vsel %vm5936_vm10, %v2021_v2, %v2029_v35  ;;  %v2039_v48 = vsel %vm5954_vm12, %v2029_v35, %v2021_v2  ;;  %v1816_v2 = vsel %vm5957_vm1, %v1803_v36, %v1811_v39  ;;  %v1820_v35 = vsel %vm5958_vm0, %v1811_v39, %v1803_v36  ;;  %vm5967_vm10 = vmmov %vm5955_vm8 }
 0x5d9   : > { %v4777_v19 = vsel %vm5955_vm8, %v4770_v7, %v2015_v27  ;;  %v4782_v59 = vsel %vm5956_vm2, %v4760_v31, %v2039_v48  ;;  %v1781_v39 = vpop.permute.xlu2 %1780  ;;  %vm5968_vm12 = vmmov %vm5956_vm2 }
 0x5da   : > { %2188 = vrot.lane.b32.xlu2 %v2156_v14, %s2965_s5  ;;  %vm5969_vm8 = vmmov %vm5948_vm7 }
 0x5db   : > { %2196 = vrot.lane.b32.xlu0 %v2157_v60, %s2965_s5  ;;  %vm5970_vm2 = vmmov %vm5958_vm0 }
 0x5dc   : > { %vm5971_vm1 = vmmov %vm5958_vm0 }
 0x5dd   : > { %vm5972_vm0 = vmmov %vm5948_vm7 }
 0x5df   : > { %v1787_v22 = vpop.permute.xlu1 %1786  ;;  %v2023_v4 = vpop.permute.xlu0 %2022 }
 0x5e0   : > { %v1792_v27 = vsel %vm5948_vm7, %v1779_v47, %v1787_v22  ;;  %v1796_v48 = vsel %vm5959_vm13, %v1787_v22, %v1779_v47  ;;  %vm5975_vm13 = vmmov %vm5964_vm9 }
 0x5e1   : > { %v4796_v14 = vsel %vm3353_vm3, %v1816_v2, %v1796_v48  ;;  %v4800_v60 = vsel %vm3357_vm4, %v1820_v35, %v1792_v27  ;;  %v4816_v62 = vsel %vm3385_vm5, %v1792_v27, %v1820_v35  ;;  %v4820_v41 = vsel %vm3393_vm6, %v1796_v48, %v1816_v2 }
 0x5e2   : > { %1858 = vrot.lane.b32.xlu2 %v4796_v14, %s2965_s5  ;;  %1842 = vrot.lane.b32.xlu1 %v4800_v60, %s2966_s6  ;;  %5962 = vst [vmem:[#allocation45_spill] sm:$0xff] %v4816_v62 }
 0x5e3   : > { %1834 = vrot.lane.b32.xlu0 %v4796_v14, %s2966_s6  ;;  %5963 = vst [vmem:[#allocation48_spill] sm:$0xff] %v4820_v41 }
 0x5e7   : > { %v1999_v36 = vpop.permute.xlu1 %1998 }
 0x5e8   : > { %v4810_v22 = vsel %vm5960_vm15, %v1999_v36, %v2007_v12  ;;  %v2016_v47 = vsel %vm5961_vm14, %v2007_v12, %v1999_v36  ;;  %v1813_v12 = vpop.permute.xlu2 %1812  ;;  %v1789_v36 = vpop.permute.xlu0 %1788  ;;  %vm5977_vm15 = vmmov %vm5964_vm9 }
 0x5e9   : > { %v1797_v49 = vsel %vm5972_vm0, %v1789_v36, %v1781_v39  ;;  %vm5979_vm14 = vmmov %vm5968_vm12 }
 0x5ea   : > { %2174 = vrot.lane.b32.xlu2 %v4816_v62, %s2966_s6  ;;  %2166 = vrot.lane.b32.xlu1 %v4820_v41, %s2966_s6 }
 0x5eb   : > { %1866 = vrot.lane.b32.xlu0 %v4800_v60, %s2965_s5 }
 0x5ef   : > { %v2031_v50 = vpop.permute.xlu1 %2030 }
 0x5f0   : > { %v4830_v35 = vsel %vm5964_vm9, %v2023_v4, %v2031_v50  ;;  %v2040_v2 = vsel %vm5966_vm11, %v2031_v50, %v2023_v4  ;;  %v1793_v50 = vsel %vm5969_vm8, %v1781_v39, %v1789_v36 }
 0x5f1   : > { %5965 = vst [vmem:[#allocation17_spill] sm:$0xff] %v4830_v35  ;;  %v4837_v27 = vsel %vm5967_vm10, %v4830_v35, %v2016_v47  ;;  %v4842_v48 = vsel %vm5968_vm12, %v4810_v22, %v2040_v2  ;;  %v2009_v2 = vpop.permute.xlu2 %2008 }
 0x5f2   : > { %2295 = vperm.xlu2 %2857, %v4412_v29   ;;  %2259 = vperm.xlu1 %2856, %v4401_v18  }
 0x5f3   : > { %2190 = vrot.lane.b32.xlu0 %v4820_v41, %s2965_s5 }
 0x5f7   : > { %v1805_v10 = vpop.permute.xlu1 %1804 }
 0x5f8   : > { %v1821_v4 = vsel %vm5970_vm2, %v1813_v12, %v1805_v10  ;;  %v1817_v29 = vsel %vm5971_vm1, %v1805_v10, %v1813_v12  ;;  %vm5990_vm2 = vmmov %vm5979_vm14 }
 0x5f9   : > { %v4854_v47 = vsel %vm3357_vm4, %v1821_v4, %v1793_v50  ;;  %vm5973_vm4 = vmmov %vm5967_vm10  ;;  %v4874_v1 = vsel %vm3353_vm3, %v1817_v29, %v1797_v49  ;;  %v2033_v10 = vpop.permute.xlu2 %2032 }
 0x5fa   : > { %2198 = vrot.lane.b32.xlu1 %v4816_v62, %s2965_s5  ;;  %1844 = vrot.lane.b32.xlu2 %v4854_v47, %s2966_s6  ;;  %vm5974_vm7 = vmmov %vm5973_vm4 }
 0x5fb   : > { %2091 = vperm.xlu0 %2855, %v4401_v18   ;;  %2858 = vset.pattern.permute.xlu1 %v5895_v54  ;;  %vm5978_vm3 = vmmov %vm5973_vm4 }
 0x5fc   : > { %vm5985_vm9 = vmmov %vm5978_vm3 }
 0x5fd   : > { %vm5986_vm11 = vmmov %vm5978_vm3 }
 0x5fe   : > { %vm5987_vm10 = vmmov %vm5975_vm13 }
 0x5ff   : > { %v2001_v41 = vpop.permute.xlu1 %2000  ;;  %vm5988_vm12 = vmmov %vm5987_vm10 }
 0x600   : > { %v4868_v35 = vsel %vm5973_vm4, %v2001_v41, %v2009_v2  ;;  %v2017_v62 = vsel %vm5974_vm7, %v2009_v2, %v2001_v41  ;;  %vm5989_vm8 = vmmov %vm5978_vm3 }
 0x601   : > { %vm5991_vm1 = vmmov %vm5987_vm10 }
 0x602   : > { %1868 = vrot.lane.b32.xlu2 %v4854_v47, %s2965_s5  ;;  %1836 = vrot.lane.b32.xlu1 %v4874_v1, %s2966_s6  ;;  %vm5992_vm0 = vmmov %vm5991_vm1 }
 0x603   : > { %2331 = vperm.xlu0 %2855, %v4321_v5   ;;  %v4899_v5 = vsel %vm3385_vm5, %v1793_v50, %v1821_v4  ;;  %vm5983_vm5 = vmmov %vm5978_vm3 }
 0x604   : > { %5981 = vst [vmem:[#allocation44_spill] sm:$0xff] %v4899_v5  ;;  %vm5993_vm4 = vmmov %vm5978_vm3 }
 0x605   : > { %vm5994_vm7 = vmmov %vm5990_vm2 }
 0x607   : > { %v2025_v39 = vpop.permute.xlu1 %2024 }
 0x608   : > { %v4883_v12 = vsel %vm5975_vm13, %v2025_v39, %v2033_v10  ;;  %v2041_v41 = vsel %vm5977_vm15, %v2033_v10, %v2025_v39  ;;  %v1947_v10 = vmul.f32 %v4562_v44, %v4676_v21  ;;  %vm5995_vm13 = vmmov %vm5978_vm3 }
 0x609   : > { %5976 = vst [vmem:[#allocation30_spill] sm:$0xff] %v4883_v12  ;;  %v4890_v40 = vsel %vm5978_vm3, %v4883_v12, %v2017_v62  ;;  %v4895_v36 = vsel %vm5979_vm14, %v4868_v35, %v2041_v41  ;;  %v4908_v62 = vsel %vm3393_vm6, %v1797_v49, %v1817_v29  ;;  %vm5984_vm6 = vmmov %vm5978_vm3  ;;  %v1946_v12 = vmul.f32 %v4562_v44, %v4680_v26 }
 0x60a   : > { %5980 = vst [vmem:[#allocation4_spill] sm:$0xff] %v4895_v36  ;;  %2176 = vrot.lane.b32.xlu2 %v4899_v5, %s2966_s6  ;;  %1860 = vrot.lane.b32.xlu1 %v4874_v1, %s2965_s5  ;;  %vm5996_vm15 = vmmov %vm5978_vm3 }
 0x60b   : > { %2860 = vset.pattern.permute.xlu0 %v5902_v0  ;;  %5982 = vst [vmem:[#allocation49_spill] sm:$0xff] %v4908_v62  ;;  %vm5997_vm14 = vmmov %vm5978_vm3 }
 0x60c   : > { %v1855_v2 = vpop.permute.xlu2 %1854 }
 0x612   : > { %2200 = vrot.lane.b32.xlu2 %v4899_v5, %s2965_s5  ;;  %2168 = vrot.lane.b32.xlu1 %v4908_v62, %s2966_s6  ;;  %s5550_s6 = scalar_lea.vmem %s5575_s4, %s2752_s7 }
 0x614   : > { %v2171_v42 = vpop.permute.xlu2 %2170 }
 0x61a   : > { %2291 = vperm.xlu2 %2857, %v4401_v18   ;;  %2192 = vrot.lane.b32.xlu1 %v4908_v62, %s2965_s5 }
 0x61c   : > { %v2195_v50 = vpop.permute.xlu2 %2194 }
 0x622   : > { %2859 = vset.pattern.permute.xlu2 %v5895_v54  ;;  %2335 = vperm.xlu1 %2858, %v4313_v20  }
 0x623   : > { %2323 = vperm.xlu2 %2859, %v4329_v8  }
 0x624   : > { %v1857_v17 = vpop.permute.xlu2 %1856  ;;  %v1839_v4 = vpop.permute.xlu1 %1838 }
 0x625   : > { %v1831_v29 = vpop.permute.xlu0 %1830 }
 0x626   : > { %v1846_v49 = vsel %vm5983_vm5, %v1831_v29, %v1839_v4  ;;  %v1850_v21 = vsel %vm5986_vm11, %v1839_v4, %v1831_v29  ;;  %v2075_v4 = vmul.f32 %v4558_v3, %v4696_v9  ;;  %vm5998_vm5 = vmmov %vm5992_vm0 }
 0x627   : > { %v1915_v18 = vmul.f32 %v4552_v34, %v1846_v49  ;;  %vm6001_vm11 = vmmov %vm5990_vm2 }
 0x629   : > { %v1955_v39 = vadd.f32 %v1947_v10, %v1915_v18 }
 0x62a   : > { %2327 = vperm.xlu1 %2858, %v4339_v56  }
 0x62b   : > { %2862 = vset.pattern.permute.xlu2 %v5902_v0 }
 0x62c   : > { %v2165_v54 = vpop.permute.xlu2 %2164  ;;  %v2163_v20 = vpop.permute.xlu1 %2162 }
 0x62d   : > { %v1863_v41 = vpop.permute.xlu0 %1862  ;;  %v4929_v8 = vsel %vm5984_vm6, %v2163_v20, %v2171_v42  ;;  %v2182_v62 = vsel %vm5985_vm9, %v2171_v42, %v2163_v20  ;;  %vm5999_vm6 = vmmov %vm5992_vm0 }
 0x62e   : > { %v1870_v10 = vsel %vm5987_vm10, %v1855_v2, %v1863_v41  ;;  %v1874_v56 = vsel %vm5988_vm12, %v1863_v41, %v1855_v2  ;;  %v2074_v41 = vmul.f32 %v4558_v3, %v4703_v57  ;;  %vm6000_vm9 = vmmov %vm5978_vm3 }
 0x62f   : > { %v1878_v18 = vsel %vm5989_vm8, %v1870_v10, %v1850_v21  ;;  %v1887_v5 = vsel %vm5990_vm2, %v1846_v49, %v1874_v56  ;;  %v1978_v36 = vmul.f32 %v4568_v61, %v1870_v10  ;;  %vm6002_vm10 = vmmov %vm5992_vm0 }
 0x630   : > { %v1914_v42 = vmul.f32 %v4552_v34, %v1878_v18  ;;  %v1979_v20 = vmul.f32 %v4568_v61, %v1887_v5  ;;  %v1949_v5 = vmul.f32 %v4560_v32, %v4738_v46  ;;  %vm6003_vm12 = vmmov %vm5992_vm0 }
 0x631   : > { %vm6004_vm8 = vmmov %vm5978_vm3 }
 0x632   : > { %v1954_v29 = vadd.f32 %v1946_v12, %v1914_v42  ;;  %v1987_v2 = vadd.f32 %v1979_v20, %v1955_v39  ;;  %2861 = vset.pattern.permute.xlu1 %v5902_v0  ;;  %v1557_v39 = vpop.f32.mrf.mxu1  ;;  %v1516_v42 = vpop.f32.mrf.mxu0 }
 0x634   : > { %v1986_v49 = vadd.f32 %v1978_v36, %v1954_v29  ;;  %v2189_v21 = vpop.permute.xlu2 %2188  ;;  %v2187_v56 = vpop.permute.xlu1 %2186  ;;  %v4953_v44 = vadd.f32 %v2075_v4, %v1987_v2 }
 0x635   : > { %v4957_v34 = vsel %vm5991_vm1, %v2187_v56, %v2195_v50  ;;  %v2206_v9 = vsel %vm5992_vm0, %v2195_v50, %v2187_v56  ;;  %vm6006_vm1 = vmmov %vm5978_vm3 }
 0x636   : > { %v4964_v61 = vsel %vm5993_vm4, %v4957_v34, %v2182_v62  ;;  %v4966_v0 = vadd.f32 %v2074_v41, %v1986_v49  ;;  %v4971_v3 = vsel %vm5994_vm7, %v4929_v8, %v2206_v9  ;;  %v1948_v9 = vmul.f32 %v4560_v32, %v4742_v37  ;;  %vm6007_vm0 = vmmov %vm6006_vm1 }
 0x637   : > { %vm6008_vm4 = vmmov %vm5998_vm5 }
 0x638   : > { %vm6009_vm7 = vmmov %vm6008_vm4 }
 0x63c   : > { %v4973_v57 = vpop.permute.xlu2 %1858  ;;  %v1841_v26 = vpop.permute.xlu1 %1840 }
 0x63d   : > { %v1833_v12 = vpop.permute.xlu0 %1832 }
 0x63e   : > { %v1847_v36 = vsel %vm5995_vm13, %v1833_v12, %v1841_v26  ;;  %v1851_v2 = vsel %vm5997_vm14, %v1841_v26, %v1833_v12  ;;  %v2077_v26 = vmul.f32 %v4574_v16, %v4760_v31  ;;  %vm6010_vm13 = vmmov %vm6007_vm0 }
 0x63f   : > { %v1917_v62 = vmul.f32 %v4556_v63, %v1847_v36  ;;  %vm6019_vm14 = vmmov %vm6007_vm0 }
 0x641   : > { %v1957_v50 = vadd.f32 %v1949_v5, %v1917_v62 }
 0x644   : > { %v4980_v10 = vpop.permute.xlu2 %2174  ;;  %v2173_v18 = vpop.permute.xlu1 %2172 }
 0x645   : > { %v1865_v20 = vpop.permute.xlu0 %1864  ;;  %v2179_v4 = vsel %vm5996_vm15, %v2165_v54, %v2173_v18  ;;  %v2183_v29 = vsel %vm5978_vm3, %v2173_v18, %v2165_v54  ;;  %v1560_v18 = vpop.f32.mrf.mxu1  ;;  %vm6011_vm15 = vmmov %vm5990_vm2 }
 0x646   : > { %v1871_v46 = vsel %vm5998_vm5, %v1857_v17, %v1865_v20  ;;  %v1875_v41 = vsel %vm5999_vm6, %v1865_v20, %v1857_v17  ;;  %v2076_v20 = vmul.f32 %v4574_v16, %v4777_v19  ;;  %v1609_v16 = vadd.f32 %v4528_v55, %v1516_v42  ;;  %v1519_v19 = vpop.f32.mrf.mxu0  ;;  %vm6012_vm3 = vmmov %vm6007_vm0 }
 0x647   : > { %v1880_v49 = vsel %vm6000_vm9, %v1871_v46, %v1851_v2  ;;  %v1889_v56 = vsel %vm6001_vm11, %v1847_v36, %v1875_v41  ;;  %v1980_v62 = vmul.f32 %v4572_v45, %v1871_v46  ;;  %vm6020_vm5 = vmmov %vm6008_vm4 }
 0x648   : > { %v1916_v54 = vmul.f32 %v4556_v63, %v1880_v49  ;;  %v1981_v5 = vmul.f32 %v4572_v45, %v1889_v56  ;;  %v2141_v63 = vmul.f32 %v4644_v30, %v4782_v59  ;;  %vm6023_vm6 = vmmov %vm6007_vm0 }
 0x649   : > { %vm6031_vm9 = vmmov %vm6007_vm0 }
 0x64a   : > { %v1956_v12 = vadd.f32 %v1948_v9, %v1916_v54  ;;  %v1989_v17 = vadd.f32 %v1981_v5, %v1957_v50  ;;  %v2245_v9 = vmul.f32 %v4652_v28, %v2179_v4  ;;  %vm6037_vm11 = vmmov %vm6007_vm0 }
 0x64c   : > { %v1988_v2 = vadd.f32 %v1980_v62, %v1956_v12  ;;  %v2085_v36 = vadd.f32 %v2077_v26, %v1989_v17  ;;  %v5005_v41 = vpop.permute.xlu2 %2295  ;;  %v2714_v26 = vmul.f32 -1.442695, %v1609_v16 }
 0x64d   : > { %v2197_v32 = vpop.permute.xlu0 %2196 }
 0x64e   : > { %v2084_v37 = vadd.f32 %v2076_v20, %v1988_v2  ;;  %v2117_v49 = vadd.f32 %v4594_v43, %v2085_v36  ;;  %v5012_v31 = vsel %vm6002_vm10, %v2189_v21, %v2197_v32  ;;  %v2207_v45 = vsel %vm6003_vm12, %v2197_v32, %v2189_v21  ;;  %v1563_v20 = vpop.f32.mrf.mxu1  ;;  %vm6038_vm10 = vmmov %vm6008_vm4 }
 0x64f   : > { %v2212_v50 = vsel %vm6004_vm8, %v5012_v31, %v2183_v29  ;;  %v2221_v59 = vsel %vm5990_vm2, %v2179_v4, %v2207_v45  ;;  %v2140_v43 = vmul.f32 %v4644_v30, %v4770_v7  ;;  %v1610_v21 = vadd.f32 %v4528_v55, %v1557_v39  ;;  %v1522_v39 = vpop.f32.mrf.mxu0  ;;  %vm6039_vm12 = vmmov %vm6008_vm4 }
 0x650   : > { %v2116_v46 = vadd.f32 %v4592_v53, %v2084_v37  ;;  %v2149_v56 = vadd.f32 %v2141_v63, %v2117_v49  ;;  %v2244_v5 = vmul.f32 %v4652_v28, %v2212_v50  ;;  %v2309_v29 = vmul.f32 %v5005_v41, %v2221_v59  ;;  %vm6040_vm8 = vmmov %vm6007_vm0 }
 0x651   : > { %v2715_v53 = vmul.f32 -1.442695, %v1610_v21  ;;  %2898 = vpow2.f32 %v2714_v26  ;;  %v1611_v2 = vadd.f32 %v4542_v33, %v1519_v19 }
 0x652   : > { %v2253_v54 = vadd.f32 %v2245_v9, %v2149_v56  ;;  %v2148_v42 = vadd.f32 %v2140_v43, %v2116_v46  ;;  %v1950_v46 = vmul.f32 %v4554_v11, %v4796_v14 }
 0x653   : > { %2900 = vpow2.f32 %v2715_v53  ;;  %v2716_v19 = vmul.f32 -1.442695, %v1611_v2  ;;  %v6013_v2 = vld [vmem:[#allocation12_spill] sm:$0xff] }
 0x654   : > { %v2252_v12 = vadd.f32 %v2244_v5, %v2148_v42  ;;  %v5029_v62 = vpop.permute.xlu2 %1844  ;;  %v1843_v17 = vpop.permute.xlu1 %1842  ;;  %v2285_v30 = vadd.f32 %v4752_v58, %v2253_v54  ;;  %v2079_v42 = vmul.f32 %v4586_v13, %v4810_v22 }
 0x655   : > { %v1835_v7 = vpop.permute.xlu0 %1834  ;;  %2902 = vpow2.f32 %v2716_v19 }
 0x656   : > { %v5033_v4 = vadd.f32 %v4756_v25, %v2252_v12  ;;  %v5035_v55 = vadd.f32 %v2309_v29, %v2285_v30  ;;  %v1848_v28 = vsel %vm6006_vm1, %v1835_v7, %v1843_v17  ;;  %v1951_v25 = vmul.f32 %v4554_v11, %v4800_v60  ;;  %v1566_v60 = vpop.f32.mrf.mxu1  ;;  %vm6045_vm1 = vmmov %vm6007_vm0 }
 0x657   : > { %v1919_v36 = vmul.f32 %v4550_v24, %v1848_v28  ;;  %v2899_v37 = vpop.eup %2898  ;;  %v1852_v49 = vsel %vm6007_vm0, %v1843_v17, %v1835_v7  ;;  %v1613_v11 = vadd.f32 %v4538_v51, %v1522_v39  ;;  %v1525_v14 = vpop.f32.mrf.mxu0  ;;  %v2078_v17 = vmul.f32 %v4586_v13, %v4837_v27  ;;  %vm6048_vm0 = vmmov %vm6008_vm4 }
 0x658   : > { %6005 = vst [vmem:[#allocation31_spill] sm:$0xff] %v5035_v55  ;;  %v5063_v54 = vadd.f32 1.0, %v2899_v37  ;;  %v1614_v7 = vadd.f32 %v4538_v51, %v1563_v20  ;;  %v1615_v13 = vadd.f32 %v4535_v23, %v1525_v14  ;;  %v2143_v27 = vmul.f32 %v4616_v6, %v4842_v48  ;;  %v6014_v20 = vld [vmem:[#allocation17_spill] sm:$0xff] }
 0x659   : > { %v2901_v43 = vpop.eup %2900  ;;  %v1959_v56 = vadd.f32 %v1951_v25, %v1919_v36  ;;  %v2142_v37 = vmul.f32 %v4616_v6, %v6014_v20  ;;  %v6015_v25 = vld [vmem:[#allocation36_spill] sm:$0xff] }
 0x65a   : > { %v5069_v29 = vadd.f32 1.0, %v2901_v43  ;;  %2904 = vrcp.f32 %v5063_v54  ;;  %v2720_v48 = vmul.f32 -1.442695, %v1615_v13  ;;  %v6018_v43 = vld [vmem:[#allocation15_spill] sm:$0xff]  ;;  %v6026_v13 = vld [vmem:[#allocation33_spill] sm:$0xff] }
 0x65c   : > { %v5041_v63 = vpop.permute.xlu2 %1868  ;;  %v5043_v58 = vpop.permute.xlu1 %2166  ;;  %2906 = vrcp.f32 %v5069_v29 }
 0x65d   : > { %v1867_v32 = vpop.permute.xlu0 %1866  ;;  %v5085_v53 = vsel %vm6012_vm3, %v5043_v58, %v4980_v10 }
 0x65e   : > { %v1872_v45 = vsel %vm6008_vm4, %v4973_v57, %v1867_v32  ;;  %v1876_v16 = vsel %vm6009_vm7, %v1867_v32, %v4973_v57  ;;  %v1612_v57 = vadd.f32 %v4542_v33, %v1560_v18  ;;  %v2718_v32 = vmul.f32 -1.442695, %v1613_v11  ;;  %v6021_v11 = vld [vmem:[#allocation3_spill] sm:$0xff]  ;;  %vm6051_vm7 = vmmov %vm5990_vm2 }
 0x65f   : > { %v1882_v50 = vsel %vm6010_vm13, %v1872_v45, %v1852_v49  ;;  %v1891_v59 = vsel %vm6011_vm15, %v1848_v28, %v1876_v16  ;;  %v1982_v26 = vmul.f32 %v4546_v15, %v1872_v45  ;;  %v6016_v16 = vld [vmem:[#allocation19_spill] sm:$0xff] }
 0x660   : > { %v1918_v9 = vmul.f32 %v4550_v24, %v1882_v50  ;;  %v1983_v21 = vmul.f32 %v4546_v15, %v1891_v59  ;;  %v1616_v24 = vadd.f32 %v4535_v23, %v1566_v60  ;;  %v2717_v15 = vmul.f32 -1.442695, %v1612_v57  ;;  %v2903_v50 = vpop.eup %2902  ;;  %v6017_v59 = vld [vmem:[#allocation45_spill] sm:$0xff] }
 0x661   : > { %v2247_v19 = vmul.f32 %v6016_v16, %v5085_v53  ;;  %v2719_v23 = vmul.f32 -1.442695, %v1614_v7  ;;  %v2279_v60 = vmul.f32 %v6018_v43, %v6017_v59 }
 0x662   : > { %v1958_v5 = vadd.f32 %v1950_v46, %v1918_v9  ;;  %v1991_v12 = vadd.f32 %v1983_v21, %v1959_v56  ;;  %v2721_v51 = vmul.f32 -1.442695, %v1616_v24  ;;  %2908 = vpow2.f32 %v2717_v15  ;;  %v5101_v9 = vpop.eup %2904  ;;  %v6022_v24 = vld [vmem:[#allocation11_spill] sm:$0xff] }
 0x663   : > { %2910 = vpow2.f32 %v2718_v32  ;;  %v5133_v32 = vadd.f32 1.0, %v2903_v50 }
 0x664   : > { %v1990_v30 = vadd.f32 %v1982_v26, %v1958_v5  ;;  %v2087_v33 = vadd.f32 %v2079_v42, %v1991_v12  ;;  %v5075_v18 = vpop.permute.xlu2 %2176  ;;  %v5077_v22 = vpop.permute.xlu1 %2259  ;;  %2912 = vpow2.f32 %v2721_v51  ;;  %v2184_v5 = vsel %vm6019_vm14, %v4980_v10, %v5043_v58  ;;  %v6024_v10 = vld [vmem:[#allocation46_spill] sm:$0xff]  ;;  %v6027_v51 = vld [vmem:[#allocation48_spill] sm:$0xff] }
 0x665   : > { %v5087_v39 = vpop.permute.xlu0 %2190  ;;  %v5109_v42 = vpop.eup %2906  ;;  %2914 = vpow2.f32 %v2719_v23  ;;  %v6025_v58 = vld [vmem:[#allocation14_spill] sm:$0xff]  ;;  %v2278_v20 = vmul.f32 %v6018_v43, %v6027_v51 }
 0x666   : > { %v2086_v28 = vadd.f32 %v2078_v17, %v1990_v30  ;;  %v2119_v36 = vadd.f32 %v6013_v2, %v2087_v33  ;;  %2916 = vpow2.f32 %v2720_v48  ;;  %v2138_v7 = vmul.f32 %v6025_v58, %v6024_v10 }
 0x667   : > { %2918 = vrcp.f32 %v5133_v32 }
 0x668   : > { %v2118_v49 = vadd.f32 %v6015_v25, %v2086_v28  ;;  %v2151_v45 = vadd.f32 %v2143_v27, %v2119_v36  ;;  %v2909_v33 = vpop.eup %2908  ;;  %v2139_v27 = vmul.f32 %v6025_v58, %v6026_v13 }
 0x669   : > { %v2911_v36 = vpop.eup %2910 }
 0x66a   : > { %v2255_v46 = vadd.f32 %v2247_v19, %v2151_v45  ;;  %v2150_v56 = vadd.f32 %v2142_v37, %v2118_v49  ;;  %v2913_v25 = vpop.eup %2912  ;;  %v6028_v49 = vld [vmem:[#allocation29_spill] sm:$0xff]  ;;  %v5147_v43 = vadd.f32 1.0, %v2911_v36  ;;  %v6034_v36 = vld [vmem:[#allocation26_spill] sm:$0xff] }
 0x66b   : > { %v2243_v45 = vmul.f32 %v6028_v49, %v4929_v8  ;;  %v2915_v48 = vpop.eup %2914 }
 0x66c   : > { %v5103_v6 = vpop.permute.xlu2 %2200  ;;  %v5105_v21 = vpop.permute.xlu1 %2198  ;;  %v5107_v57 = vadd.f32 %v2279_v60, %v2255_v46  ;;  %v6029_v60 = vld [vmem:[#allocation47_spill] sm:$0xff]  ;;  %vm1714_vm14 = vweird.f32 %v5147_v43 }
 0x66d   : > { %v2092_v26 = vpop.permute.xlu0 %2091  ;;  %v5119_v12 = vsel %vm6020_vm5, %v5087_v39, %v5105_v21  ;;  %v2917_v59 = vpop.eup %2916  ;;  %v2274_v46 = vmul.f32 %v5077_v22, %v6029_v60  ;;  %vm1655_vm5 = vweird.f32 %v5101_v9 }
 0x66e   : > { %v2106_v14 = vmul.f32 %v2092_v26, %v6021_v11  ;;  %v2107_v17 = vmul.f32 %v2092_v26, %v6022_v24  ;;  %v2214_v30 = vsel %vm6023_vm6, %v5119_v12, %v2184_v5  ;;  %v5151_v26 = vadd.f32 1.0, %v2913_v25  ;;  %v6030_v11 = vld [vmem:[#allocation10_spill] sm:$0xff]  ;;  %vm6052_vm6 = vmmov %vm6045_vm1 }
 0x66f   : > { %v2246_v15 = vmul.f32 %v6016_v16, %v2214_v30  ;;  %v2242_v16 = vmul.f32 %v6028_v49, %v4964_v61  ;;  %v1665_v30 = vmul.f32 %v5109_v42, %v5069_v29  ;;  %v5163_v10 = vadd.f32 1.0, %v2917_v59 }
 0x670   : > { %v2114_v28 = vadd.f32 %v2106_v14, %v4966_v0  ;;  %v2115_v2 = vadd.f32 %v2107_v17, %v4953_v44  ;;  %v1650_v44 = vmul.f32 %v5101_v9, %v5063_v54  ;;  %v5143_v0 = vadd.f32 1.0, %v2909_v33 }
 0x671   : > { %v2254_v37 = vadd.f32 %v2246_v15, %v2150_v56  ;;  %v2275_v14 = vmul.f32 %v5077_v22, %v6030_v11  ;;  %v5160_v33 = vadd.f32 1.0, %v2915_v48  ;;  %v1666_v13 = vsub.f32 1.0, %v1665_v30  ;;  %v6036_v48 = vld [vmem:[#allocation13_spill] sm:$0xff] }
 0x672   : > { %v2146_v19 = vadd.f32 %v2138_v7, %v2114_v28  ;;  %v2147_v23 = vadd.f32 %v2139_v27, %v2115_v2  ;;  %2920 = vrcp.f32 %v5143_v0  ;;  %v6032_v27 = vld [vmem:[#allocation7_spill] sm:$0xff]  ;;  %v6033_v28 = vld [vmem:[#allocation28_spill] sm:$0xff]  ;;  %v1952_v11 = vmul.f32 %v6036_v48, %v4874_v1  ;;  %v6042_v1 = vld [vmem:[#allocation6_spill] sm:$0xff] }
 0x673   : > { %v5145_v50 = vadd.f32 %v2278_v20, %v2254_v37  ;;  %2922 = vrcp.f32 %v5147_v43  ;;  %v2112_v2 = vmul.f32 %v6033_v28, %v6032_v27  ;;  %v5179_v20 = vpop.eup %2918  ;;  %v6035_v37 = vld [vmem:[#allocation39_spill] sm:$0xff]  ;;  %v2081_v27 = vmul.f32 %v6042_v1, %v4868_v35 }
 0x674   : > { %v2292_v8 = vpop.permute.xlu2 %2291  ;;  %v1837_v56 = vpop.permute.xlu1 %1836  ;;  %v2250_v5 = vadd.f32 %v2242_v16, %v2146_v19  ;;  %v2251_v61 = vadd.f32 %v2243_v45, %v2147_v23  ;;  %2924 = vrcp.f32 %v5151_v26  ;;  %v2113_v25 = vmul.f32 %v6033_v28, %v6035_v37  ;;  %v6047_v16 = vld [vmem:[#allocation30_spill] sm:$0xff] }
 0x675   : > { %v2306_v24 = vmul.f32 %v2292_v8, %v4957_v34  ;;  %v2307_v17 = vmul.f32 %v2292_v8, %v4971_v3  ;;  %v1849_v34 = vsel %vm6031_vm9, %v1837_v56, %v5029_v62  ;;  %v1651_v3 = vsub.f32 1.0, %v1650_v44  ;;  %vm6053_vm9 = vmmov %vm6048_vm0 }
 0x676   : > { %v2282_v15 = vadd.f32 %v2274_v46, %v2250_v5  ;;  %v2283_v58 = vadd.f32 %v2275_v14, %v2251_v61  ;;  %2926 = vrcp.f32 %v5160_v33  ;;  %v1921_v51 = vmul.f32 %v6034_v36, %v1849_v34 }
 0x677   : > { %2928 = vrcp.f32 %v5163_v10  ;;  %v1652_v45 = vmul.f32 %v5101_v9, %v1651_v3  ;;  %v1953_v44 = vmul.f32 %v6036_v48, %v4854_v47  ;;  %v1853_v59 = vsel %vm6037_vm11, %v5029_v62, %v1837_v56  ;;  %vm6054_vm11 = vmmov %vm6048_vm0 }
 0x678   : > { %v5169_v22 = vadd.f32 %v2306_v24, %v2282_v15  ;;  %v5172_v7 = vadd.f32 %v2307_v17, %v2283_v58  ;;  %v5186_v23 = vpop.eup %2920  ;;  %v1667_v61 = vmul.f32 %v5109_v42, %v1666_v13  ;;  %v6041_v24 = vld [vmem:[#allocation20_spill] sm:$0xff]  ;;  %v1680_v37 = vmul.f32 %v5179_v20, %v5133_v32 }
 0x679   : > { %v5199_v8 = vpop.eup %2922  ;;  %v1961_v14 = vadd.f32 %v1953_v44, %v1921_v51  ;;  %v5216_v15 = vadd.f32 %v5101_v9, %v1652_v45  ;;  %v2080_v44 = vmul.f32 %v6042_v1, %v4890_v40  ;;  %v1720_v3 = vand.u32 2147483648, %v5147_v43 }
 0x67a   : > { %v5207_v56 = vpop.eup %2924  ;;  %v5233_v48 = vadd.f32 %v5109_v42, %v1667_v61  ;;  %vm1729_vm4 = vweird.f32 %v5160_v33  ;;  %vm1715_vm13 = vweird.f32 %v5199_v8  ;;  %vm1744_vm15 = vweird.f32 %v5163_v10 }
 0x67b   : > { %v1755_v45 = vmul.f32 %v5207_v56, %v5151_v26  ;;  %vm1760_vm3 = vweird.f32 %v5207_v56 }
 0x67c   : > { %v1861_v49 = vpop.permute.xlu1 %1860  ;;  %v5213_v30 = vpop.eup %2926 }
 0x67d   : > { %v1873_v60 = vsel %vm6038_vm10, %v1861_v49, %v5041_v63  ;;  %v1877_v46 = vsel %vm6039_vm12, %v5041_v63, %v1861_v49  ;;  %v5221_v13 = vpop.eup %2928  ;;  %v1695_v49 = vmul.f32 %v5186_v23, %v5143_v0  ;;  %vm6056_vm10 = vmmov %vm6045_vm1 }
 0x67e   : > { %v1884_v5 = vsel %vm6040_vm8, %v1873_v60, %v1853_v59  ;;  %v1893_v47 = vsel %vm5990_vm2, %v1849_v34, %v1877_v46  ;;  %v1710_v46 = vmul.f32 %v5199_v8, %v5147_v43  ;;  %vm6057_vm12 = vmmov %vm5990_vm2  ;;  %vm1685_vm8 = vweird.f32 %v5179_v20 }
 0x67f   : > { %v1920_v63 = vmul.f32 %v6034_v36, %v1884_v5  ;;  %v1985_v17 = vmul.f32 %v6041_v24, %v1893_v47  ;;  %v1984_v36 = vmul.f32 %v6041_v24, %v1873_v60  ;;  %v1725_v5 = vmul.f32 %v5213_v30, %v5160_v33 }
 0x680   : > { %v1740_v47 = vmul.f32 %v5221_v13, %v5163_v10  ;;  %v1696_v62 = vsub.f32 1.0, %v1695_v49  ;;  %vm1730_vm2 = vweird.f32 %v5213_v30 }
 0x681   : > { %v1960_v28 = vadd.f32 %v1952_v11, %v1920_v63  ;;  %v1993_v51 = vadd.f32 %v1985_v17, %v1961_v14  ;;  %v1735_v11 = vand.u32 2147483648, %v5160_v33  ;;  %v6043_v14 = vld [vmem:[#allocation4_spill] sm:$0xff]  ;;  %v6044_v63 = vld [vmem:[#allocation5_spill] sm:$0xff] }
 0x682   : > { %v2145_v24 = vmul.f32 %v6044_v63, %v6043_v14  ;;  %v2144_v19 = vmul.f32 %v6044_v63, %v6047_v16  ;;  %v6049_v14 = vld [vmem:[#allocation44_spill] sm:$0xff]  ;;  %v1741_v55 = vsub.f32 1.0, %v1740_v47 }
 0x683   : > { %v1992_v59 = vadd.f32 %v1984_v36, %v1960_v28  ;;  %v2089_v60 = vadd.f32 %v2081_v27, %v1993_v51  ;;  %v6046_v27 = vld [vmem:[#allocation41_spill] sm:$0xff]  ;;  %v1756_v36 = vsub.f32 1.0, %v1755_v45  ;;  %v1681_v51 = vsub.f32 1.0, %v1680_v37  ;;  %v6050_v45 = vld [vmem:[#allocation38_spill] sm:$0xff] }
 0x684   : > { %v2169_v61 = vpop.permute.xlu1 %2168  ;;  %v2281_v37 = vmul.f32 %v6050_v45, %v6049_v14  ;;  %v5262_v16 = vor.u32 1.1754944e-38, %v1735_v11  ;;  %v1742_v11 = vmul.f32 %v5221_v13, %v1741_v55  ;;  %v2332_v14 = vpop.permute.xlu0 %2331 }
 0x685   : > { %v2088_v40 = vadd.f32 %v2080_v44, %v1992_v59  ;;  %v2121_v17 = vadd.f32 %v2113_v25, %v2089_v60  ;;  %v2181_v1 = vsel %vm6045_vm1, %v2169_v61, %v5075_v18  ;;  %v2208_v25 = vsel %vm6048_vm0, %v5105_v21, %v5087_v39 }
 0x686   : > { %v2249_v28 = vmul.f32 %v6046_v27, %v2181_v1  ;;  %v1711_v44 = vsub.f32 1.0, %v1710_v46  ;;  %v1726_v59 = vsub.f32 1.0, %v1725_v5  ;;  %v1733_v60 = vand.u32 2147483647, %v5160_v33 }
 0x687   : > { %v2120_v34 = vadd.f32 %v2112_v2, %v2088_v40  ;;  %v2153_v58 = vadd.f32 %v2145_v24, %v2121_v17  ;;  %v1757_v2 = vmul.f32 %v5207_v56, %v1756_v36  ;;  %v5266_v63 = vmul.f32 %v5179_v20, %v1681_v51  ;;  %v6055_v24 = vld [vmem:[#allocation18_spill] sm:$0xff]  ;;  %v6061_v51 = vld [vmem:[#allocation49_spill] sm:$0xff] }
 0x688   : > { %v5269_v39 = vmul.f32 %v5186_v23, %v1696_v62  ;;  %v2223_v21 = vsel %vm6051_vm7, %v5085_v53, %v2208_v25  ;;  %v1748_v5 = vand.u32 2147483647, %v5163_v10  ;;  %v2185_v53 = vsel %vm6052_vm6, %v5075_v18, %v2169_v61 }
 0x689   : > { %v2257_v49 = vadd.f32 %v2249_v28, %v2153_v58  ;;  %v2152_v35 = vadd.f32 %v2144_v19, %v2120_v34  ;;  %v1712_v58 = vmul.f32 %v5199_v8, %v1711_v44  ;;  %v1727_v34 = vmul.f32 %v5213_v30, %v1726_v59 }
 0x68a   : > { %v2311_v40 = vmul.f32 %v6055_v24, %v2223_v21  ;;  %v1758_v18 = vadd.f32 %v5207_v56, %v1757_v2  ;;  %vm5300_vm1 = vcmp.eq.f32.partialorder %v1733_v60, 8.507059e+37  ;;  %vm1654_vm0 = vweird.f32 %v5063_v54 }
 0x68b   : > { %v2289_v19 = vadd.f32 %v2281_v37, %v2257_v49  ;;  %vm1759_vm7 = vweird.f32 %v5151_v26  ;;  %v1728_v52 = vadd.f32 %v5213_v30, %v1727_v34  ;;  %v1765_v36 = vand.u32 2147483648, %v5151_v26 }
 0x68c   : > { %v2193_v46 = vpop.permute.xlu1 %2192  ;;  %v2310_v25 = vmul.f32 %v6055_v24, %v5119_v12  ;;  %v1743_v59 = vadd.f32 %v5221_v13, %v1742_v11  ;;  %v2319_v37 = vadd.f32 %v2311_v40, %v5107_v57  ;;  %vm1669_vm6 = vweird.f32 %v5069_v29 }
 0x68d   : > { %v2205_v62 = vsel %vm6053_vm9, %v2193_v46, %v5103_v6  ;;  %v2209_v47 = vsel %vm6054_vm11, %v5103_v6, %v2193_v46  ;;  %v6060_v6 = vld [vmem:[#allocation8_spill] sm:$0xff]  ;;  %vm1745_vm11 = vweird.f32 %v5221_v13  ;;  %vm1699_vm9 = vweird.f32 %v5143_v0 }
 0x68e   : > { %v2216_v17 = vsel %vm6056_vm10, %v2205_v62, %v2185_v53  ;;  %v2225_v28 = vsel %vm6057_vm12, %v2181_v1, %v2209_v47  ;;  %v1763_v1 = vand.u32 2147483647, %v5151_v26  ;;  %vm1684_vm10 = vweird.f32 %v5133_v32  ;;  %vm5322_vm12 = vmor %vm1759_vm7, %vm1760_vm3 }
 0x68f   : > { %v2248_v55 = vmul.f32 %v6046_v27, %v2216_v17  ;;  %v2313_v38 = vmul.f32 %v6060_v6, %v2225_v28  ;;  %v2280_v27 = vmul.f32 %v6050_v45, %v6061_v51  ;;  %v1713_v26 = vadd.f32 %v5199_v8, %v1712_v58  ;;  %vm5338_vm3 = vmor %vm1729_vm4, %vm1730_vm2 }
 0x690   : > { %v1750_v12 = vand.u32 2147483648, %v5163_v10  ;;  %v2318_v49 = vadd.f32 %v2310_v25, %v5145_v50  ;;  %v2312_v57 = vmul.f32 %v6060_v6, %v2205_v62  ;;  %v1732_v58 = vsel %vm5338_vm3, %v5213_v30, %v1728_v52  ;;  %vm5351_vm7 = vmor %vm1744_vm15, %vm1745_vm11 }
 0x691   : > { %v2256_v44 = vadd.f32 %v2248_v55, %v2152_v35  ;;  %v1762_v35 = vsel %vm5322_vm12, %v5207_v56, %v1758_v18  ;;  %v2321_v21 = vadd.f32 %v2313_v38, %v2289_v19  ;;  %vm5355_vm4 = vcmp.eq.f32.partialorder %v1748_v5, 8.507059e+37  ;;  %vm5366_vm15 = vmor %vm1714_vm14, %vm1715_vm13  ;;  %v2728_v56 = vld [vmem:[%s5572_s1 + $0xd0] sm:$0xff] }
 0x692   : > { %vm1764_vm2 = vcmp.eq.f32.partialorder %v1763_v1, 8.507059e+37  ;;  %v1766_v50 = vor.u32 1.1754944e-38, %v1765_v36  ;;  %v2343_v19 = vadd.f32 %v2332_v14, %v2319_v37  ;;  %v1747_v30 = vsel %vm5351_vm7, %v5221_v13, %v1743_v59  ;;  %vm5388_vm13 = vmor %vm1654_vm0, %vm1655_vm5 }
 0x693   : > { %v2288_v2 = vadd.f32 %v2280_v27, %v2256_v44  ;;  %v1751_v5 = vor.u32 1.1754944e-38, %v1750_v12  ;;  %v1683_v47 = vadd.f32 %v5179_v20, %v5266_v63  ;;  %v1698_v11 = vadd.f32 %v5186_v23, %v5269_v39  ;;  %vm5408_vm5 = vmor %vm1684_vm10, %vm1685_vm8 }
 0x694   : > { %v2336_v34 = vpop.permute.xlu1 %2335  ;;  %v1767_v62 = vsel %vm1764_vm2, %v1766_v50, %v1762_v35  ;;  %v1717_v13 = vsel %vm5366_vm15, %v5199_v8, %v1713_v26  ;;  %v2342_v24 = vadd.f32 %v2332_v14, %v2318_v49  ;;  %v1721_v28 = vor.u32 1.1754944e-38, %v1720_v3  ;;  %v6088_v35 = vld [vmem:[#allocation31_spill] sm:$0xff]  ;;  %v2729_v50 = vld [vmem:[%s5572_s1 + $0xd8] sm:$0xff] }
 0x695   : > { %v2320_v46 = vadd.f32 %v2312_v57, %v2288_v2  ;;  %v2345_v53 = vadd.f32 %v2336_v34, %v2321_v21  ;;  %v1737_v18 = vsel %vm5300_vm1, %v5262_v16, %v1732_v58  ;;  %v1752_v8 = vsel %vm5355_vm4, %v1751_v5, %v1747_v30 }
 0x696   : > { %v1705_v39 = vand.u32 2147483648, %v5143_v0  ;;  %v2308_v3 = vmul.f32 %v5005_v41, %v5012_v31  ;;  %v6074_v55 = vand.u32 2147483647, %v5147_v43  ;;  %v5399_v16 = vmul.f32 %v2343_v19, %v1737_v18  ;;  %v2324_v31 = vpop.permute.xlu2 %2323  ;;  %v2942_v18 = vld [vmem:[%s5574_s3 + $0x28] sm:$0xff] }
 0x697   : > { %v2344_v40 = vadd.f32 %v2336_v34, %v2320_v46  ;;  %v5377_v17 = vmul.f32 %v2345_v53, %v1767_v62  ;;  %v1675_v41 = vand.u32 2147483648, %v5069_v29  ;;  %v1687_v43 = vsel %vm5408_vm5, %v5179_v20, %v1683_v47 }
 0x698   : > { %vm1719_vm14 = vcmp.eq.f32.partialorder %v6074_v55, 8.507059e+37  ;;  %v6077_v52 = vand.u32 2147483647, %v5133_v32  ;;  %vm6080_vm0 = vweird.f32 %v5186_v23  ;;  %vm6083_vm11 = vweird.f32 %v5109_v42 }
 0x699   : > { %v5401_v61 = vmul.f32 %v2344_v40, %v1752_v8  ;;  %2411 = vmatpush.msra.mxu3 %v5377_v17  ;;  %v1722_v38 = vsel %vm1719_vm14, %v1721_v28, %v1717_v13  ;;  %vm5426_vm8 = vmor %vm1699_vm9, %vm6080_vm0  ;;  %v6086_v27 = vand.u32 2147483648, %v5133_v32  ;;  %v2316_v59 = vadd.f32 %v2308_v3, %v5033_v4  ;;  %v2943_v3 = vld [vmem:[%s5574_s3 + $0x30] sm:$0xff] }
 0x69a   : > { %vm5418_vm1 = vcmp.eq.f32.partialorder %v6077_v52, 8.507059e+37  ;;  %v5430_v51 = vmul.f32 %v2342_v24, %v1722_v38  ;;  %vm5436_vm10 = vmor %vm1669_vm6, %vm6083_vm11  ;;  %v1702_v44 = vsel %vm5426_vm8, %v5186_v23, %v1698_v11  ;;  %v1657_v60 = vsel %vm5388_vm13, %v5101_v9, %v5216_v15  ;;  %v2944_v38 = vld [vmem:[%s5574_s3 + $0x20] sm:$0xff] }
 0x69b   : > { %2382 = vmatpush.msra.mxu2 %v5401_v61  ;;  %2412 = vmatpush.msra.mxu3 %v5399_v16  ;;  %v1691_v25 = vor.u32 1.1754944e-38, %v6086_v27  ;;  %v1672_v26 = vsel %vm5436_vm10, %v5109_v42, %v5233_v48  ;;  %v6087_v14 = vand.u32 2147483647, %v5143_v0  ;;  %v1706_v32 = vor.u32 1.1754944e-38, %v1705_v39 }
 0x69c   : > { %v2328_v37 = vpop.permute.xlu1 %2327  ;;  %v2338_v12 = vadd.f32 %v2324_v31, %v5169_v22  ;;  %v2339_v23 = vadd.f32 %v2324_v31, %v5172_v7  ;;  %v6089_v9 = vand.u32 2147483648, %v5063_v54  ;;  %v1676_v49 = vor.u32 1.1754944e-38, %v1675_v41 }
 0x69d   : > { %vm1704_vm6 = vcmp.eq.f32.partialorder %v6087_v14, 8.507059e+37  ;;  %v2340_v4 = vadd.f32 %v2328_v37, %v2316_v59  ;;  %v2341_v45 = vadd.f32 %v2328_v37, %v6088_v35  ;;  %2383 = vmatpush.msra.mxu2 %v5430_v51  ;;  %v1692_v42 = vsel %vm5418_vm1, %v1691_v25, %v1687_v43  ;;  %v2945_v43 = vld [vmem:[%s5574_s3 + $0x38] sm:$0xff] }
 0x69e   : > { %v1661_v15 = vor.u32 1.1754944e-38, %v6089_v9  ;;  %v1707_v0 = vsel %vm1704_vm6, %v1706_v32, %v1702_v44  ;;  %v6090_v48 = vand.u32 2147483647, %v5063_v54  ;;  %v6091_v22 = vand.u32 2147483647, %v5069_v29  ;;  %v2726_v54 = vld [vmem:[%s5572_s1 + $0xc0] sm:$0xff] }
 0x69f   : > { %v5470_v7 = vmul.f32 %v2340_v4, %v1692_v42  ;;  %v5472_v57 = vmul.f32 %v2341_v45, %v1707_v0  ;;  %vm6092_vm3 = vcmask 261120   ;;  %v2727_v29 = vld [vmem:[%s5572_s1 + $0xc8] sm:$0xff]  ;;  %v6100_v6 = vmov 6   ;;  %v2741_v4 = vld [vmem:[%s5572_s1 + $0xf8] sm:$0xff] }
 0x6a0   : > { %vm1659_vm9 = vcmp.eq.f32.partialorder %v6090_v48, 8.507059e+37  ;;  %vm1674_vm12 = vcmp.eq.f32.partialorder %v6091_v22, 8.507059e+37  ;;  %vm6093_vm7 = vmmov %vm6092_vm3  ;;  %v6109_v42 = vld [vmem:[#allocation25_spill] sm:$0xff]  ;;  %v6110_v48 = vld [vmem:[#allocation23_spill] sm:$0xff] }
 0x6a1   : > { %v1662_v2 = vsel %vm1659_vm9, %v1661_v15, %v1657_v60  ;;  %v1677_v21 = vsel %vm1674_vm12, %v1676_v49, %v1672_v26  ;;  %2384 = vmatpush.msra.mxu2 %v5470_v7  ;;  %2413 = vmatpush.msra.mxu3 %v5472_v57  ;;  %vm6094_vm4 = vmmov %vm6092_vm3 }
 0x6a2   : > { %v5474_v58 = vmul.f32 %v2338_v12, %v1662_v2  ;;  %v5476_v33 = vmul.f32 %v2339_v23, %v1677_v21  ;;  %vm6095_vm2 = vmmov %vm6092_vm3 }
 0x6a3   : > { %vm6096_vm15 = vmmov %vm6095_vm2 }
 0x6a4   : > { %2385 = vmatpush.msra.mxu2 %v5474_v58  ;;  %2414 = vmatpush.msra.mxu3 %v5476_v33  ;;  %vm6097_vm13 = vmmov %vm6095_vm2 }
 0x6a5   : > { %2730 = vmatmul.msk.f32.vlgmr.msra.gmra.mxu2 %vm6092_vm3, %v2726_v54  ;;  %2734 = vmatmul.msk.f32.vlgmr.msra.gmra.mxu3 %vm6093_vm7, %v2726_v54  ;;  %vm6098_vm14 = vmmov %vm6095_vm2 }
 0x6a6   : > { %vm6099_vm5 = vmmov %vm6095_vm2 }
 0x6a7   : > { %vm6101_vm1 = vmmov %vm6095_vm2 }
 0x6a8   : > { %vm6102_vm0 = vmmov %vm6101_vm1 }
 0x6a9   : > { %vm6103_vm8 = vmmov %vm6102_vm0 }
 0x6aa   : > { %vm6104_vm11 = vmmov %vm6102_vm0 }
 0x6ab   : > { %vm6105_vm10 = vmmov %vm6102_vm0 }
 0x6ac   : > { %vm6106_vm6 = vmmov %vm6102_vm0 }
 0x6ad   : > { %2731 = vmatmul.msk.f32.gmra.mxu2 %vm6094_vm4, %v2727_v29  ;;  %2735 = vmatmul.msk.f32.gmra.mxu3 %vm6095_vm2, %v2727_v29  ;;  %vm6107_vm9 = vmmov %vm6102_vm0  ;;  %v6112_v29 = vld [vmem:[#allocation40_spill] sm:$0xff] }
 0x6ae   : > { %vm6108_vm12 = vmmov %vm6102_vm0 }
 0x6b5   : > { %2732 = vmatmul.msk.f32.gmra.mxu2 %vm6096_vm15, %v2728_v56  ;;  %2736 = vmatmul.msk.f32.gmra.mxu3 %vm6097_vm13, %v2728_v56 }
 0x6bd   : > { %2733 = vmatmul.msk.f32.gmra.mxu2 %vm6098_vm14, %v2729_v50  ;;  %2737 = vmatmul.msk.f32.gmra.mxu3 %vm6099_vm5, %v2729_v50 }
 0x728   : > { %v2387_v34 = vpop.f32.mrf.mxu2  ;;  %v2416_v19 = vpop.f32.mrf.mxu3 }
 0x729   : > { %v2428_v24 = vadd.f32 %v2416_v19, %v2387_v34 }
 0x730   : > { %v2390_v30 = vpop.f32.mrf.mxu2  ;;  %v2419_v46 = vpop.f32.mrf.mxu3 }
 0x731   : > { %v2431_v53 = vadd.f32 %v2419_v46, %v2390_v30 }
 0x733   : > { %2432 = vadd.xlane.f32.xlu0 %v2431_v53  ;;  %v6113_v53 = vld [vmem:[#allocation32_spill] sm:$0xff] }
 0x738   : > { %v2393_v10 = vpop.f32.mrf.mxu2  ;;  %v2422_v5 = vpop.f32.mrf.mxu3 }
 0x739   : > { %v2434_v62 = vadd.f32 %v2422_v5, %v2393_v10  ;;  %v6114_v5 = vld [vmem:[#allocation37_spill] sm:$0xff] }
 0x73b   : > { %2435 = vadd.xlane.f32.xlu2 %v2434_v62 }
 0x740   : > { %v2396_v47 = vpop.f32.mrf.mxu2  ;;  %v2425_v11 = vpop.f32.mrf.mxu3 }
 0x741   : > { %v2437_v13 = vadd.f32 %v2425_v11, %v2396_v47 }
 0x743   : > { %2438 = vadd.xlane.f32.xlu1 %v2437_v13 }
 0x74b   : > { %2429 = vadd.xlane.f32.xlu1 %v2428_v24 }
 0x7a6   : > { %v2433_v40 = vpop.xlane.xlu0 %2432 }
 0x7a7   : > { %v2441_v28 = vmul.f32 0.00390625, %v2433_v40 }
 0x7a9   : > { %v2445_v63 = vadd.f32 %v2942_v18, %v2441_v28  ;;  %v6115_v28 = vld [vmem:[#allocation2_spill] sm:$0xff] }
 0x7ab   : > { %2455 = vperm.xlu1 %2861, %v2445_v63   ;;  %v6116_v63 = vld [vmem:[#allocation9_spill] sm:$0xff] }
 0x7ae   : > { %v2436_v8 = vpop.xlane.xlu2 %2435 }
 0x7af   : > { %v2442_v39 = vmul.f32 0.00390625, %v2436_v8 }
 0x7b1   : > { %v2446_v55 = vadd.f32 %v2943_v3, %v2442_v39 }
 0x7b3   : > { %2460 = vperm.xlu0 %2860, %v2446_v55   ;;  %2863 = vset.pattern.permute.xlu1 %v6100_v6 }
 0x7b4   : > { %2481 = vperm.xlu1 %2863, %v2944_v38  }
 0x7b6   : > { %v2439_v41 = vpop.xlane.xlu1 %2438 }
 0x7b7   : > { %v2443_v31 = vmul.f32 0.00390625, %v2439_v41 }
 0x7b9   : > { %v2447_v52 = vadd.f32 %v2945_v43, %v2443_v31 }
 0x7bb   : > { %2465 = vperm.xlu2 %2862, %v2447_v52   ;;  %2865 = vset.pattern.permute.xlu0 %v6100_v6 }
 0x7bc   : > { %2489 = vperm.xlu1 %2863, %v2943_v3  }
 0x7be   : > { %v2430_v1 = vpop.xlane.xlu1 %2429 }
 0x7bf   : > { %v2440_v36 = vmul.f32 0.00390625, %v2430_v1 }
 0x7c1   : > { %v2444_v20 = vadd.f32 %v2944_v38, %v2440_v36 }
 0x7c3   : > { %2450 = vperm.xlu2 %2862, %v2444_v20  }
 0x7cb   : > { %2864 = vset.pattern.permute.xlu2 %v6100_v6 }
 0x7cc   : > { %2485 = vperm.xlu2 %2864, %v2942_v18  }
 0x7d4   : > { %2493 = vperm.xlu2 %2864, %v2945_v43  }
 0x815   : > { %v2466_v27 = vpop.permute.xlu2 %2465 }
 0x816   : > { %v2474_v25 = vmul.f32 %v2466_v27, %v5401_v61  ;;  %v2475_v44 = vmul.f32 %v2466_v27, %v5377_v17  ;;  %v2738_v17 = vld [vmem:[%s5572_s1 + $0xe0] sm:$0xff] }
 0x818   : > { %2520 = vmatpush.msrb.mxu2 %v2474_v25  ;;  %2549 = vmatpush.msrb.mxu3 %v2475_v44 }
 0x81d   : > { %v2456_v59 = vpop.permute.xlu1 %2455  ;;  %v2451_v32 = vpop.permute.xlu2 %2450 }
 0x81e   : > { %v2470_v37 = vmul.f32 %v2456_v59, %v5470_v7  ;;  %v2471_v12 = vmul.f32 %v2456_v59, %v5472_v57  ;;  %v2468_v23 = vmul.f32 %v2451_v32, %v5474_v58  ;;  %v2469_v61 = vmul.f32 %v2451_v32, %v5476_v33  ;;  %v6111_v33 = vld [vmem:[#allocation35_spill] sm:$0xff] }
 0x825   : > { %v2461_v60 = vpop.permute.xlu0 %2460 }
 0x826   : > { %v2472_v26 = vmul.f32 %v2461_v60, %v5430_v51  ;;  %v2473_v14 = vmul.f32 %v2461_v60, %v5399_v16  ;;  %v2739_v16 = vld [vmem:[%s5572_s1 + $0xe8] sm:$0xff]  ;;  %v2740_v51 = vld [vmem:[%s5572_s1 + $0xf0] sm:$0xff]  ;;  %v2482_v35 = vpop.permute.xlu1 %2481  ;;  %v2486_v7 = vpop.permute.xlu2 %2485 }
 0x828   : > { %2521 = vmatpush.msrb.mxu2 %v2472_v26  ;;  %2550 = vmatpush.msrb.mxu3 %v2473_v14 }
 0x82a   : > { %2522 = vmatpush.msrb.mxu2 %v2470_v37  ;;  %2551 = vmatpush.msrb.mxu3 %v2471_v12 }
 0x82c   : > { %2523 = vmatpush.msrb.mxu2 %v2468_v23  ;;  %2552 = vmatpush.msrb.mxu3 %v2469_v61 }
 0x82d   : > { %2742 = vmatmul.msk.f32.vlgmr.msrb.gmra.mxu2 %vm6101_vm1, %v2738_v17  ;;  %2746 = vmatmul.msk.f32.vlgmr.msrb.gmra.mxu3 %vm6102_vm0, %v2738_v17 }
 0x82e   : > { %v2490_v50 = vpop.permute.xlu1 %2489  ;;  %v2494_v47 = vpop.permute.xlu2 %2493 }
 0x835   : > { %2743 = vmatmul.msk.f32.gmra.mxu2 %vm6103_vm8, %v2739_v16  ;;  %2747 = vmatmul.msk.f32.gmra.mxu3 %vm6104_vm11, %v2739_v16 }
 0x83d   : > { %2744 = vmatmul.msk.f32.gmra.mxu2 %vm6105_vm10, %v2740_v51  ;;  %2748 = vmatmul.msk.f32.gmra.mxu3 %vm6106_vm6, %v2740_v51 }
 0x845   : > { %2745 = vmatmul.msk.f32.gmra.mxu2 %vm6107_vm9, %v2741_v4  ;;  %2749 = vmatmul.msk.f32.gmra.mxu3 %vm6108_vm12, %v2741_v4 }
 0x8b0   : > { %v2525_v45 = vpop.f32.mrf.mxu2  ;;  %v2554_v9 = vpop.f32.mrf.mxu3 }
 0x8b1   : > { %v2526_v15 = vadd.f32 %v2525_v45, %v2482_v35  ;;  %v2555_v49 = vadd.f32 %v2554_v9, %v2482_v35 }
 0x8b3   : > { %v2566_v0 = vadd.f32 %v2526_v15, %v6109_v42  ;;  %v2567_v22 = vadd.f32 %v2555_v49, %v6110_v48 }
 0x8b5   : > { %2574 = vst [vmem:[%s5550_s6] sm:$0xff] %v2566_v0 }
 0x8b6   : > { %2575 = vst [vmem:[%s5550_s6 + $0x8] sm:$0xff] %v2567_v22 }
 0x8b8   : > { %v2528_v57 = vpop.f32.mrf.mxu2  ;;  %v2557_v2 = vpop.f32.mrf.mxu3 }
 0x8b9   : > { %v2529_v21 = vadd.f32 %v2528_v57, %v2486_v7  ;;  %v2558_v58 = vadd.f32 %v2557_v2, %v2486_v7 }
 0x8bb   : > { %v2568_v54 = vadd.f32 %v2529_v21, %v6111_v33  ;;  %v2569_v56 = vadd.f32 %v2558_v58, %v6112_v29 }
 0x8bd   : > { %2576 = vst [vmem:[%s5550_s6 + $0x10] sm:$0xff] %v2568_v54 }
 0x8be   : > { %2577 = vst [vmem:[%s5550_s6 + $0x18] sm:$0xff] %v2569_v56 }
 0x8c0   : > { %v2531_v34 = vpop.f32.mrf.mxu2  ;;  %v2560_v19 = vpop.f32.mrf.mxu3 }
 0x8c1   : > { %v2532_v30 = vadd.f32 %v2531_v34, %v2490_v50  ;;  %v2561_v46 = vadd.f32 %v2560_v19, %v2490_v50 }
 0x8c3   : > { %v2570_v10 = vadd.f32 %v2532_v30, %v6113_v53  ;;  %v2571_v62 = vadd.f32 %v2561_v46, %v6114_v5 }
 0x8c5   : > { %2578 = vst [vmem:[%s5550_s6 + $0x20] sm:$0xff] %v2570_v10 }
 0x8c6   : > { %2579 = vst [vmem:[%s5550_s6 + $0x28] sm:$0xff] %v2571_v62 }
 0x8c8   : > { %v2534_v11 = vpop.f32.mrf.mxu2  ;;  %v2563_v13 = vpop.f32.mrf.mxu3 }
 0x8c9   : > { %v2535_v24 = vadd.f32 %v2534_v11, %v2494_v47  ;;  %v2564_v40 = vadd.f32 %v2563_v13, %v2494_v47 }
 0x8cb   : > { %v2572_v18 = vadd.f32 %v2535_v24, %v6115_v28  ;;  %v2573_v8 = vadd.f32 %v2564_v40, %v6116_v63 }
 0x8cd   : > { %2580 = vst [vmem:[%s5550_s6 + $0x30] sm:$0xff] %v2572_v18 }
 0x8ce   : > { %2581 = vst [vmem:[%s5550_s6 + $0x38] sm:$0xff] %v2573_v8 }
 0x8cf PF: > { %s14_s15 = sadd.s32 1, %s2952_s15  }
 0x8d0   : > { %p11_p4 = scmp.ge.s32.totalorder %s14_s15, 4  }
 0x8d2   :  { %13 = sbr.rel (!%p11_p4) target bundleno = 1 (0x1), region = 69 }

</bundles_post_ra>
